<compile_context>
chip_gen: v7x
topology: tpu7x:2x2x1
jax: 0.10.0
libtpu: 0.0.40
codegen_flags: <defaults>
</compile_context>

<pallas_src>
import functools

import jax
import jax.numpy as jnp
from jax import lax
from jax.experimental import pallas as pl
from jax.experimental.pallas import tpu as pltpu


# ---------------------------------------------------------------------------
# elementwise helpers (exact-erf GELU; |erf error| < ~2e-7)
# ---------------------------------------------------------------------------
def _erf(x):
    a1, a2, a3, a4, a5 = 0.254829592, -0.284496736, 1.421413741, -1.453152027, 1.061405429
    p = 0.3275911
    s = jnp.where(x < 0.0, -1.0, 1.0)
    ax = jnp.abs(x)
    d = 1.0 + p * ax
    r = pl.reciprocal(d, approx=True)     # EUP slot
    t = r * (2.0 - d * r)                 # one Newton step -> ~f32-exact 1/d
    poly = ((((a5 * t + a4) * t + a3) * t + a2) * t + a1) * t
    return s * (1.0 - poly * jnp.exp(-ax * ax))


def _gelu_exact(x):
    # PyTorch nn.GELU() default (erf form)
    return 0.5 * x * (1.0 + _erf(x * 0.7071067811865476))


# ---------------------------------------------------------------------------
# precomputed spatial-tap masks (grid-invariant, constant-folded by XLA)
# rows ordered j = (dy+1)*3 + (dx+1); row 4 (center) is all ones.
# yy uses % H so per-image edges stay correct after folding B into lanes.
# ---------------------------------------------------------------------------
def _make_tap_masks(B, H, W):
    BN = B * H * W
    p = jnp.arange(BN, dtype=jnp.int32)
    yy = (p // W) % H
    xx = p % W
    rows = []
    for dy in (-1, 0, 1):
        for dx in (-1, 0, 1):
            ok = jnp.ones((BN,), jnp.bool_)
            if dy == 1:
                ok = ok & (yy < H - 1)
            elif dy == -1:
                ok = ok & (yy > 0)
            if dx == 1:
                ok = ok & (xx < W - 1)
            elif dx == -1:
                ok = ok & (xx > 0)
            rows.append(ok.astype(jnp.float32))
    return jnp.stack(rows, axis=0)                      # (9, B*N) f32


# ---------------------------------------------------------------------------
# fused kernel: fc1 -> depthwise Conv3d -> GELU -> fc2, per channel c
# ---------------------------------------------------------------------------
def _make_fused_kernel(W):
    def kernel(xt_ref, w1t_ref, b1_ref, masks_ref, cw_ref, cb_ref,
               w2t_ref, b2_ref, o_ref, h0_ref, hm_ref, hp_ref):
        c = pl.program_id(0)                   # channel of this slab
        K, BN = h0_ref.shape                   # hidden features, B*H*W lanes

        # ---- fc1 (transposed): (K, Fin) @ (Fin, B*N) -> (K, B*N), f32 accum --
        h = jnp.dot(w1t_ref[...], xt_ref[0],
                    preferred_element_type=jnp.float32) + b1_ref[...]

        # ---- depth (K) shifted copies, zero-padded at k=0 / k=K-1 -----------
        # Parked in VMEM scratch so the tap loop keeps only ONE (K, B*N)
        # accumulator register-resident (vreg pressure, review opt 5).
        kk = lax.broadcasted_iota(jnp.int32, (K, 1), 0)
        h0_ref[...] = h                                                    # h[k]
        hm_ref[...] = jnp.where(kk > 0, pltpu.roll(h, shift=1, axis=0), 0.0)       # h[k-1]
        hp_ref[...] = jnp.where(kk < K - 1, pltpu.roll(h, shift=K - 1, axis=0), 0.0)  # h[k+1]

        # ---- 9 spatial taps: lane rolls + precomputed masks -----------------
        # weight flat index = (dk+1)*9 + (dy+1)*3 + (dx+1)
        acc = None
        j = 0
        for dy in (-1, 0, 1):
            for dx in (-1, 0, 1):
                g = (cw_ref[c, 9 + j] * h0_ref[...]
                     + cw_ref[c, j] * hm_ref[...]
                     + cw_ref[c, 18 + j] * hp_ref[...])
                s = dy * W + dx
                if s != 0:
                    g = masks_ref[pl.ds(j, 1), :] * pltpu.roll(g, shift=(-s) % BN, axis=1)
                acc = g if acc is None else acc + g
                j += 1

        # ---- bias + GELU + fc2: (Fout, K) @ (K, B*N) -> (Fout, B*N) ----------
        v = _gelu_exact(acc + cb_ref[c])
        outT = jnp.dot(w2t_ref[...], v.astype(w2t_ref.dtype),
                       preferred_element_type=jnp.float32) + b2_ref[...]
        o_ref[0] = outT.astype(o_ref.dtype)

    return kernel


# ---------------------------------------------------------------------------
# Mlp forward
# ---------------------------------------------------------------------------
@functools.partial(jax.jit, static_argnums=(1, 2),
                   static_argnames=("compute_dtype", "out_dtype", "transpose_output"))
def mlp_forward(x, H, W, params, *, compute_dtype=jnp.bfloat16,
                out_dtype=jnp.float32, transpose_output=True):
    """x: (B, N=H*W, C, Fin) -> (B, N, C, Fout)   (module semantics).

    compute_dtype : dtype of the MXU operands (bf16 default on all TPU gens);
                    conv / GELU / accumulation always stay f32.
    out_dtype     : kernel output dtype (bf16 halves writeback if the consumer
                    tolerates it).
    transpose_output=False returns the kernel-native (C, Fout, B*N) layout so
    the final transpose can be fused into the consumer.
    """
    B, N, C, Fin = x.shape
    assert N == H * W
    BN = B * N
    w1, b1 = params["w1"], params["b1"]            # (Fin, hid), (hid,)
    cw, cb = params["conv_w"], params["conv_b"]    # (C, 3, 3, 3), (C,)
    w2, b2 = params["w2"], params["b2"]            # (hid, Fout), (Fout,)
    K, Fout = w1.shape[1], w2.shape[1]

    # Layout glue touches only the small input tensor (<=128 KiB); the hidden
    # tensor never leaves VMEM.  Lane order inside B*N is (b, n).
    xt = x.transpose(2, 3, 0, 1).reshape(C, Fin, BN).astype(compute_dtype)  # (C, Fin, B*N)
    w1t = w1.T.astype(compute_dtype)                          # (K, Fin)
    w2t = w2.T.astype(compute_dtype)                          # (Fout, K)
    b1c = b1.reshape(K, 1).astype(jnp.float32)
    b2c = b2.reshape(Fout, 1).astype(jnp.float32)
    cwf = cw.reshape(C, 27).astype(jnp.float32)               # SMEM scalars
    cbf = cb.astype(jnp.float32)
    masks = _make_tap_masks(B, H, W)                          # (9, B*N) f32, const-folded

    out_t = pl.pallas_call(
        _make_fused_kernel(W),
        out_shape=jax.ShapeDtypeStruct((C, Fout, BN), out_dtype),
        grid=(C,),
        in_specs=[
            pl.BlockSpec((1, Fin, BN), lambda c: (c, 0, 0)),   # x^T slab (per channel)
            pl.BlockSpec((K, Fin), lambda c: (0, 0)),          # W1^T (resident)
            pl.BlockSpec((K, 1), lambda c: (0, 0)),            # b1
            pl.BlockSpec((9, BN), lambda c: (0, 0)),           # tap masks (resident)
            pl.BlockSpec(memory_space=pltpu.MemorySpace.SMEM), # conv W (C, 27)
            pl.BlockSpec(memory_space=pltpu.MemorySpace.SMEM), # conv b (C,)
            pl.BlockSpec((Fout, K), lambda c: (0, 0)),         # W2^T (resident)
            pl.BlockSpec((Fout, 1), lambda c: (0, 0)),         # b2
        ],
        out_specs=pl.BlockSpec((1, Fout, BN), lambda c: (c, 0, 0)),
        scratch_shapes=[pltpu.VMEM((K, BN), jnp.float32)] * 3,  # h0, h[k-1], h[k+1]
        compiler_params=pltpu.CompilerParams(
            dimension_semantics=("parallel",)),
    )(xt, w1t, b1c, masks, cwf, cbf, w2t, b2c)

    if not transpose_output:
        return out_t                                           # (C, Fout, B*N)
    return out_t.reshape(C, Fout, B, N).transpose(2, 3, 0, 1)  # (B, N, C, Fout)


# ---------------------------------------------------------------------------
# pure-JAX reference (numerical sanity check)
# ---------------------------------------------------------------------------
def ref_forward(x, H, W, params):
    B, N, C, Fin = x.shape
    w1, b1 = params["w1"], params["b1"]
    cw, cb = params["conv_w"], params["conv_b"]
    w2, b2 = params["w2"], params["b2"]
    hid = w1.shape[1]

    h = jnp.einsum("bnci,ih->bnch", x, w1) + b1
    v = h.reshape(B, H, W, C, hid).transpose(0, 3, 4, 1, 2)
    v = lax.conv_general_dilated(
        v, cw.reshape(C, 1, 3, 3, 3), (1, 1, 1), [(1, 1)] * 3,
        dimension_numbers=("NCDHW", "OIDHW", "NCDHW"), feature_group_count=C)
    v = v + cb[None, :, None, None, None]
    v = v.transpose(0, 3, 4, 1, 2).reshape(B, N, C, hid)
    v = jax.nn.gelu(v, approximate=False)
    return jnp.einsum("bnch,ho->bnco", v, w2) + b2


if __name__ == "__main__":
    key = jax.random.PRNGKey(0)
    B, Hs, Ws, C = 2, 16, 16, 4            # batch, spatial H/W, channels (DWConv dim)
    Fin, hid, Fout = 16, 32, 16            # in_features, hidden_features, out_features
    N = Hs * Ws                            # 256; lane dim B*N = 512 (multiple of 128)

    ks = jax.random.split(key, 6)
    x = jax.random.normal(ks[0], (B, N, C, Fin), jnp.float32)

    # Deterministic synthetic params (trunc_normal(std=0.02) approximated by
    # scaled normal; linear biases zero as in _init_weights; conv default-ish).
    params = dict(
        w1=jax.random.normal(ks[1], (Fin, hid), jnp.float32) * 0.02,
        b1=jnp.zeros((hid,), jnp.float32),
        conv_w=jax.random.normal(ks[2], (C, 3, 3, 3), jnp.float32) * (1.0 / 27.0 ** 0.5),
        conv_b=jax.random.normal(ks[3], (C,), jnp.float32) * 0.05,
        w2=jax.random.normal(ks[4], (hid, Fout), jnp.float32) * 0.02,
        b2=jnp.zeros((Fout,), jnp.float32),
    )

    ref = ref_forward(x, Hs, Ws, params)

    # f32 MXU-operand path (tight numerical check)
    out_f32 = jax.block_until_ready(
        mlp_forward(x, Hs, Ws, params, compute_dtype=jnp.float32))
    assert out_f32.shape == (B, N, C, Fout)
    err = float(jnp.max(jnp.abs(out_f32 - ref)))
    assert err < 1e-3, f"f32 max abs err {err}"

    # default path: bf16 MXU operands, f32 accumulation/conv/GELU, f32 output
    out = jax.block_until_ready(mlp_forward(x, Hs, Ws, params))
    assert out.shape == (B, N, C, Fout)
    err_bf16 = float(jnp.max(jnp.abs(out - ref)))
    assert err_bf16 < 2.5e-3, f"bf16 max abs err {err_bf16}"

    # bf16 output (half the writeback, review opt 8) — looser accuracy budget
    out_bf16 = jax.block_until_ready(
        mlp_forward(x, Hs, Ws, params, out_dtype=jnp.bfloat16))
    assert bool(jnp.isfinite(out_bf16.astype(jnp.float32)).all())
    err_obf = float(jnp.max(jnp.abs(out_bf16.astype(jnp.float32) - ref)))
    assert err_obf < 8e-3, f"bf16-out max abs err {err_obf}"

    print("KERNEL_OK")
</pallas_src>

<mosaic_0001>
module attributes {stable_mosaic.version = 11 : i64} {
  func.func @kernel(%arg0: i32, %arg1: memref<1x16x512xf32, #tpu.memory_space<vmem>>, %arg2: memref<32x16xf32, #tpu.memory_space<vmem>>, %arg3: memref<32x1xf32, #tpu.memory_space<vmem>>, %arg4: memref<9x512xf32, #tpu.memory_space<vmem>>, %arg5: memref<4x27xf32, #tpu.memory_space<smem>>, %arg6: memref<4xf32, #tpu.memory_space<smem>>, %arg7: memref<16x32xf32, #tpu.memory_space<vmem>>, %arg8: memref<16x1xf32, #tpu.memory_space<vmem>>, %arg9: memref<1x16x512xf32, #tpu.memory_space<vmem>>, %arg10: memref<32x512xf32, #tpu.memory_space<vmem>>, %arg11: memref<32x512xf32, #tpu.memory_space<vmem>>, %arg12: memref<32x512xf32, #tpu.memory_space<vmem>>) attributes {dimension_semantics = [#tpu.dimension_semantics<parallel>], iteration_bounds = array<i64: 4>, scalar_prefetch = 0 : i64, scratch_operands = 3 : i64, tpu.core_type = #tpu.core_type<tc>, window_params = [{transform_indices = @transform_0, window_bounds = array<i64: 1, 16, 512>}, {pipeline_mode = #tpu.pipeline_mode<synchronous>, transform_indices = @transform_1, window_bounds = array<i64: 32, 16>}, {pipeline_mode = #tpu.pipeline_mode<synchronous>, transform_indices = @transform_2, window_bounds = array<i64: 32, 1>}, {pipeline_mode = #tpu.pipeline_mode<synchronous>, transform_indices = @transform_3, window_bounds = array<i64: 9, 512>}, {transform_indices = @transform_4, window_bounds = array<i64: 4, 27>}, {transform_indices = @transform_5, window_bounds = array<i64: 4>}, {pipeline_mode = #tpu.pipeline_mode<synchronous>, transform_indices = @transform_6, window_bounds = array<i64: 16, 32>}, {pipeline_mode = #tpu.pipeline_mode<synchronous>, transform_indices = @transform_7, window_bounds = array<i64: 16, 1>}, {transform_indices = @transform_8, window_bounds = array<i64: 1, 16, 512>}]} {
    %c0 = arith.constant 0 : index
    %c0_0 = arith.constant 0 : index
    %0 = vector.load %arg2[%c0, %c0_0] : memref<32x16xf32, #tpu.memory_space<vmem>>, vector<32x16xf32>
    %c0_1 = arith.constant 0 : index
    %c0_2 = arith.constant 0 : index
    %c0_3 = arith.constant 0 : index
    %1 = vector.load %arg1[%c0_1, %c0_2, %c0_3] : memref<1x16x512xf32, #tpu.memory_space<vmem>>, vector<1x16x512xf32>
    %2 = vector.shape_cast %1 : vector<1x16x512xf32> to vector<16x512xf32>
    %cst = arith.constant dense<0.000000e+00> : vector<32x512xf32>
    %3 = tpu.matmul %0, %2, %cst {dimension_numbers = #tpu.dot_dimension_numbers<[1], [0], [0], [1], [0, 0, 1, 1], [], []>} : vector<32x16xf32>, vector<16x512xf32>, vector<32x512xf32> -> vector<32x512xf32>
    %c0_4 = arith.constant 0 : index
    %c0_5 = arith.constant 0 : index
    %4 = vector.load %arg3[%c0_4, %c0_5] : memref<32x1xf32, #tpu.memory_space<vmem>>, vector<32x1xf32>
    %5 = vector.broadcast %4 : vector<32x1xf32> to vector<32x512xf32>
    %6 = arith.addf %3, %5 : vector<32x512xf32>
    %7 = tpu.iota {dimensions = array<i32: 0>} : vector<32x1xi32>
    %c0_6 = arith.constant 0 : index
    %c0_7 = arith.constant 0 : index
    %8 = vector.load %arg10[%c0_6, %c0_7] : memref<32x512xf32, #tpu.memory_space<vmem>>, vector<32x512xf32>
    tpu.vector_store %arg10[%c0_6, %c0_7], %6 {strides = array<i32>} : memref<32x512xf32, #tpu.memory_space<vmem>>, vector<32x512xf32>,
    %c0_i32 = arith.constant 0 : i32
    %9 = vector.broadcast %c0_i32 : i32 to vector<32x1xi32>
    %10 = arith.cmpi sgt, %7, %9 : vector<32x1xi32>
    %c1_i32 = arith.constant 1 : i32
    %11 = tpu.dynamic_rotate %6 by %c1_i32 dim 0 : vector<32x512xf32>, i32 -> vector<32x512xf32>
    %cst_8 = arith.constant 0.000000e+00 : f32
    %12 = vector.shape_cast %10 : vector<32x1xi1> to vector<32x1xi1>
    %13 = vector.broadcast %12 : vector<32x1xi1> to vector<32x512xi1>
    %14 = vector.broadcast %cst_8 : f32 to vector<32x512xf32>
    %15 = arith.select %13, %11, %14 : vector<32x512xi1>, vector<32x512xf32>
    %c0_9 = arith.constant 0 : index
    %c0_10 = arith.constant 0 : index
    %16 = vector.load %arg11[%c0_9, %c0_10] : memref<32x512xf32, #tpu.memory_space<vmem>>, vector<32x512xf32>
    tpu.vector_store %arg11[%c0_9, %c0_10], %15 {strides = array<i32>} : memref<32x512xf32, #tpu.memory_space<vmem>>, vector<32x512xf32>,
    %c31_i32 = arith.constant 31 : i32
    %17 = vector.broadcast %c31_i32 : i32 to vector<32x1xi32>
    %18 = arith.cmpi slt, %7, %17 : vector<32x1xi32>
    %c31_i32_11 = arith.constant 31 : i32
    %19 = tpu.dynamic_rotate %6 by %c31_i32_11 dim 0 : vector<32x512xf32>, i32 -> vector<32x512xf32>
    %cst_12 = arith.constant 0.000000e+00 : f32
    %20 = vector.shape_cast %18 : vector<32x1xi1> to vector<32x1xi1>
    %21 = vector.broadcast %20 : vector<32x1xi1> to vector<32x512xi1>
    %22 = vector.broadcast %cst_12 : f32 to vector<32x512xf32>
    %23 = arith.select %21, %19, %22 : vector<32x512xi1>, vector<32x512xf32>
    %c0_13 = arith.constant 0 : index
    %c0_14 = arith.constant 0 : index
    %24 = vector.load %arg12[%c0_13, %c0_14] : memref<32x512xf32, #tpu.memory_space<vmem>>, vector<32x512xf32>
    tpu.vector_store %arg12[%c0_13, %c0_14], %23 {strides = array<i32>} : memref<32x512xf32, #tpu.memory_space<vmem>>, vector<32x512xf32>,
    %25 = arith.index_cast %arg0 : i32 to index
    %c9 = arith.constant 9 : index
    %26 = memref.load %arg5[%25, %c9] : memref<4x27xf32, #tpu.memory_space<smem>>
    %c0_15 = arith.constant 0 : index
    %c0_16 = arith.constant 0 : index
    %27 = vector.load %arg10[%c0_15, %c0_16] : memref<32x512xf32, #tpu.memory_space<vmem>>, vector<32x512xf32>
    %28 = vector.broadcast %26 : f32 to vector<32x512xf32>
    %29 = arith.mulf %28, %27 : vector<32x512xf32>
    %30 = arith.index_cast %arg0 : i32 to index
    %c0_17 = arith.constant 0 : index
    %31 = memref.load %arg5[%30, %c0_17] : memref<4x27xf32, #tpu.memory_space<smem>>
    %c0_18 = arith.constant 0 : index
    %c0_19 = arith.constant 0 : index
    %32 = vector.load %arg11[%c0_18, %c0_19] : memref<32x512xf32, #tpu.memory_space<vmem>>, vector<32x512xf32>
    %33 = vector.broadcast %31 : f32 to vector<32x512xf32>
    %34 = arith.mulf %33, %32 : vector<32x512xf32>
    %35 = arith.addf %29, %34 : vector<32x512xf32>
    %36 = arith.index_cast %arg0 : i32 to index
    %c18 = arith.constant 18 : index
    %37 = memref.load %arg5[%36, %c18] : memref<4x27xf32, #tpu.memory_space<smem>>
    %c0_20 = arith.constant 0 : index
    %c0_21 = arith.constant 0 : index
    %38 = vector.load %arg12[%c0_20, %c0_21] : memref<32x512xf32, #tpu.memory_space<vmem>>, vector<32x512xf32>
    %39 = vector.broadcast %37 : f32 to vector<32x512xf32>
    %40 = arith.mulf %39, %38 : vector<32x512xf32>
    %41 = arith.addf %35, %40 : vector<32x512xf32>
    %c0_22 = arith.constant 0 : index
    %c0_23 = arith.constant 0 : index
    %42 = vector.load %arg4[%c0_22, %c0_23] : memref<9x512xf32, #tpu.memory_space<vmem>>, vector<1x512xf32>
    %c17_i32 = arith.constant 17 : i32
    %43 = tpu.dynamic_rotate %41 by %c17_i32 dim 1 : vector<32x512xf32>, i32 -> vector<32x512xf32>
    %44 = vector.broadcast %42 : vector<1x512xf32> to vector<32x512xf32>
    %45 = arith.mulf %44, %43 : vector<32x512xf32>
    %46 = arith.index_cast %arg0 : i32 to index
    %c10 = arith.constant 10 : index
    %47 = memref.load %arg5[%46, %c10] : memref<4x27xf32, #tpu.memory_space<smem>>
    %c0_24 = arith.constant 0 : index
    %c0_25 = arith.constant 0 : index
    %48 = vector.load %arg10[%c0_24, %c0_25] : memref<32x512xf32, #tpu.memory_space<vmem>>, vector<32x512xf32>
    %49 = vector.broadcast %47 : f32 to vector<32x512xf32>
    %50 = arith.mulf %49, %48 : vector<32x512xf32>
    %51 = arith.index_cast %arg0 : i32 to index
    %c1 = arith.constant 1 : index
    %52 = memref.load %arg5[%51, %c1] : memref<4x27xf32, #tpu.memory_space<smem>>
    %c0_26 = arith.constant 0 : index
    %c0_27 = arith.constant 0 : index
    %53 = vector.load %arg11[%c0_26, %c0_27] : memref<32x512xf32, #tpu.memory_space<vmem>>, vector<32x512xf32>
    %54 = vector.broadcast %52 : f32 to vector<32x512xf32>
    %55 = arith.mulf %54, %53 : vector<32x512xf32>
    %56 = arith.addf %50, %55 : vector<32x512xf32>
    %57 = arith.index_cast %arg0 : i32 to index
    %c19 = arith.constant 19 : index
    %58 = memref.load %arg5[%57, %c19] : memref<4x27xf32, #tpu.memory_space<smem>>
    %c0_28 = arith.constant 0 : index
    %c0_29 = arith.constant 0 : index
    %59 = vector.load %arg12[%c0_28, %c0_29] : memref<32x512xf32, #tpu.memory_space<vmem>>, vector<32x512xf32>
    %60 = vector.broadcast %58 : f32 to vector<32x512xf32>
    %61 = arith.mulf %60, %59 : vector<32x512xf32>
    %62 = arith.addf %56, %61 : vector<32x512xf32>
    %c1_30 = arith.constant 1 : index
    %c0_31 = arith.constant 0 : index
    %63 = vector.load %arg4[%c1_30, %c0_31] : memref<9x512xf32, #tpu.memory_space<vmem>>, vector<1x512xf32>
    %c16_i32 = arith.constant 16 : i32
    %64 = tpu.dynamic_rotate %62 by %c16_i32 dim 1 : vector<32x512xf32>, i32 -> vector<32x512xf32>
    %65 = vector.broadcast %63 : vector<1x512xf32> to vector<32x512xf32>
    %66 = arith.mulf %65, %64 : vector<32x512xf32>
    %67 = arith.addf %45, %66 : vector<32x512xf32>
    %68 = arith.index_cast %arg0 : i32 to index
    %c11 = arith.constant 11 : index
    %69 = memref.load %arg5[%68, %c11] : memref<4x27xf32, #tpu.memory_space<smem>>
    %c0_32 = arith.constant 0 : index
    %c0_33 = arith.constant 0 : index
    %70 = vector.load %arg10[%c0_32, %c0_33] : memref<32x512xf32, #tpu.memory_space<vmem>>, vector<32x512xf32>
    %71 = vector.broadcast %69 : f32 to vector<32x512xf32>
    %72 = arith.mulf %71, %70 : vector<32x512xf32>
    %73 = arith.index_cast %arg0 : i32 to index
    %c2 = arith.constant 2 : index
    %74 = memref.load %arg5[%73, %c2] : memref<4x27xf32, #tpu.memory_space<smem>>
    %c0_34 = arith.constant 0 : index
    %c0_35 = arith.constant 0 : index
    %75 = vector.load %arg11[%c0_34, %c0_35] : memref<32x512xf32, #tpu.memory_space<vmem>>, vector<32x512xf32>
    %76 = vector.broadcast %74 : f32 to vector<32x512xf32>
    %77 = arith.mulf %76, %75 : vector<32x512xf32>
    %78 = arith.addf %72, %77 : vector<32x512xf32>
    %79 = arith.index_cast %arg0 : i32 to index
    %c20 = arith.constant 20 : index
    %80 = memref.load %arg5[%79, %c20] : memref<4x27xf32, #tpu.memory_space<smem>>
    %c0_36 = arith.constant 0 : index
    %c0_37 = arith.constant 0 : index
    %81 = vector.load %arg12[%c0_36, %c0_37] : memref<32x512xf32, #tpu.memory_space<vmem>>, vector<32x512xf32>
    %82 = vector.broadcast %80 : f32 to vector<32x512xf32>
    %83 = arith.mulf %82, %81 : vector<32x512xf32>
    %84 = arith.addf %78, %83 : vector<32x512xf32>
    %c2_38 = arith.constant 2 : index
    %c0_39 = arith.constant 0 : index
    %85 = vector.load %arg4[%c2_38, %c0_39] : memref<9x512xf32, #tpu.memory_space<vmem>>, vector<1x512xf32>
    %c15_i32 = arith.constant 15 : i32
    %86 = tpu.dynamic_rotate %84 by %c15_i32 dim 1 : vector<32x512xf32>, i32 -> vector<32x512xf32>
    %87 = vector.broadcast %85 : vector<1x512xf32> to vector<32x512xf32>
    %88 = arith.mulf %87, %86 : vector<32x512xf32>
    %89 = arith.addf %67, %88 : vector<32x512xf32>
    %90 = arith.index_cast %arg0 : i32 to index
    %c12 = arith.constant 12 : index
    %91 = memref.load %arg5[%90, %c12] : memref<4x27xf32, #tpu.memory_space<smem>>
    %c0_40 = arith.constant 0 : index
    %c0_41 = arith.constant 0 : index
    %92 = vector.load %arg10[%c0_40, %c0_41] : memref<32x512xf32, #tpu.memory_space<vmem>>, vector<32x512xf32>
    %93 = vector.broadcast %91 : f32 to vector<32x512xf32>
    %94 = arith.mulf %93, %92 : vector<32x512xf32>
    %95 = arith.index_cast %arg0 : i32 to index
    %c3 = arith.constant 3 : index
    %96 = memref.load %arg5[%95, %c3] : memref<4x27xf32, #tpu.memory_space<smem>>
    %c0_42 = arith.constant 0 : index
    %c0_43 = arith.constant 0 : index
    %97 = vector.load %arg11[%c0_42, %c0_43] : memref<32x512xf32, #tpu.memory_space<vmem>>, vector<32x512xf32>
    %98 = vector.broadcast %96 : f32 to vector<32x512xf32>
    %99 = arith.mulf %98, %97 : vector<32x512xf32>
    %100 = arith.addf %94, %99 : vector<32x512xf32>
    %101 = arith.index_cast %arg0 : i32 to index
    %c21 = arith.constant 21 : index
    %102 = memref.load %arg5[%101, %c21] : memref<4x27xf32, #tpu.memory_space<smem>>
    %c0_44 = arith.constant 0 : index
    %c0_45 = arith.constant 0 : index
    %103 = vector.load %arg12[%c0_44, %c0_45] : memref<32x512xf32, #tpu.memory_space<vmem>>, vector<32x512xf32>
    %104 = vector.broadcast %102 : f32 to vector<32x512xf32>
    %105 = arith.mulf %104, %103 : vector<32x512xf32>
    %106 = arith.addf %100, %105 : vector<32x512xf32>
    %c3_46 = arith.constant 3 : index
    %c0_47 = arith.constant 0 : index
    %107 = vector.load %arg4[%c3_46, %c0_47] : memref<9x512xf32, #tpu.memory_space<vmem>>, vector<1x512xf32>
    %c1_i32_48 = arith.constant 1 : i32
    %108 = tpu.dynamic_rotate %106 by %c1_i32_48 dim 1 : vector<32x512xf32>, i32 -> vector<32x512xf32>
    %109 = vector.broadcast %107 : vector<1x512xf32> to vector<32x512xf32>
    %110 = arith.mulf %109, %108 : vector<32x512xf32>
    %111 = arith.addf %89, %110 : vector<32x512xf32>
    %112 = arith.index_cast %arg0 : i32 to index
    %c13 = arith.constant 13 : index
    %113 = memref.load %arg5[%112, %c13] : memref<4x27xf32, #tpu.memory_space<smem>>
    %c0_49 = arith.constant 0 : index
    %c0_50 = arith.constant 0 : index
    %114 = vector.load %arg10[%c0_49, %c0_50] : memref<32x512xf32, #tpu.memory_space<vmem>>, vector<32x512xf32>
    %115 = vector.broadcast %113 : f32 to vector<32x512xf32>
    %116 = arith.mulf %115, %114 : vector<32x512xf32>
    %117 = arith.index_cast %arg0 : i32 to index
    %c4 = arith.constant 4 : index
    %118 = memref.load %arg5[%117, %c4] : memref<4x27xf32, #tpu.memory_space<smem>>
    %c0_51 = arith.constant 0 : index
    %c0_52 = arith.constant 0 : index
    %119 = vector.load %arg11[%c0_51, %c0_52] : memref<32x512xf32, #tpu.memory_space<vmem>>, vector<32x512xf32>
    %120 = vector.broadcast %118 : f32 to vector<32x512xf32>
    %121 = arith.mulf %120, %119 : vector<32x512xf32>
    %122 = arith.addf %116, %121 : vector<32x512xf32>
    %123 = arith.index_cast %arg0 : i32 to index
    %c22 = arith.constant 22 : index
    %124 = memref.load %arg5[%123, %c22] : memref<4x27xf32, #tpu.memory_space<smem>>
    %c0_53 = arith.constant 0 : index
    %c0_54 = arith.constant 0 : index
    %125 = vector.load %arg12[%c0_53, %c0_54] : memref<32x512xf32, #tpu.memory_space<vmem>>, vector<32x512xf32>
    %126 = vector.broadcast %124 : f32 to vector<32x512xf32>
    %127 = arith.mulf %126, %125 : vector<32x512xf32>
    %128 = arith.addf %122, %127 : vector<32x512xf32>
    %129 = arith.addf %111, %128 : vector<32x512xf32>
    %130 = arith.index_cast %arg0 : i32 to index
    %c14 = arith.constant 14 : index
    %131 = memref.load %arg5[%130, %c14] : memref<4x27xf32, #tpu.memory_space<smem>>
    %c0_55 = arith.constant 0 : index
    %c0_56 = arith.constant 0 : index
    %132 = vector.load %arg10[%c0_55, %c0_56] : memref<32x512xf32, #tpu.memory_space<vmem>>, vector<32x512xf32>
    %133 = vector.broadcast %131 : f32 to vector<32x512xf32>
    %134 = arith.mulf %133, %132 : vector<32x512xf32>
    %135 = arith.index_cast %arg0 : i32 to index
    %c5 = arith.constant 5 : index
    %136 = memref.load %arg5[%135, %c5] : memref<4x27xf32, #tpu.memory_space<smem>>
    %c0_57 = arith.constant 0 : index
    %c0_58 = arith.constant 0 : index
    %137 = vector.load %arg11[%c0_57, %c0_58] : memref<32x512xf32, #tpu.memory_space<vmem>>, vector<32x512xf32>
    %138 = vector.broadcast %136 : f32 to vector<32x512xf32>
    %139 = arith.mulf %138, %137 : vector<32x512xf32>
    %140 = arith.addf %134, %139 : vector<32x512xf32>
    %141 = arith.index_cast %arg0 : i32 to index
    %c23 = arith.constant 23 : index
    %142 = memref.load %arg5[%141, %c23] : memref<4x27xf32, #tpu.memory_space<smem>>
    %c0_59 = arith.constant 0 : index
    %c0_60 = arith.constant 0 : index
    %143 = vector.load %arg12[%c0_59, %c0_60] : memref<32x512xf32, #tpu.memory_space<vmem>>, vector<32x512xf32>
    %144 = vector.broadcast %142 : f32 to vector<32x512xf32>
    %145 = arith.mulf %144, %143 : vector<32x512xf32>
    %146 = arith.addf %140, %145 : vector<32x512xf32>
    %c5_61 = arith.constant 5 : index
    %c0_62 = arith.constant 0 : index
    %147 = vector.load %arg4[%c5_61, %c0_62] : memref<9x512xf32, #tpu.memory_space<vmem>>, vector<1x512xf32>
    %c511_i32 = arith.constant 511 : i32
    %148 = tpu.dynamic_rotate %146 by %c511_i32 dim 1 : vector<32x512xf32>, i32 -> vector<32x512xf32>
    %149 = vector.broadcast %147 : vector<1x512xf32> to vector<32x512xf32>
    %150 = arith.mulf %149, %148 : vector<32x512xf32>
    %151 = arith.addf %129, %150 : vector<32x512xf32>
    %152 = arith.index_cast %arg0 : i32 to index
    %c15 = arith.constant 15 : index
    %153 = memref.load %arg5[%152, %c15] : memref<4x27xf32, #tpu.memory_space<smem>>
    %c0_63 = arith.constant 0 : index
    %c0_64 = arith.constant 0 : index
    %154 = vector.load %arg10[%c0_63, %c0_64] : memref<32x512xf32, #tpu.memory_space<vmem>>, vector<32x512xf32>
    %155 = vector.broadcast %153 : f32 to vector<32x512xf32>
    %156 = arith.mulf %155, %154 : vector<32x512xf32>
    %157 = arith.index_cast %arg0 : i32 to index
    %c6 = arith.constant 6 : index
    %158 = memref.load %arg5[%157, %c6] : memref<4x27xf32, #tpu.memory_space<smem>>
    %c0_65 = arith.constant 0 : index
    %c0_66 = arith.constant 0 : index
    %159 = vector.load %arg11[%c0_65, %c0_66] : memref<32x512xf32, #tpu.memory_space<vmem>>, vector<32x512xf32>
    %160 = vector.broadcast %158 : f32 to vector<32x512xf32>
    %161 = arith.mulf %160, %159 : vector<32x512xf32>
    %162 = arith.addf %156, %161 : vector<32x512xf32>
    %163 = arith.index_cast %arg0 : i32 to index
    %c24 = arith.constant 24 : index
    %164 = memref.load %arg5[%163, %c24] : memref<4x27xf32, #tpu.memory_space<smem>>
    %c0_67 = arith.constant 0 : index
    %c0_68 = arith.constant 0 : index
    %165 = vector.load %arg12[%c0_67, %c0_68] : memref<32x512xf32, #tpu.memory_space<vmem>>, vector<32x512xf32>
    %166 = vector.broadcast %164 : f32 to vector<32x512xf32>
    %167 = arith.mulf %166, %165 : vector<32x512xf32>
    %168 = arith.addf %162, %167 : vector<32x512xf32>
    %c6_69 = arith.constant 6 : index
    %c0_70 = arith.constant 0 : index
    %169 = vector.load %arg4[%c6_69, %c0_70] : memref<9x512xf32, #tpu.memory_space<vmem>>, vector<1x512xf32>
    %c497_i32 = arith.constant 497 : i32
    %170 = tpu.dynamic_rotate %168 by %c497_i32 dim 1 : vector<32x512xf32>, i32 -> vector<32x512xf32>
    %171 = vector.broadcast %169 : vector<1x512xf32> to vector<32x512xf32>
    %172 = arith.mulf %171, %170 : vector<32x512xf32>
    %173 = arith.addf %151, %172 : vector<32x512xf32>
    %174 = arith.index_cast %arg0 : i32 to index
    %c16 = arith.constant 16 : index
    %175 = memref.load %arg5[%174, %c16] : memref<4x27xf32, #tpu.memory_space<smem>>
    %c0_71 = arith.constant 0 : index
    %c0_72 = arith.constant 0 : index
    %176 = vector.load %arg10[%c0_71, %c0_72] : memref<32x512xf32, #tpu.memory_space<vmem>>, vector<32x512xf32>
    %177 = vector.broadcast %175 : f32 to vector<32x512xf32>
    %178 = arith.mulf %177, %176 : vector<32x512xf32>
    %179 = arith.index_cast %arg0 : i32 to index
    %c7 = arith.constant 7 : index
    %180 = memref.load %arg5[%179, %c7] : memref<4x27xf32, #tpu.memory_space<smem>>
    %c0_73 = arith.constant 0 : index
    %c0_74 = arith.constant 0 : index
    %181 = vector.load %arg11[%c0_73, %c0_74] : memref<32x512xf32, #tpu.memory_space<vmem>>, vector<32x512xf32>
    %182 = vector.broadcast %180 : f32 to vector<32x512xf32>
    %183 = arith.mulf %182, %181 : vector<32x512xf32>
    %184 = arith.addf %178, %183 : vector<32x512xf32>
    %185 = arith.index_cast %arg0 : i32 to index
    %c25 = arith.constant 25 : index
    %186 = memref.load %arg5[%185, %c25] : memref<4x27xf32, #tpu.memory_space<smem>>
    %c0_75 = arith.constant 0 : index
    %c0_76 = arith.constant 0 : index
    %187 = vector.load %arg12[%c0_75, %c0_76] : memref<32x512xf32, #tpu.memory_space<vmem>>, vector<32x512xf32>
    %188 = vector.broadcast %186 : f32 to vector<32x512xf32>
    %189 = arith.mulf %188, %187 : vector<32x512xf32>
    %190 = arith.addf %184, %189 : vector<32x512xf32>
    %c7_77 = arith.constant 7 : index
    %c0_78 = arith.constant 0 : index
    %191 = vector.load %arg4[%c7_77, %c0_78] : memref<9x512xf32, #tpu.memory_space<vmem>>, vector<1x512xf32>
    %c496_i32 = arith.constant 496 : i32
    %192 = tpu.dynamic_rotate %190 by %c496_i32 dim 1 : vector<32x512xf32>, i32 -> vector<32x512xf32>
    %193 = vector.broadcast %191 : vector<1x512xf32> to vector<32x512xf32>
    %194 = arith.mulf %193, %192 : vector<32x512xf32>
    %195 = arith.addf %173, %194 : vector<32x512xf32>
    %196 = arith.index_cast %arg0 : i32 to index
    %c17 = arith.constant 17 : index
    %197 = memref.load %arg5[%196, %c17] : memref<4x27xf32, #tpu.memory_space<smem>>
    %c0_79 = arith.constant 0 : index
    %c0_80 = arith.constant 0 : index
    %198 = vector.load %arg10[%c0_79, %c0_80] : memref<32x512xf32, #tpu.memory_space<vmem>>, vector<32x512xf32>
    %199 = vector.broadcast %197 : f32 to vector<32x512xf32>
    %200 = arith.mulf %199, %198 : vector<32x512xf32>
    %201 = arith.index_cast %arg0 : i32 to index
    %c8 = arith.constant 8 : index
    %202 = memref.load %arg5[%201, %c8] : memref<4x27xf32, #tpu.memory_space<smem>>
    %c0_81 = arith.constant 0 : index
    %c0_82 = arith.constant 0 : index
    %203 = vector.load %arg11[%c0_81, %c0_82] : memref<32x512xf32, #tpu.memory_space<vmem>>, vector<32x512xf32>
    %204 = vector.broadcast %202 : f32 to vector<32x512xf32>
    %205 = arith.mulf %204, %203 : vector<32x512xf32>
    %206 = arith.addf %200, %205 : vector<32x512xf32>
    %207 = arith.index_cast %arg0 : i32 to index
    %c26 = arith.constant 26 : index
    %208 = memref.load %arg5[%207, %c26] : memref<4x27xf32, #tpu.memory_space<smem>>
    %c0_83 = arith.constant 0 : index
    %c0_84 = arith.constant 0 : index
    %209 = vector.load %arg12[%c0_83, %c0_84] : memref<32x512xf32, #tpu.memory_space<vmem>>, vector<32x512xf32>
    %210 = vector.broadcast %208 : f32 to vector<32x512xf32>
    %211 = arith.mulf %210, %209 : vector<32x512xf32>
    %212 = arith.addf %206, %211 : vector<32x512xf32>
    %c8_85 = arith.constant 8 : index
    %c0_86 = arith.constant 0 : index
    %213 = vector.load %arg4[%c8_85, %c0_86] : memref<9x512xf32, #tpu.memory_space<vmem>>, vector<1x512xf32>
    %c495_i32 = arith.constant 495 : i32
    %214 = tpu.dynamic_rotate %212 by %c495_i32 dim 1 : vector<32x512xf32>, i32 -> vector<32x512xf32>
    %215 = vector.broadcast %213 : vector<1x512xf32> to vector<32x512xf32>
    %216 = arith.mulf %215, %214 : vector<32x512xf32>
    %217 = arith.addf %195, %216 : vector<32x512xf32>
    %218 = arith.index_cast %arg0 : i32 to index
    %219 = memref.load %arg6[%218] : memref<4xf32, #tpu.memory_space<smem>>
    %220 = vector.broadcast %219 : f32 to vector<32x512xf32>
    %221 = arith.addf %217, %220 : vector<32x512xf32>
    %cst_87 = arith.constant 5.000000e-01 : f32
    %222 = vector.broadcast %cst_87 : f32 to vector<32x512xf32>
    %223 = arith.mulf %222, %221 : vector<32x512xf32>
    %cst_88 = arith.constant 0.707106769 : f32
    %224 = vector.broadcast %cst_88 : f32 to vector<32x512xf32>
    %225 = arith.mulf %221, %224 : vector<32x512xf32>
    %cst_89 = arith.constant 0.000000e+00 : f32
    %226 = vector.broadcast %cst_89 : f32 to vector<32x512xf32>
    %227 = arith.cmpf olt, %225, %226 : vector<32x512xf32>
    %cst_90 = arith.constant -1.000000e+00 : f32
    %cst_91 = arith.constant 1.000000e+00 : f32
    %228 = vector.broadcast %cst_90 : f32 to vector<32x512xf32>
    %229 = vector.broadcast %cst_91 : f32 to vector<32x512xf32>
    %230 = arith.select %227, %228, %229 : vector<32x512xi1>, vector<32x512xf32>
    %231 = math.absf %225 : vector<32x512xf32>
    %cst_92 = arith.constant 0.327591091 : f32
    %232 = vector.broadcast %cst_92 : f32 to vector<32x512xf32>
    %233 = arith.mulf %232, %231 : vector<32x512xf32>
    %cst_93 = arith.constant 1.000000e+00 : f32
    %234 = vector.broadcast %cst_93 : f32 to vector<32x512xf32>
    %235 = arith.addf %234, %233 : vector<32x512xf32>
    %236 = tpu.reciprocal %235 {approx = true} : vector<32x512xf32> -> vector<32x512xf32>
    %237 = arith.mulf %235, %236 : vector<32x512xf32>
    %cst_94 = arith.constant 2.000000e+00 : f32
    %238 = vector.broadcast %cst_94 : f32 to vector<32x512xf32>
    %239 = arith.subf %238, %237 : vector<32x512xf32>
    %240 = arith.mulf %236, %239 : vector<32x512xf32>
    %cst_95 = arith.constant 1.06140542 : f32
    %241 = vector.broadcast %cst_95 : f32 to vector<32x512xf32>
    %242 = arith.mulf %241, %240 : vector<32x512xf32>
    %cst_96 = arith.constant -1.45315206 : f32
    %243 = vector.broadcast %cst_96 : f32 to vector<32x512xf32>
    %244 = arith.addf %242, %243 : vector<32x512xf32>
    %245 = arith.mulf %244, %240 : vector<32x512xf32>
    %cst_97 = arith.constant 1.42141378 : f32
    %246 = vector.broadcast %cst_97 : f32 to vector<32x512xf32>
    %247 = arith.addf %245, %246 : vector<32x512xf32>
    %248 = arith.mulf %247, %240 : vector<32x512xf32>
    %cst_98 = arith.constant -0.284496725 : f32
    %249 = vector.broadcast %cst_98 : f32 to vector<32x512xf32>
    %250 = arith.addf %248, %249 : vector<32x512xf32>
    %251 = arith.mulf %250, %240 : vector<32x512xf32>
    %cst_99 = arith.constant 0.254829586 : f32
    %252 = vector.broadcast %cst_99 : f32 to vector<32x512xf32>
    %253 = arith.addf %251, %252 : vector<32x512xf32>
    %254 = arith.mulf %253, %240 : vector<32x512xf32>
    %cst_100 = arith.constant 0.000000e+00 : f32
    %255 = vector.broadcast %cst_100 : f32 to vector<32x512xf32>
    %256 = arith.subf %255, %231 : vector<32x512xf32>
    %257 = arith.mulf %256, %231 : vector<32x512xf32>
    %258 = math.exp %257 : vector<32x512xf32>
    %259 = arith.mulf %254, %258 : vector<32x512xf32>
    %cst_101 = arith.constant 1.000000e+00 : f32
    %260 = vector.broadcast %cst_101 : f32 to vector<32x512xf32>
    %261 = arith.subf %260, %259 : vector<32x512xf32>
    %262 = arith.mulf %230, %261 : vector<32x512xf32>
    %cst_102 = arith.constant 1.000000e+00 : f32
    %263 = vector.broadcast %cst_102 : f32 to vector<32x512xf32>
    %264 = arith.addf %263, %262 : vector<32x512xf32>
    %265 = arith.mulf %223, %264 : vector<32x512xf32>
    %c0_103 = arith.constant 0 : index
    %c0_104 = arith.constant 0 : index
    %266 = vector.load %arg7[%c0_103, %c0_104] : memref<16x32xf32, #tpu.memory_space<vmem>>, vector<16x32xf32>
    %cst_105 = arith.constant dense<0.000000e+00> : vector<16x512xf32>
    %267 = tpu.matmul %266, %265, %cst_105 {dimension_numbers = #tpu.dot_dimension_numbers<[1], [0], [0], [1], [0, 0, 1, 1], [], []>} : vector<16x32xf32>, vector<32x512xf32>, vector<16x512xf32> -> vector<16x512xf32>
    %c0_106 = arith.constant 0 : index
    %c0_107 = arith.constant 0 : index
    %268 = vector.load %arg8[%c0_106, %c0_107] : memref<16x1xf32, #tpu.memory_space<vmem>>, vector<16x1xf32>
    %269 = vector.broadcast %268 : vector<16x1xf32> to vector<16x512xf32>
    %270 = arith.addf %267, %269 : vector<16x512xf32>
    %c0_108 = arith.constant 0 : index
    %c0_109 = arith.constant 0 : index
    %c0_110 = arith.constant 0 : index
    %271 = vector.load %arg9[%c0_108, %c0_109, %c0_110] : memref<1x16x512xf32, #tpu.memory_space<vmem>>, vector<1x16x512xf32>
    %272 = vector.shape_cast %271 : vector<1x16x512xf32> to vector<16x512xf32>
    %273 = vector.shape_cast %270 : vector<16x512xf32> to vector<1x16x512xf32>
    tpu.vector_store %arg9[%c0_108, %c0_109, %c0_110], %273 {strides = array<i32>} : memref<1x16x512xf32, #tpu.memory_space<vmem>>, vector<1x16x512xf32>,
    return
  }
  func.func @transform_0(%arg0: i32) -> (i32, i32, i32) {
    %c0_i32 = arith.constant 0 : i32
    %c0_i32_0 = arith.constant 0 : i32
    %c0_i32_1 = arith.constant 0 : i32
    return %arg0, %c0_i32, %c0_i32_0 : i32, i32, i32
  }
  func.func @transform_1(%arg0: i32) -> (i32, i32) {
    %c0_i32 = arith.constant 0 : i32
    %c0_i32_0 = arith.constant 0 : i32
    %c0_i32_1 = arith.constant 0 : i32
    return %c0_i32, %c0_i32_0 : i32, i32
  }
  func.func @transform_2(%arg0: i32) -> (i32, i32) {
    %c0_i32 = arith.constant 0 : i32
    %c0_i32_0 = arith.constant 0 : i32
    %c0_i32_1 = arith.constant 0 : i32
    return %c0_i32, %c0_i32_0 : i32, i32
  }
  func.func @transform_3(%arg0: i32) -> (i32, i32) {
    %c0_i32 = arith.constant 0 : i32
    %c0_i32_0 = arith.constant 0 : i32
    %c0_i32_1 = arith.constant 0 : i32
    return %c0_i32, %c0_i32_0 : i32, i32
  }
  func.func @transform_4(%arg0: i32) -> (i32, i32) {
    %c0_i32 = arith.constant 0 : i32
    %c0_i32_0 = arith.constant 0 : i32
    %c0_i32_1 = arith.constant 0 : i32
    return %c0_i32, %c0_i32_0 : i32, i32
  }
  func.func @transform_5(%arg0: i32) -> i32 {
    %c0_i32 = arith.constant 0 : i32
    %c0_i32_0 = arith.constant 0 : i32
    return %c0_i32 : i32
  }
  func.func @transform_6(%arg0: i32) -> (i32, i32) {
    %c0_i32 = arith.constant 0 : i32
    %c0_i32_0 = arith.constant 0 : i32
    %c0_i32_1 = arith.constant 0 : i32
    return %c0_i32, %c0_i32_0 : i32, i32
  }
  func.func @transform_7(%arg0: i32) -> (i32, i32) {
    %c0_i32 = arith.constant 0 : i32
    %c0_i32_0 = arith.constant 0 : i32
    %c0_i32_1 = arith.constant 0 : i32
    return %c0_i32, %c0_i32_0 : i32, i32
  }
  func.func @transform_8(%arg0: i32) -> (i32, i32, i32) {
    %c0_i32 = arith.constant 0 : i32
    %c0_i32_0 = arith.constant 0 : i32
    %c0_i32_1 = arith.constant 0 : i32
    return %arg0, %c0_i32, %c0_i32_0 : i32, i32, i32
  }
}

</mosaic_0001>

<bundles_post_ra>
// kernel: mlp_forward.1
= control target key start
LH: loop header
LB: loop body
LE: loop exit
PB: predicated region body
PF: predicated region fallthrough
CT: control target
= control target key end

     0   :  { %s6678_s0 = inlined_call_operand.vmem [shape: f32[4,16,512], index: 0, kind: input, shape index: {}]   ;;  %s6679_s1 = inlined_call_operand.vmem [shape: f32[32,16], index: 1, kind: input, shape index: {}]   ;;  %s6680_s2 = inlined_call_operand.vmem [shape: f32[32,1], index: 2, kind: input, shape index: {}]   ;;  %s6681_s3 = inlined_call_operand.vmem [shape: f32[9,512], index: 3, kind: input, shape index: {}]   ;;  %s6682_s4 = inlined_call_operand.vmem [shape: f32[4,27], index: 4, kind: input, shape index: {}]   ;;  %s6683_s5 = inlined_call_operand.vmem [shape: f32[4], index: 5, kind: input, shape index: {}]   ;;  %s6684_s6 = inlined_call_operand.vmem [shape: f32[16,32], index: 6, kind: input, shape index: {}]   ;;  %s6685_s7 = inlined_call_operand.vmem [shape: f32[16,1], index: 7, kind: input, shape index: {}]   ;;  %s6686_s8 = inlined_call_operand.vmem [shape: f32[4,16,512], index: 8, kind: output, shape index: {}]  }
   0x1   :  { %6977 = sst [smem:[#allocation122_spill]] %s6678_s0 }
   0x2   :  { %6978 = sst [smem:[#allocation123_spill]] %s6679_s1 }
   0x3   :  { %13 = vsyncpa [#allocation6], 0 }
   0x4   :  { %14 = vsyncpa [#allocation8], 0  ;;  %s3430_s27 = smov 0  }
   0x5 LB: > { %s3436_s28 = sadd.s32 4294967295, %s3370_s27   ;;  %p3161_p0 = scmp.ge.s32.totalorder %s3370_s27, 1  ;;  %s3370_s27 = sphi %s3430_s27, %s20_s27  }
   0x6   : > { %p224_p1 = scmp.lt.s32.totalorder %s3370_s27, 5  ;;  %s246_s9 = sshll.u32 %s6682_s4, 4  ;;  %s247_s9 = int_to_ptr.vmem [resolvable:$true] %s246_s9 }
   0x7   : > { %p6687_p3 = scmp.eq.s32.totalorder %s3436_s28, 0  ;;  %s257_s13 = sshll.u32 %s6683_s5, 4  ;;  %s258_s13 = int_to_ptr.vmem [resolvable:$true] %s257_s13 }
   0x8   : > { %p3443_p2 = pnand %p3161_p0, %p224_p1  ;;  %s3326_s15 = scalar_lea.vmem %s247_s9, 64 }
   0x9   : > { %p3327_p6 = scmp.ne.s32.totalorder %s247_s9, %s3326_s15  ;;  %p3334_p10 = scmp.lt.s32.totalorder %s247_s9, %s247_s9 }
   0xa   : > { %s6979_s10 = scalar_select %p3443_p2, 1, 0 }
   0xb   : > { %p3228_p4 = pneg %p3443_p2  ;;  %p3335_p11 = scmp.lt.s32.totalorder %s3326_s15, %s3326_s15 }
   0xd   : > { %p3455_p5 = pnand %p6687_p3, %p3228_p4  ;;  %p3336_p12 = por %p3335_p11, %p3334_p10 }
   0xf   : > { %p3328_p7 = pneg %p3455_p5 }
  0x11   : > { %p3329_p8 = pnand %p3328_p7, %p3327_p6 }
  0x13   : > { %p3330_p9 = pneg %p3329_p8 }
  0x15   : > { %p3337_p13 = pnand %p3336_p12, %p3330_p9 }
  0x17   : > { %3340 = shalt.err (!%p3337_p13)
}
  0x18   : > { %s3372_s16 = smov [#allocation5]   ;;  %s3341_s17 = scalar_lea.vmem %s258_s13, 16 }
  0x19   : > { %3231 = dma.vmem_to_smem (!%p3455_p5), %s247_s9, 64, %s3372_s16, [#allocation6]  }
  0x1a   : > { %p3342_p0 = scmp.ne.s32.totalorder %s258_s13, %s3341_s17  ;;  %p3349_p3 = scmp.lt.s32.totalorder %s258_s13, %s258_s13 }
  0x1b   : > { %p3350_p2 = scmp.lt.s32.totalorder %s3341_s17, %s3341_s17 }
  0x1c   : > { %p3344_p1 = pnand %p3342_p0, %p3328_p7 }
  0x1d   : > { %p3351_p6 = por %p3350_p2, %p3349_p3 }
  0x1e   : > { %p3345_p4 = pneg %p3344_p1 }
  0x20   : > { %p3352_p8 = pnand %p3351_p6, %p3345_p4 }
  0x22   : > { %3355 = shalt.err (!%p3352_p8)
}
  0x23   : > { %s3373_s18 = smov [#allocation7]   ;;  %p6981_p9 = scmp.ne.s32.totalorder %s6979_s10, 0 }
  0x24   : > { %3234 = dma.vmem_to_smem (!%p3455_p5), %s258_s13, 16, %s3373_s18, [#allocation8]  }
  0x25   : > { %284 = sbr.rel (%p6981_p9) target bundleno = 1007 (0x3ef), region = 52 }
  0x2c   : > { %p6982_p10 = scmp.eq.s32.totalorder %s3436_s28, 0 }
  0x2e   : > { %3361 = dma.done.wait (%p6982_p10), [#allocation6], 64   ;;  %p6983_p11 = pmov %p6982_p10 }
  0x2f   : > { %p6984_p7 = pmov %p6982_p10 }
  0x30   : > { %3363 = vsyncadd (%p6983_p11), [#allocation6], 4294967232 }
  0x31   : > { %3365 = dma.done.wait (%p6984_p7), [#allocation8], 16   ;;  %p6985_p2 = pmov %p6984_p7 }
  0x33   : > { %3367 = vsyncadd (%p6985_p2), [#allocation8], 4294967280 }
  0x34   : > { %294 = sfence }
  0x35   : > { %p323_p3 = scmp.lt.s32.totalorder %s3436_s28, 3  ;;  %v6690_v0 = vmov 0.0   ;;  %v345_v1 = vld [vmem:[%s6680_s2] sm:$0xff]  ;;  %v346_v2 = vld [vmem:[%s6680_s2 + $0x8] sm:$0xff]  ;;  %v3375_v3 = vmov 0   ;;  %v347_v4 = vld [vmem:[%s6680_s2 + $0x10] sm:$0xff]  ;;  %v6692_v22 = vlaneseq }
  0x36   : > { %446 = vmatprep.mubr.f32.mxu0 %v6690_v0  ;;  %535 = vmatprep.mubr.f32.mxu1 %v6690_v0  ;;  %v348_v5 = vld [vmem:[%s6680_s2 + $0x18] sm:$0xff]  ;;  %s6986_s0 = sld [smem:[#allocation122_spill]]  ;;  %s6987_s1 = sld [smem:[#allocation123_spill]]  ;;  %vm369_vm0 = vcmask 130048  }
  0x37   : > { %s3485_s23 = scalar_select %p323_p3, %s3436_s28, 3  ;;  %3260 = vset.pattern.permute.xlu0 %v3375_v3  ;;  %3261 = vset.pattern.permute.xlu1 %v3375_v3  ;;  %v3544_v29 = vshrl.u32 %v6692_v22, 7 }
  0x38   : > { %351 = vperm.xlu0 %3260, %v345_v1   ;;  %356 = vperm.xlu1 %3261, %v346_v2   ;;  %s3528_s20 = sshll.u32 %s3436_s28, 7 }
  0x39   : > { %s6689_s24 = sshll.u32 %s3485_s23, 6  ;;  %s736_s21 = sadd.s32 9, %s3528_s20  ;;  %vm601_vm1 = vcmp.lt.s32.totalorder %v3544_v29, 1  ;;  %vm678_vm2 = vcmp.lt.s32.totalorder %v3544_v29, 7  ;;  %vm581_vm3 = vcmp.gt.s32.totalorder %v3544_v29, 0 }
  0x3a   : > { %s771_s22 = sld [smem:[#allocation5 + %s3528_s20]]  ;;  %s821_s25 = sadd.s32 18, %s3528_s20 }
  0x3b   : > { %s3537_s26 = sld [smem:[#allocation5 + %s736_s21]]  ;;  %s980_s30 = sadd.s32 1, %s3528_s20 }
  0x3c   : > { %s327_s11 = scalar_lea.vmem %s6986_s0, %s6689_s24  ;;  %361 = vperm.xlu1 %3261, %v347_v4   ;;  %366 = vperm.xlu0 %3260, %v348_v5   ;;  %v333_v18 = vld [vmem:[%s6987_s1] sm:$0xff]  ;;  %v334_v19 = vld [vmem:[%s6987_s1 + $0x8] sm:$0xff]  ;;  %v335_v20 = vld [vmem:[%s6987_s1 + $0x10] sm:$0xff]  ;;  %s3546_s29 = sld [smem:[#allocation5 + %s821_s25]] }
  0x3d   : > { %v338_v6 = vld [vmem:[%s327_s11 + $0x8] sm:$0xff]  ;;  %v340_v8 = vld [vmem:[%s327_s11 + $0x18] sm:$0xff]  ;;  %v337_v11 = vld [vmem:[%s327_s11] sm:$0xff]  ;;  %s961_s9 = sadd.s32 10, %s3528_s20  ;;  %s1154_s10 = sadd.s32 11, %s3528_s20 }
  0x3e   : > { %v342_v7 = vld [vmem:[%s327_s11 + $0x28] sm:$0xff]  ;;  %v344_v10 = vld [vmem:[%s327_s11 + $0x38] sm:$0xff]  ;;  %v341_v12 = vld [vmem:[%s327_s11 + $0x20] sm:$0xff]  ;;  %s1015_s12 = sadd.s32 19, %s3528_s20  ;;  %s1173_s13 = sadd.s32 2, %s3528_s20 }
  0x3f   : > { %v3196_v9 = vpack.c.bf16 %v342_v7, %v338_v6  ;;  %v3200_v13 = vpack.c.bf16 %v344_v10, %v340_v8  ;;  %v3198_v14 = vpack.c.bf16 %v341_v12, %v337_v11  ;;  %v339_v15 = vld [vmem:[%s327_s11 + $0x10] sm:$0xff]  ;;  %v336_v21 = vld [vmem:[%s6987_s1 + $0x18] sm:$0xff]  ;;  %s1347_s14 = sadd.s32 12, %s3528_s20  ;;  %s3581_s15 = sld [smem:[#allocation5 + %s961_s9]] }
  0x40   : > { %v343_v16 = vld [vmem:[%s327_s11 + $0x30] sm:$0xff]  ;;  %s3568_s11 = sld [smem:[#allocation5 + %s980_s30]]  ;;  %v3573_v40 = vstv %s771_s22  ;;  %s1208_s21 = sadd.s32 20, %s3528_s20 }
  0x41   : > { %3197 = vmatprep.subr.bf16.mxu0 %v3196_v9  ;;  %v3202_v17 = vpack.c.bf16 %v343_v16, %v339_v15  ;;  %3201 = vmatprep.subr.bf16.mxu1 %v3200_v13  ;;  %v3596_v49 = vstv %s3537_s26  ;;  %s3598_s16 = sld [smem:[#allocation5 + %s1015_s12]]  ;;  %s1645_s22 = sadd.s32 14, %s3528_s20 }
  0x42   : > { %3199 = vmatpush1.bf16.msra.mxu0 %v3198_v14  ;;  %6994 = vst [vmem:[#allocation17_spill] sm:$0xff] %v3596_v49  ;;  %s3600_s17 = sld [smem:[#allocation5 + %s1154_s10]]  ;;  %v3611_v54 = vstv %s3546_s29  ;;  %s1366_s25 = sadd.s32 3, %s3528_s20 }
  0x43   : > { %3203 = vmatpush1.bf16.msra.mxu1 %v3202_v17  ;;  %6996 = vst [vmem:[#allocation19_spill] sm:$0xff] %v3611_v54  ;;  %s3613_s18 = sld [smem:[#allocation5 + %s1173_s13]]  ;;  %s1401_s26 = sadd.s32 21, %s3528_s20 }
  0x44   : > { %s3615_s19 = sld [smem:[#allocation5 + %s1347_s14]]  ;;  %s1838_s29 = sadd.s32 15, %s3528_s20 }
  0x45   : > { %3172 = vmatmul.mubr.msk.f32.vlgmr.msra.gmra.mrb[0].mxu0 %vm369_vm0, %v333_v18  ;;  %s3667_s30 = sld [smem:[#allocation5 + %s1208_s21]]  ;;  %s1699_s14 = sadd.s32 23, %s3528_s20 }
  0x46   : > { %3176 = vmatmul.mubr.msk.f32.vlgmr.msra.gmra.mrb[0].mxu1 %vm369_vm0, %v333_v18  ;;  %452 = vmatprep.mubr.f32.mxu0 %v6690_v0  ;;  %s3669_s9 = sld [smem:[#allocation5 + %s1645_s22]]  ;;  %v3679_v15 = vstv %s3568_s11  ;;  %s1664_s11 = sadd.s32 5, %s3528_s20 }
  0x47   : > { %541 = vmatprep.mubr.f32.mxu1 %v6690_v0  ;;  %7003 = vst [vmem:[#allocation26_spill] sm:$0xff] %v3679_v15  ;;  %s3681_s10 = sld [smem:[#allocation5 + %s1366_s25]]  ;;  %s2031_s21 = sadd.s32 16, %s3528_s20 }
  0x48   : > { %s3683_s12 = sld [smem:[#allocation5 + %s1401_s26]]  ;;  %s3376_s22 = smov 17  }
  0x49   : > { %3173 = vmatmul.mubr.msk.f32.gmra.mrb[2].mxu0 %vm369_vm0, %v334_v19  ;;  %s3696_s13 = sld [smem:[#allocation5 + %s1838_s29]]  ;;  %s1857_s25 = sadd.s32 6, %s3528_s20 }
  0x4a   : > { %3177 = vmatmul.mubr.msk.f32.gmra.mrb[2].mxu1 %vm369_vm0, %v334_v19  ;;  %458 = vmatprep.mubr.f32.mxu0 %v6690_v0  ;;  %s1892_s26 = sadd.s32 24, %s3528_s20  ;;  %s3738_s29 = sld [smem:[#allocation5 + %s1699_s14]] }
  0x4b   : > { %547 = vmatprep.mubr.f32.mxu1 %v6690_v0  ;;  %s3740_s24 = sld [smem:[#allocation5 + %s2031_s21]]  ;;  %s2050_s21 = sadd.s32 7, %s3528_s20 }
  0x4c   : > { %s3753_s14 = sld [smem:[#allocation5 + %s1892_s26]]  ;;  %s2243_s0 = sadd.s32 8, %s3528_s20 }
  0x4d   : > { %3174 = vmatmul.mubr.msk.f32.gmra.mrb[4].mxu0 %vm369_vm0, %v335_v20  ;;  %s3377_s1 = smov 16  }
  0x4e   : > { %3178 = vmatmul.mubr.msk.f32.gmra.mrb[4].mxu1 %vm369_vm0, %v335_v20  ;;  %464 = vmatprep.mubr.f32.mxu0 %v6690_v0 }
  0x4f   : > { %553 = vmatprep.mubr.f32.mxu1 %v6690_v0 }
  0x51   : > { %3175 = vmatmul.mubr.msk.f32.gmra.mrb[6].mxu0 %vm369_vm0, %v336_v21 }
  0x52   : > { %3179 = vmatmul.mubr.msk.f32.gmra.mrb[6].mxu1 %vm369_vm0, %v336_v21  ;;  %2984 = vmatprep.mubr.f32.mxu0 %v6690_v0 }
  0x53   : > { %3061 = vmatprep.mubr.f32.mxu1 %v6690_v0 }
  0xb7   : > { %v3533_v23 = vpop.permute.xlu0 %351  ;;  %v3539_v27 = vpop.permute.xlu1 %356 }
  0xbb   : > { %v3578_v42 = vpop.permute.xlu1 %361  ;;  %v3629_v59 = vpop.permute.xlu0 %366 }
 0x118   : > { %v448_v24 = vpop.f32.mrb[0].mxu0 }
 0x119   : > { %v3535_v25 = vpop.f32.mrb[1].mxu0  ;;  %v537_v26 = vpop.f32.mrb[0].mxu1  ;;  %v3549_v30 = vadd.f32 %v448_v24, %v3533_v23 }
 0x11a   : > { %v3541_v28 = vpop.f32.mrb[1].mxu1  ;;  %v3552_v31 = vadd.f32 %v537_v26, %v3533_v23  ;;  %v3708_v26 = vstv %s3581_s15  ;;  %s3731_s15 = sld [smem:[#allocation5 + %s1664_s11]]  ;;  %s2224_s11 = sadd.s32 17, %s3528_s20 }
 0x11b   : > { %6988 = vst [vmem:[#allocation11_spill] sm:$0xff] %v3549_v30  ;;  %v6700_v38 = vrot.slane %v3549_v30, 7  ;;  %7006 = vst [vmem:[#allocation29_spill] sm:$0xff] %v3708_v26  ;;  %s3780_s26 = sld [smem:[#allocation5 + %s2224_s11]] }
 0x11c   : > { %6989 = vst [vmem:[#allocation12_spill] sm:$0xff] %v3552_v31  ;;  %v454_v32 = vpop.f32.mrb[2].mxu0  ;;  %v6699_v41 = vrot.slane %v3552_v31, 7 }
 0x11d   : > { %v3556_v33 = vadd.f32 %v454_v32, %v3539_v27  ;;  %v543_v34 = vpop.f32.mrb[2].mxu1  ;;  %v3558_v35 = vpop.f32.mrb[3].mxu0 }
 0x11e   : > { %v3563_v36 = vadd.f32 %v543_v34, %v3539_v27  ;;  %v3565_v37 = vpop.f32.mrb[3].mxu1 }
 0x11f   : > { %6990 = vst [vmem:[#allocation13_spill] sm:$0xff] %v3556_v33  ;;  %v589_v39 = vrot.slane %v3556_v33, 7  ;;  %v6698_v52 = vrot.slane %v3556_v33, 1  ;;  %v759_v56 = vmul.f32 %v3596_v49, %v3556_v33 }
 0x120   : > { %6991 = vst [vmem:[#allocation14_spill] sm:$0xff] %v3563_v36  ;;  %v460_v43 = vpop.f32.mrb[4].mxu0  ;;  %v591_v44 = vrot.slane %v3563_v36, 7  ;;  %v6696_v61 = vrot.slane %v3563_v36, 1  ;;  %v761_v63 = vmul.f32 %v3596_v49, %v3563_v36 }
 0x121   : > { %v3584_v45 = vadd.f32 %v460_v43, %v3578_v42  ;;  %v549_v46 = vpop.f32.mrb[4].mxu1  ;;  %v3586_v47 = vpop.f32.mrb[5].mxu0  ;;  %v3592_v48 = vsel %vm601_vm1, %v6700_v38, %v589_v39  ;;  %v3850_v38 = vstv %s3780_s26 }
 0x122   : > { %6993 = vst [vmem:[#allocation16_spill] sm:$0xff] %v3592_v48  ;;  %v3603_v50 = vadd.f32 %v549_v46, %v3578_v42  ;;  %v3605_v51 = vpop.f32.mrb[5].mxu1  ;;  %v793_v53 = vmul.f32 %v3573_v40, %v3592_v48  ;;  %v3625_v58 = vsel %vm601_vm1, %v6699_v41, %v591_v44  ;;  %v987_v43 = vmul.f32 %v3679_v15, %v3592_v48 }
 0x123   : > { %6992 = vst [vmem:[#allocation15_spill] sm:$0xff] %v3584_v45  ;;  %v670_v55 = vrot.slane %v3584_v45, 1  ;;  %v6697_v57 = vrot.slane %v3584_v45, 7  ;;  %6997 = vst [vmem:[#allocation20_spill] sm:$0xff] %v3625_v58  ;;  %v795_v12 = vmul.f32 %v3573_v40, %v3625_v58  ;;  %v763_v17 = vmul.f32 %v3596_v49, %v3584_v45 }
 0x124   : > { %6995 = vst [vmem:[#allocation18_spill] sm:$0xff] %v3603_v50  ;;  %v466_v60 = vpop.f32.mrb[6].mxu0  ;;  %v672_v62 = vrot.slane %v3603_v50, 1  ;;  %v6694_v1 = vrot.slane %v3603_v50, 7  ;;  %v809_v6 = vadd.f32 %v793_v53, %v759_v56  ;;  %v765_v46 = vmul.f32 %v3596_v49, %v3603_v50  ;;  %7021 = vst [vmem:[#allocation44_spill] sm:$0xff] %v3850_v38 }
 0x125   : > { %v3639_v2 = vadd.f32 %v466_v60, %v3629_v59  ;;  %v555_v3 = vpop.f32.mrb[6].mxu1  ;;  %v3641_v4 = vpop.f32.mrb[7].mxu0  ;;  %v3647_v5 = vsel %vm678_vm2, %v6698_v52, %v670_v55  ;;  %v3653_v7 = vsel %vm601_vm1, %v589_v39, %v6697_v57  ;;  %v811_v39 = vadd.f32 %v795_v12, %v761_v63 }
 0x126   : > { %6999 = vst [vmem:[#allocation22_spill] sm:$0xff] %v3647_v5  ;;  %7000 = vst [vmem:[#allocation23_spill] sm:$0xff] %v3653_v7  ;;  %v3657_v8 = vadd.f32 %v555_v3, %v3629_v59  ;;  %v3659_v9 = vpop.f32.mrb[7].mxu1  ;;  %v844_v10 = vmul.f32 %v3611_v54, %v3647_v5  ;;  %v797_v11 = vmul.f32 %v3573_v40, %v3653_v7 }
 0x127   : > { %6998 = vst [vmem:[#allocation21_spill] sm:$0xff] %v3639_v2  ;;  %v6695_v13 = vrot.slane %v3639_v2, 1  ;;  %v3676_v14 = vsel %vm678_vm2, %v6696_v61, %v672_v62  ;;  %v3693_v19 = vsel %vm601_vm1, %v591_v44, %v6694_v1  ;;  %v968_v53 = vmul.f32 %v3708_v26, %v3556_v33 }
 0x128   : > { %7001 = vst [vmem:[#allocation24_spill] sm:$0xff] %v3657_v8  ;;  %7002 = vst [vmem:[#allocation25_spill] sm:$0xff] %v3676_v14  ;;  %v860_v16 = vadd.f32 %v844_v10, %v809_v6  ;;  %v846_v18 = vmul.f32 %v3611_v54, %v3676_v14  ;;  %v6693_v21 = vrot.slane %v3657_v8, 1  ;;  %v799_v24 = vmul.f32 %v3573_v40, %v3693_v19 }
 0x129   : > { %7004 = vst [vmem:[#allocation27_spill] sm:$0xff] %v3693_v19  ;;  %v3702_v20 = vsel %vm678_vm2, %v670_v55, %v6695_v13  ;;  %v813_v32 = vadd.f32 %v797_v11, %v763_v17  ;;  %v3729_v55 = vstv %s3598_s16  ;;  %v970_v6 = vmul.f32 %v3708_v26, %v3563_v36  ;;  %s3744_s16 = sld [smem:[#allocation5 + %s1857_s25]]  ;;  %s2085_s25 = sadd.s32 25, %s3528_s20 }
 0x12a   : > { %7005 = vst [vmem:[#allocation28_spill] sm:$0xff] %v3702_v20  ;;  %875 = vrot.lane.b32.xlu1 %v860_v16, %s3376_s22  ;;  %v848_v34 = vmul.f32 %v3611_v54, %v3702_v20  ;;  %v3722_v44 = vsel %vm678_vm2, %v672_v62, %v6693_v21  ;;  %7008 = vst [vmem:[#allocation31_spill] sm:$0xff] %v3729_v55  ;;  %v862_v60 = vadd.f32 %v846_v18, %v811_v39 }
 0x12b   : > { %7007 = vst [vmem:[#allocation30_spill] sm:$0xff] %v3722_v44  ;;  %v850_v63 = vmul.f32 %v3611_v54, %v3722_v44  ;;  %v1022_v62 = vmul.f32 %v3729_v55, %v3647_v5  ;;  %v815_v3 = vadd.f32 %v799_v24, %v765_v46  ;;  %v1003_v10 = vadd.f32 %v987_v43, %v968_v53 }
 0x12c   : > { %v864_v56 = vadd.f32 %v848_v34, %v813_v32  ;;  %v991_v11 = vmul.f32 %v3679_v15, %v3653_v7  ;;  %v989_v12 = vmul.f32 %v3679_v15, %v3625_v58  ;;  %v972_v16 = vmul.f32 %v3708_v26, %v3584_v45 }
 0x12d   : > { %v3759_v17 = vstv %s3613_s18  ;;  %v866_v18 = vadd.f32 %v850_v63, %v815_v3  ;;  %v1038_v24 = vadd.f32 %v1022_v62, %v1003_v10  ;;  %v1026_v32 = vmul.f32 %v3729_v55, %v3702_v20  ;;  %s3778_s18 = sld [smem:[#allocation5 + %s2050_s21]]  ;;  %s1540_s21 = sadd.s32 13, %s3528_s20 }
 0x12e   : > { %877 = vrot.lane.b32.xlu0 %v864_v56, %s3376_s22  ;;  %891 = vrot.lane.b32.xlu1 %v862_v60, %s3376_s22  ;;  %7009 = vst [vmem:[#allocation32_spill] sm:$0xff] %v3759_v17  ;;  %v1024_v34 = vmul.f32 %v3729_v55, %v3676_v14  ;;  %v993_v39 = vmul.f32 %v3679_v15, %v3693_v19  ;;  %v3770_v43 = vstv %s3600_s17  ;;  %v3773_v46 = vstv %s3667_s30  ;;  %s3789_s17 = sld [smem:[#allocation5 + %s2085_s25]]  ;;  %s2278_s30 = sadd.s32 26, %s3528_s20 }
 0x12f   : > { %7010 = vst [vmem:[#allocation33_spill] sm:$0xff] %v3770_v43  ;;  %7011 = vst [vmem:[#allocation34_spill] sm:$0xff] %v3773_v46  ;;  %v3776_v53 = vstv %s3615_s19  ;;  %v1007_v56 = vadd.f32 %v991_v11, %v972_v16  ;;  %v1005_v60 = vadd.f32 %v989_v12, %v970_v6  ;;  %v1180_v63 = vmul.f32 %v3759_v17, %v3592_v48  ;;  %s3791_s19 = sld [smem:[#allocation5 + %s2243_s0]] }
 0x130   : > { %7012 = vst [vmem:[#allocation35_spill] sm:$0xff] %v3776_v53  ;;  %v3787_v62 = vstv %s3669_s9  ;;  %v974_v3 = vmul.f32 %v3708_v26, %v3603_v50  ;;  %v1161_v10 = vmul.f32 %v3770_v43, %v3556_v33  ;;  %v3801_v6 = vstv %s3683_s12  ;;  %s3825_s0 = sld [smem:[#allocation5 + %s2278_s30]]  ;;  %s3379_s9 = smov 1  }
 0x131   : > { %7013 = vst [vmem:[#allocation36_spill] sm:$0xff] %v3787_v62  ;;  %7015 = vst [vmem:[#allocation38_spill] sm:$0xff] %v3801_v6  ;;  %v1042_v11 = vadd.f32 %v1026_v32, %v1007_v56  ;;  %v1040_v12 = vadd.f32 %v1024_v34, %v1005_v60  ;;  %v1028_v16 = vmul.f32 %v3729_v55, %v3722_v44  ;;  %v3811_v21 = vstv %s3731_s15  ;;  %s3381_s12 = smov 113   ;;  %s3383_s15 = smov 111  }
 0x132   : > { %893 = vrot.lane.b32.xlu0 %v866_v18, %s3376_s22  ;;  %1054 = vrot.lane.b32.xlu1 %v1038_v24, %s3377_s1  ;;  %v3798_v18 = vstv %s3681_s10  ;;  %v1215_v24 = vmul.f32 %v3773_v46, %v3647_v5  ;;  %v1009_v0 = vadd.f32 %v993_v39, %v974_v3  ;;  %v1184_v22 = vmul.f32 %v3759_v17, %v3653_v7  ;;  %s3380_s10 = smov 127   ;;  %s4878_s25 = sld [smem:[#allocation5 + %s1540_s21]] }
 0x133   : > { %7014 = vst [vmem:[#allocation37_spill] sm:$0xff] %v3798_v18  ;;  %7016 = vst [vmem:[#allocation39_spill] sm:$0xff] %v3811_v21  ;;  %v3814_v1 = vstv %s3696_s13  ;;  %v1196_v32 = vadd.f32 %v1180_v63, %v1161_v10  ;;  %v1163_v34 = vmul.f32 %v3770_v43, %v3563_v36  ;;  %v1182_v39 = vmul.f32 %v3759_v17, %v3625_v58  ;;  %s3382_s13 = smov 112   ;;  %s1594_s30 = sadd.s32 22, %s3528_s20 }
 0x134   : > { %v3823_v56 = vstv %s3738_s29  ;;  %v1165_v60 = vmul.f32 %v3770_v43, %v3584_v45  ;;  %v3830_v3 = vstv %s3744_s16  ;;  %v3836_v63 = vstv %s3740_s24  ;;  %s3378_s24 = smov 15  }
 0x135   : > { %7017 = vst [vmem:[#allocation40_spill] sm:$0xff] %v3823_v56  ;;  %7019 = vst [vmem:[#allocation42_spill] sm:$0xff] %v3836_v63  ;;  %v1044_v10 = vadd.f32 %v1028_v16, %v1009_v0  ;;  %v1219_v13 = vmul.f32 %v3773_v46, %v3702_v20  ;;  %v1217_v61 = vmul.f32 %v3773_v46, %v3676_v14  ;;  %v3847_v41 = vstv %s3778_s18  ;;  %s1559_s18 = sadd.s32 4, %s3528_s20  ;;  %s4962_s20 = sld [smem:[#allocation5 + %s1594_s30]] }
 0x136   : > { %1056 = vrot.lane.b32.xlu0 %v1042_v11, %s3377_s1  ;;  %1070 = vrot.lane.b32.xlu1 %v1040_v12, %s3377_s1  ;;  %v3833_v11 = vstv %s3753_s14  ;;  %v1231_v12 = vadd.f32 %v1215_v24, %v1196_v32  ;;  %v1186_v57 = vmul.f32 %v3759_v17, %v3693_v19  ;;  %v1373_v52 = vmul.f32 %v3798_v18, %v3592_v48 }
 0x137   : > { %7018 = vst [vmem:[#allocation41_spill] sm:$0xff] %v3833_v11  ;;  %7020 = vst [vmem:[#allocation43_spill] sm:$0xff] %v3847_v41  ;;  %v1200_v0 = vadd.f32 %v1184_v22, %v1165_v60  ;;  %v1198_v16 = vadd.f32 %v1182_v39, %v1163_v34  ;;  %v3855_v24 = vstv %s3789_s17  ;;  %v3858_v32 = vstv %s3791_s19  ;;  %s4922_s19 = sld [smem:[#allocation5 + %s1559_s18]] }
 0x138   : > { %7022 = vst [vmem:[#allocation45_spill] sm:$0xff] %v3855_v24  ;;  %7023 = vst [vmem:[#allocation46_spill] sm:$0xff] %v3858_v32  ;;  %v3862_v8 = vadd.f32 %v3535_v25, %v3533_v23  ;;  %v3866_v2 = vadd.f32 %v3541_v28, %v3533_v23  ;;  %v1354_v22 = vmul.f32 %v3776_v53, %v3556_v33 }
 0x139   : > { %v1235_v34 = vadd.f32 %v1219_v13, %v1200_v0  ;;  %v1233_v39 = vadd.f32 %v1217_v61, %v1198_v16  ;;  %v1221_v60 = vmul.f32 %v3773_v46, %v3722_v44  ;;  %v1408_v25 = vmul.f32 %v3801_v6, %v3647_v5 }
 0x13a   : > { %1072 = vrot.lane.b32.xlu0 %v1044_v10, %s3377_s1  ;;  %1247 = vrot.lane.b32.xlu1 %v1231_v12, %s3378_s24  ;;  %7024 = vst [vmem:[#allocation47_spill] sm:$0xff] %v3862_v8  ;;  %7025 = vst [vmem:[#allocation48_spill] sm:$0xff] %v3866_v2  ;;  %v1167_v10 = vmul.f32 %v3770_v43, %v3603_v50  ;;  %v1389_v17 = vadd.f32 %v1373_v52, %v1354_v22 }
 0x13b   : > { %v3878_v23 = vmul.f32 %v3596_v49, %v3549_v30  ;;  %v3882_v28 = vmul.f32 %v3596_v49, %v3552_v31  ;;  %v1377_v61 = vmul.f32 %v3798_v18, %v3653_v7  ;;  %v1356_v13 = vmul.f32 %v3776_v53, %v3563_v36 }
 0x13c   : > { %v1202_v12 = vadd.f32 %v1186_v57, %v1167_v10  ;;  %v1375_v52 = vmul.f32 %v3798_v18, %v3625_v58  ;;  %v3893_v57 = vstv %s3825_s0  ;;  %v3897_v0 = vadd.f32 %v3558_v35, %v3539_v27 }
 0x13d   : > { %7026 = vst [vmem:[#allocation49_spill] sm:$0xff] %v3878_v23  ;;  %7027 = vst [vmem:[#allocation50_spill] sm:$0xff] %v3882_v28  ;;  %v1358_v16 = vmul.f32 %v3776_v53, %v3584_v45  ;;  %v3903_v10 = vmul.f32 %v3708_v26, %v3549_v30  ;;  %v3907_v22 = vmul.f32 %v3708_v26, %v3552_v31 }
 0x13e   : > { %1249 = vrot.lane.b32.xlu0 %v1235_v34, %s3378_s24  ;;  %1263 = vrot.lane.b32.xlu1 %v1233_v39, %s3378_s24  ;;  %7028 = vst [vmem:[#allocation51_spill] sm:$0xff] %v3893_v57  ;;  %7029 = vst [vmem:[#allocation52_spill] sm:$0xff] %v3897_v0  ;;  %v1237_v34 = vadd.f32 %v1221_v60, %v1202_v12  ;;  %v1424_v39 = vadd.f32 %v1408_v25, %v1389_v17 }
 0x13f   : > { %7030 = vst [vmem:[#allocation53_spill] sm:$0xff] %v3903_v10  ;;  %7031 = vst [vmem:[#allocation54_spill] sm:$0xff] %v3907_v22  ;;  %v1412_v28 = vmul.f32 %v3801_v6, %v3702_v20  ;;  %v1410_v35 = vmul.f32 %v3801_v6, %v3676_v14  ;;  %v3915_v23 = vadd.f32 %v3565_v37, %v3539_v27 }
 0x140   : > { %v1379_v46 = vmul.f32 %v3798_v18, %v3693_v19  ;;  %v3921_v10 = vmul.f32 %v3770_v43, %v3549_v30  ;;  %v3925_v17 = vmul.f32 %v3770_v43, %v3552_v31  ;;  %v1393_v60 = vadd.f32 %v1377_v61, %v1358_v16 }
 0x141   : > { %7032 = vst [vmem:[#allocation55_spill] sm:$0xff] %v3915_v23  ;;  %v1391_v25 = vadd.f32 %v1375_v52, %v1356_v13  ;;  %v1671_v27 = vmul.f32 %v3811_v21, %v3592_v48  ;;  %v3934_v12 = vadd.f32 %v3586_v47, %v3578_v42  ;;  %v1414_v61 = vmul.f32 %v3801_v6, %v3722_v44 }
 0x142   : > { %7033 = vst [vmem:[#allocation56_spill] sm:$0xff] %v3921_v10  ;;  %7034 = vst [vmem:[#allocation57_spill] sm:$0xff] %v3925_v17  ;;  %1265 = vrot.lane.b32.xlu0 %v1237_v34, %s3378_s24  ;;  %1440 = vrot.lane.b32.xlu1 %v1424_v39, %s3379_s9  ;;  %v3938_v10 = vadd.f32 %v3605_v51, %v3578_v42  ;;  %v1360_v34 = vmul.f32 %v3776_v53, %v3603_v50 }
 0x143   : > { %7035 = vst [vmem:[#allocation58_spill] sm:$0xff] %v3934_v12  ;;  %v1428_v13 = vadd.f32 %v1412_v28, %v1393_v60  ;;  %v1426_v52 = vadd.f32 %v1410_v35, %v1391_v25  ;;  %v1652_v16 = vmul.f32 %v3787_v62, %v3556_v33  ;;  %v1706_v39 = vmul.f32 %v3823_v56, %v3647_v5 }
 0x144   : > { %7036 = vst [vmem:[#allocation59_spill] sm:$0xff] %v3938_v10  ;;  %v1395_v47 = vadd.f32 %v1379_v46, %v1360_v34  ;;  %v1675_v37 = vmul.f32 %v3811_v21, %v3653_v7  ;;  %v1654_v42 = vmul.f32 %v3787_v62, %v3563_v36  ;;  %v1673_v51 = vmul.f32 %v3811_v21, %v3625_v58 }
 0x145   : > { %v3956_v28 = vadd.f32 %v3641_v4, %v3629_v59  ;;  %v1687_v35 = vadd.f32 %v1671_v27, %v1652_v16  ;;  %v1677_v46 = vmul.f32 %v3811_v21, %v3693_v19  ;;  %v3965_v25 = vadd.f32 %v3659_v9, %v3629_v59 }
 0x146   : > { %1442 = vrot.lane.b32.xlu0 %v1428_v13, %s3379_s9  ;;  %1456 = vrot.lane.b32.xlu1 %v1426_v52, %s3379_s9  ;;  %v1430_v34 = vadd.f32 %v1414_v61, %v1395_v47  ;;  %v1656_v17 = vmul.f32 %v3787_v62, %v3584_v45  ;;  %v1710_v4 = vmul.f32 %v3823_v56, %v3702_v20 }
 0x147   : > { %7037 = vst [vmem:[#allocation60_spill] sm:$0xff] %v3956_v28  ;;  %7038 = vst [vmem:[#allocation61_spill] sm:$0xff] %v3965_v25  ;;  %v1722_v13 = vadd.f32 %v1706_v39, %v1687_v35  ;;  %v1708_v27 = vmul.f32 %v3823_v56, %v3676_v14  ;;  %v1658_v52 = vmul.f32 %v3787_v62, %v3603_v50 }
 0x148   : > { %v1864_v16 = vmul.f32 %v3830_v3, %v3592_v48  ;;  %v1691_v60 = vadd.f32 %v1675_v37, %v1656_v17  ;;  %v1689_v59 = vadd.f32 %v1673_v51, %v1654_v42  ;;  %v1712_v9 = vmul.f32 %v3823_v56, %v3722_v44 }
 0x149   : > { %v1868_v61 = vmul.f32 %v3830_v3, %v3653_v7  ;;  %v1693_v39 = vadd.f32 %v1677_v46, %v1658_v52  ;;  %v1845_v47 = vmul.f32 %v3814_v1, %v3556_v33  ;;  %v1899_v35 = vmul.f32 %v3833_v11, %v3647_v5 }
 0x14a   : > { %1458 = vrot.lane.b32.xlu0 %v1430_v34, %s3379_s9  ;;  %1738 = vrot.lane.b32.xlu1 %v1722_v13, %s3380_s10  ;;  %v1849_v37 = vmul.f32 %v3814_v1, %v3584_v45  ;;  %v1903_v42 = vmul.f32 %v3833_v11, %v3702_v20  ;;  %v1847_v51 = vmul.f32 %v3814_v1, %v3563_v36  ;;  %v671_v56 = vrot.slane %v3934_v12, 1 }
 0x14b   : > { %v1866_v46 = vmul.f32 %v3830_v3, %v3625_v58  ;;  %v1726_v34 = vadd.f32 %v1710_v4, %v1691_v60  ;;  %v1724_v13 = vadd.f32 %v1708_v27, %v1689_v59  ;;  %v1880_v52 = vadd.f32 %v1864_v16, %v1845_v47 }
 0x14c   : > { %v1728_v31 = vadd.f32 %v1712_v9, %v1693_v39  ;;  %v1884_v30 = vadd.f32 %v1868_v61, %v1849_v37  ;;  %v1901_v17 = vmul.f32 %v3833_v11, %v3676_v14  ;;  %v1870_v21 = vmul.f32 %v3830_v3, %v3693_v19 }
 0x14d   : > { %v1915_v62 = vadd.f32 %v1899_v35, %v1880_v52  ;;  %v2057_v60 = vmul.f32 %v3847_v41, %v3592_v48  ;;  %v1882_v16 = vadd.f32 %v1866_v46, %v1847_v51  ;;  %v1851_v59 = vmul.f32 %v3814_v1, %v3603_v50 }
 0x14e   : > { %1740 = vrot.lane.b32.xlu0 %v1726_v34, %s3380_s10  ;;  %1754 = vrot.lane.b32.xlu1 %v1724_v13, %s3380_s10  ;;  %v1919_v27 = vadd.f32 %v1903_v42, %v1884_v30  ;;  %v2061_v9 = vmul.f32 %v3847_v41, %v3653_v7  ;;  %v1905_v61 = vmul.f32 %v3833_v11, %v3722_v44  ;;  %v6726_v52 = vrot.slane %v3897_v0, 1 }
 0x14f   : > { %v2038_v39 = vmul.f32 %v3836_v63, %v3556_v33  ;;  %v2092_v47 = vmul.f32 %v3855_v24, %v3647_v5  ;;  %v2042_v35 = vmul.f32 %v3836_v63, %v3584_v45  ;;  %v2096_v30 = vmul.f32 %v3855_v24, %v3702_v20 }
 0x150   : > { %v2040_v37 = vmul.f32 %v3836_v63, %v3563_v36  ;;  %v2059_v42 = vmul.f32 %v3847_v41, %v3625_v58  ;;  %v2063_v51 = vmul.f32 %v3847_v41, %v3693_v19  ;;  %v1917_v46 = vadd.f32 %v1901_v17, %v1882_v16 }
 0x151   : > { %v1886_v34 = vadd.f32 %v1870_v21, %v1851_v59  ;;  %v2073_v13 = vadd.f32 %v2057_v60, %v2038_v39  ;;  %v2077_v4 = vadd.f32 %v2061_v9, %v2042_v35  ;;  %v2094_v22 = vmul.f32 %v3855_v24, %v3676_v14 }
 0x152   : > { %1756 = vrot.lane.b32.xlu0 %v1728_v31, %s3380_s10  ;;  %1931 = vrot.lane.b32.xlu1 %v1915_v62, %s3381_s12  ;;  %v2044_v11 = vmul.f32 %v3836_v63, %v3603_v50  ;;  %v2250_v19 = vmul.f32 %v3858_v32, %v3592_v48  ;;  %v2098_v62 = vmul.f32 %v3855_v24, %v3722_v44  ;;  %v6725_v21 = vrot.slane %v3938_v10, 7 }
 0x153   : > { %v1921_v41 = vadd.f32 %v1905_v61, %v1886_v34  ;;  %v2108_v31 = vadd.f32 %v2092_v47, %v2073_v13  ;;  %v2112_v17 = vadd.f32 %v2096_v30, %v2077_v4  ;;  %v2075_v60 = vadd.f32 %v2059_v42, %v2040_v37 }
 0x154   : > { %v2079_v16 = vadd.f32 %v2063_v51, %v2044_v11  ;;  %v2231_v59 = vmul.f32 %v3850_v38, %v3556_v33  ;;  %v2285_v9 = vmul.f32 %v3893_v57, %v3647_v5  ;;  %v2254_v61 = vmul.f32 %v3858_v32, %v3653_v7 }
 0x155   : > { %v7039_v39 = vrot.slane %v3934_v12, 7  ;;  %v7040_v47 = vrot.slane %v3897_v0, 7  ;;  %v592_v4 = vrot.slane %v3915_v23, 7  ;;  %v2110_v35 = vadd.f32 %v2094_v22, %v2075_v60 }
 0x156   : > { %1933 = vrot.lane.b32.xlu0 %v1919_v27, %s3381_s12  ;;  %1947 = vrot.lane.b32.xlu1 %v1917_v46, %s3381_s12  ;;  %v2266_v27 = vadd.f32 %v2250_v19, %v2231_v59  ;;  %v673_v30 = vrot.slane %v3938_v10, 1  ;;  %v6729_v37 = vrot.slane %v3965_v25, 1  ;;  %v2114_v42 = vadd.f32 %v2098_v62, %v2079_v16 }
 0x157   : > { %v4053_v11 = vsel %vm601_vm1, %v7040_v47, %v7039_v39  ;;  %v2235_v51 = vmul.f32 %v3850_v38, %v3584_v45  ;;  %v2233_v46 = vmul.f32 %v3850_v38, %v3563_v36  ;;  %v7042_v34 = vmov %v7040_v47 }
 0x158   : > { %7041 = vst [vmem:[#allocation62_spill] sm:$0xff] %v4053_v11  ;;  %v7043_v13 = vrot.slane %v3862_v8, 7  ;;  %v2252_v19 = vmul.f32 %v3858_v32, %v3625_v58  ;;  %v7045_v22 = vrot.slane %v3956_v28, 1  ;;  %v798_v60 = vmul.f32 %v3573_v40, %v4053_v11 }
 0x159   : > { %v4084_v16 = vsel %vm601_vm1, %v592_v4, %v6725_v21  ;;  %v2270_v59 = vadd.f32 %v2254_v61, %v2235_v51  ;;  %v2289_v47 = vmul.f32 %v3893_v57, %v3702_v20  ;;  %v7050_v51 = vrot.slane %v3866_v2, 7 }
 0x15a   : > { %v4068_v39 = vsel %vm601_vm1, %v7043_v13, %v7042_v34  ;;  %v4076_v62 = vsel %vm678_vm2, %v671_v56, %v7045_v22  ;;  %7047 = vst [vmem:[#allocation65_spill] sm:$0xff] %v4084_v16  ;;  %1949 = vrot.lane.b32.xlu0 %v1921_v41, %s3381_s12  ;;  %2124 = vrot.lane.b32.xlu1 %v2108_v31, %s3382_s13 }
 0x15b   : > { %7044 = vst [vmem:[#allocation63_spill] sm:$0xff] %v4068_v39  ;;  %7046 = vst [vmem:[#allocation64_spill] sm:$0xff] %v4076_v62  ;;  %v4094_v34 = vsel %vm678_vm2, %v6726_v52, %v671_v56  ;;  %v2287_v13 = vmul.f32 %v3893_v57, %v3676_v14  ;;  %v764_v22 = vmul.f32 %v3596_v49, %v3934_v12  ;;  %v6738_v52 = vrot.slane %v3915_v23, 1 }
 0x15c   : > { %7048 = vst [vmem:[#allocation66_spill] sm:$0xff] %v4094_v34  ;;  %v794_v41 = vmul.f32 %v3573_v40, %v4068_v39  ;;  %v4106_v31 = vsel %vm678_vm2, %v673_v30, %v6729_v37  ;;  %v849_v61 = vmul.f32 %v3611_v54, %v4076_v62  ;;  %v800_v56 = vmul.f32 %v3573_v40, %v4084_v16 }
 0x15d   : > { %7049 = vst [vmem:[#allocation67_spill] sm:$0xff] %v4106_v31  ;;  %v4116_v21 = vsel %vm601_vm1, %v7050_v51, %v592_v4  ;;  %v2268_v14 = vadd.f32 %v2252_v19, %v2233_v46  ;;  %v814_v58 = vadd.f32 %v798_v60, %v764_v22  ;;  %v760_v37 = vmul.f32 %v3596_v49, %v3897_v0 }
 0x15e   : > { %7051 = vst [vmem:[#allocation68_spill] sm:$0xff] %v4116_v21  ;;  %v845_v44 = vmul.f32 %v3611_v54, %v4094_v34  ;;  %2126 = vrot.lane.b32.xlu0 %v2112_v17, %s3382_s13  ;;  %2140 = vrot.lane.b32.xlu1 %v2110_v35, %s3382_s13  ;;  %v766_v5 = vmul.f32 %v3596_v49, %v3938_v10 }
 0x15f   : > { %v851_v4 = vmul.f32 %v3611_v54, %v4106_v31  ;;  %v4133_v46 = vsel %vm678_vm2, %v6738_v52, %v673_v30  ;;  %v2301_v19 = vadd.f32 %v2285_v9, %v2266_v27  ;;  %v2305_v60 = vadd.f32 %v2289_v47, %v2270_v59 }
 0x160   : > { %7052 = vst [vmem:[#allocation69_spill] sm:$0xff] %v4133_v46  ;;  %v810_v22 = vadd.f32 %v794_v41, %v760_v37  ;;  %v796_v17 = vmul.f32 %v3573_v40, %v4116_v21  ;;  %v2303_v51 = vadd.f32 %v2287_v13, %v2268_v14  ;;  %v865_v35 = vadd.f32 %v849_v61, %v814_v58  ;;  %v7053_v13 = vld [vmem:[#allocation32_spill] sm:$0xff] }
 0x161   : > { %v816_v48 = vadd.f32 %v800_v56, %v766_v5  ;;  %v992_v20 = vmul.f32 %v3679_v15, %v4053_v11  ;;  %v762_v2 = vmul.f32 %v3596_v49, %v3915_v23  ;;  %v847_v30 = vmul.f32 %v3611_v54, %v4133_v46 }
 0x162   : > { %v861_v7 = vadd.f32 %v845_v44, %v810_v22  ;;  %v973_v9 = vmul.f32 %v3708_v26, %v3934_v12  ;;  %2142 = vrot.lane.b32.xlu0 %v2114_v42, %s3382_s13  ;;  %2317 = vrot.lane.b32.xlu1 %v2301_v19, %s3383_s15  ;;  %v1027_v5 = vmul.f32 %v3729_v55, %v4076_v62  ;;  %v7054_v22 = vld [vmem:[#allocation34_spill] sm:$0xff] }
 0x163   : > { %v867_v58 = vadd.f32 %v851_v4, %v816_v48  ;;  %v988_v14 = vmul.f32 %v3679_v15, %v4068_v39  ;;  %v812_v44 = vadd.f32 %v796_v17, %v762_v2  ;;  %v969_v27 = vmul.f32 %v3708_v26, %v3897_v0 }
 0x164   : > { %v994_v37 = vmul.f32 %v3679_v15, %v4084_v16  ;;  %v990_v42 = vmul.f32 %v3679_v15, %v4116_v21  ;;  %v1008_v59 = vadd.f32 %v992_v20, %v973_v9  ;;  %v1023_v48 = vmul.f32 %v3729_v55, %v4094_v34 }
 0x165   : > { %v975_v47 = vmul.f32 %v3708_v26, %v3938_v10  ;;  %v1185_v41 = vmul.f32 %v7053_v13, %v4053_v11  ;;  %v863_v2 = vadd.f32 %v847_v30, %v812_v44  ;;  %v1029_v61 = vmul.f32 %v3729_v55, %v4106_v31 }
 0x166   : > { %v971_v56 = vmul.f32 %v3708_v26, %v3915_v23  ;;  %v1025_v4 = vmul.f32 %v3729_v55, %v4133_v46  ;;  %2319 = vrot.lane.b32.xlu0 %v2305_v60, %s3383_s15  ;;  %2333 = vrot.lane.b32.xlu1 %v2303_v51, %s3383_s15  ;;  %v1004_v20 = vadd.f32 %v988_v14, %v969_v27 }
 0x167   : > { %v1166_v19 = vmul.f32 %v3770_v43, %v3934_v12  ;;  %v1220_v17 = vmul.f32 %v7054_v22, %v4076_v62  ;;  %v1043_v30 = vadd.f32 %v1027_v5, %v1008_v59  ;;  %v1010_v9 = vadd.f32 %v994_v37, %v975_v47 }
 0x168   : > { %v1006_v44 = vadd.f32 %v990_v42, %v971_v56  ;;  %v1181_v52 = vmul.f32 %v7053_v13, %v4068_v39  ;;  %v1039_v25 = vadd.f32 %v1023_v48, %v1004_v20  ;;  %v1162_v60 = vmul.f32 %v3770_v43, %v3897_v0 }
 0x169   : > { %v1201_v8 = vadd.f32 %v1185_v41, %v1166_v19  ;;  %v1187_v51 = vmul.f32 %v7053_v13, %v4084_v16  ;;  %v1045_v14 = vadd.f32 %v1029_v61, %v1010_v9  ;;  %v1216_v28 = vmul.f32 %v7054_v22, %v4094_v34 }
 0x16a   : > { %v1041_v27 = vadd.f32 %v1025_v4, %v1006_v44  ;;  %v1168_v5 = vmul.f32 %v3770_v43, %v3938_v10  ;;  %885 = vrot.lane.b32.xlu0 %v865_v35, %s3376_s22  ;;  %883 = vrot.lane.b32.xlu1 %v861_v7, %s3376_s22  ;;  %v1222_v42 = vmul.f32 %v7054_v22, %v4106_v31  ;;  %v4218_v44 = vadd.s32 24, %v3544_v29 }
 0x16b   : > { %v4187_v37 = vadd.f32 %v1220_v17, %v1201_v8  ;;  %v1183_v59 = vmul.f32 %v7053_v13, %v4116_v21  ;;  %v1197_v48 = vadd.f32 %v1181_v52, %v1162_v60  ;;  %v1164_v47 = vmul.f32 %v3770_v43, %v3915_v23 }
 0x16c   : > { %v1378_v41 = vmul.f32 %v3798_v18, %v4053_v11  ;;  %v1374_v35 = vmul.f32 %v3798_v18, %v4068_v39  ;;  %v1203_v61 = vadd.f32 %v1187_v51, %v1168_v5  ;;  %v1218_v7 = vmul.f32 %v7054_v22, %v4133_v46  ;;  %7055 = vst [vmem:[#allocation70_spill] sm:$0xff] %v4218_v44 }
 0x16d   : > { %v1359_v8 = vmul.f32 %v3776_v53, %v3934_v12  ;;  %v1380_v56 = vmul.f32 %v3798_v18, %v4084_v16  ;;  %v1232_v52 = vadd.f32 %v1216_v28, %v1197_v48  ;;  %v1413_v4 = vmul.f32 %v3801_v6, %v4076_v62 }
 0x16e   : > { %v1355_v20 = vmul.f32 %v3776_v53, %v3897_v0  ;;  %v1409_v19 = vmul.f32 %v3801_v6, %v4094_v34  ;;  %901 = vrot.lane.b32.xlu0 %v867_v58, %s3376_s22  ;;  %899 = vrot.lane.b32.xlu1 %v863_v2, %s3376_s22  ;;  %v1199_v17 = vadd.f32 %v1183_v59, %v1164_v47  ;;  %v7056_v47 = vld [vmem:[#allocation39_spill] sm:$0xff]  ;;  %vm661_vm4 = vcmp.lt.s32.totalorder %v4218_v44, 31 }
 0x16f   : > { %v1361_v9 = vmul.f32 %v3776_v53, %v3938_v10  ;;  %v1415_v28 = vmul.f32 %v3801_v6, %v4106_v31  ;;  %v4220_v60 = vadd.f32 %v1222_v42, %v1203_v61  ;;  %v1394_v51 = vadd.f32 %v1378_v41, %v1359_v8  ;;  %v7057_v61 = vld [vmem:[#allocation36_spill] sm:$0xff] }
 0x170   : > { %v1390_v5 = vadd.f32 %v1374_v35, %v1355_v20  ;;  %v1376_v48 = vmul.f32 %v3798_v18, %v4116_v21  ;;  %v4224_v58 = vadd.f32 %v1218_v7, %v1199_v17  ;;  %v1357_v59 = vmul.f32 %v3776_v53, %v3915_v23  ;;  %v7058_v8 = vld [vmem:[#allocation40_spill] sm:$0xff]  ;;  %v7060_v20 = vld [vmem:[#allocation41_spill] sm:$0xff] }
 0x171   : > { %v1396_v2 = vadd.f32 %v1380_v56, %v1361_v9  ;;  %v1676_v43 = vmul.f32 %v7056_v47, %v4053_v11  ;;  %v4230_v26 = vadd.f32 %v1413_v4, %v1394_v51  ;;  %v1411_v42 = vmul.f32 %v3801_v6, %v4133_v46  ;;  %v7059_v4 = vld [vmem:[#allocation11_spill] sm:$0xff] }
 0x172   : > { %v4232_v22 = vadd.f32 %v1409_v19, %v1390_v5  ;;  %v1672_v41 = vmul.f32 %v7056_v47, %v4068_v39  ;;  %1064 = vrot.lane.b32.xlu0 %v1043_v30, %s3377_s1  ;;  %1062 = vrot.lane.b32.xlu1 %v1039_v25, %s3377_s1  ;;  %v1657_v7 = vmul.f32 %v7057_v61, %v3934_v12 }
 0x173   : > { %v4240_v35 = vadd.f32 %v1415_v28, %v1396_v2  ;;  %v1711_v56 = vmul.f32 %v7058_v8, %v4076_v62  ;;  %v1392_v19 = vadd.f32 %v1376_v48, %v1357_v59  ;;  %v1653_v17 = vmul.f32 %v7057_v61, %v3897_v0 }
 0x174   : > { %v1678_v9 = vmul.f32 %v7056_v47, %v4084_v16  ;;  %v1674_v25 = vmul.f32 %v7056_v47, %v4116_v21  ;;  %v1692_v30 = vadd.f32 %v1676_v43, %v1657_v7  ;;  %v1707_v28 = vmul.f32 %v7058_v8, %v4094_v34 }
 0x175   : > { %v1659_v51 = vmul.f32 %v7057_v61, %v3938_v10  ;;  %v1869_v5 = vmul.f32 %v3830_v3, %v4053_v11  ;;  %v1688_v48 = vadd.f32 %v1672_v41, %v1653_v17  ;;  %v1713_v2 = vmul.f32 %v7058_v8, %v4106_v31  ;;  %v7061_v17 = vld [vmem:[#allocation21_spill] sm:$0xff] }
 0x176   : > { %v1655_v59 = vmul.f32 %v7057_v61, %v3915_v23  ;;  %v1709_v43 = vmul.f32 %v7058_v8, %v4133_v46  ;;  %1080 = vrot.lane.b32.xlu0 %v1045_v14, %s3377_s1  ;;  %1078 = vrot.lane.b32.xlu1 %v1041_v27, %s3377_s1  ;;  %v1850_v7 = vmul.f32 %v3814_v1, %v3934_v12  ;;  %v6766_v6 = vrot.slane %v7061_v17, 7 }
 0x177   : > { %v1904_v47 = vmul.f32 %v7060_v20, %v4076_v62  ;;  %v1865_v41 = vmul.f32 %v3830_v3, %v4068_v39  ;;  %v4275_v53 = vadd.f32 %v1411_v42, %v1392_v19  ;;  %v1694_v61 = vadd.f32 %v1678_v9, %v1659_v51 }
 0x178   : > { %v1690_v18 = vadd.f32 %v1674_v25, %v1655_v59  ;;  %v1871_v14 = vmul.f32 %v3830_v3, %v4084_v16  ;;  %v4279_v8 = vadd.f32 %v1711_v56, %v1692_v30  ;;  %v4281_v27 = vadd.f32 %v1707_v28, %v1688_v48  ;;  %v7062_v25 = vld [vmem:[#allocation24_spill] sm:$0xff] }
 0x179   : > { %v1885_v13 = vadd.f32 %v1869_v5, %v1850_v7  ;;  %v1846_v55 = vmul.f32 %v3814_v1, %v3897_v0  ;;  %v4285_v49 = vadd.f32 %v1713_v2, %v1694_v61  ;;  %v1900_v42 = vmul.f32 %v7060_v20, %v4094_v34 }
 0x17a   : > { %v4287_v50 = vadd.f32 %v1709_v43, %v1690_v18  ;;  %v1852_v19 = vmul.f32 %v3814_v1, %v3938_v10  ;;  %1257 = vrot.lane.b32.xlu0 %v4187_v37, %s3378_s24  ;;  %1255 = vrot.lane.b32.xlu1 %v1232_v52, %s3378_s24  ;;  %v1906_v61 = vmul.f32 %v7060_v20, %v4106_v31  ;;  %v599_v18 = vrot.slane %v7062_v25, 7 }
 0x17b   : > { %v4296_v56 = vadd.f32 %v1904_v47, %v1885_v13  ;;  %v1881_v9 = vadd.f32 %v1865_v41, %v1846_v55  ;;  %v1848_v28 = vmul.f32 %v3814_v1, %v3915_v23  ;;  %v1867_v51 = vmul.f32 %v3830_v3, %v4116_v21  ;;  %v7063_v55 = vld [vmem:[#allocation43_spill] sm:$0xff] }
 0x17c   : > { %v1887_v30 = vadd.f32 %v1871_v14, %v1852_v19  ;;  %v1902_v37 = vmul.f32 %v7060_v20, %v4133_v46  ;;  %v2043_v13 = vmul.f32 %v3836_v63, %v3934_v12  ;;  %v2062_v52 = vmul.f32 %v7063_v55, %v4053_v11 }
 0x17d   : > { %v2058_v47 = vmul.f32 %v7063_v55, %v4068_v39  ;;  %v7064_v5 = vrot.slane %v7059_v4, 7  ;;  %v4319_v2 = vadd.f32 %v1900_v42, %v1881_v9  ;;  %v2097_v59 = vmul.f32 %v3855_v24, %v4076_v62  ;;  %v7065_v42 = vld [vmem:[#allocation12_spill] sm:$0xff] }
 0x17e   : > { %v2039_v43 = vmul.f32 %v3836_v63, %v3897_v0  ;;  %v2064_v7 = vmul.f32 %v7063_v55, %v4084_v16  ;;  %1273 = vrot.lane.b32.xlu0 %v4220_v60, %s3378_s24  ;;  %1271 = vrot.lane.b32.xlu1 %v4224_v58, %s3378_s24  ;;  %v4331_v41 = vadd.f32 %v1906_v61, %v1887_v30  ;;  %v7066_v19 = vrot.slane %v7065_v42, 7 }
 0x17f   : > { %v614_v48 = vsel %vm601_vm1, %v6766_v6, %v7064_v5  ;;  %v2093_v14 = vmul.f32 %v3855_v24, %v4094_v34  ;;  %v664_v5 = vrot.slane %v7065_v42, 1  ;;  %v2045_v6 = vmul.f32 %v3836_v63, %v3938_v10 }
 0x180   : > { %v616_v9 = vsel %vm601_vm1, %v599_v18, %v7066_v19  ;;  %v2099_v60 = vmul.f32 %v3855_v24, %v4106_v31  ;;  %v2060_v58 = vmul.f32 %v7063_v55, %v4116_v21  ;;  %v4348_v61 = vsel %vm581_vm3, %v614_v48, 0.0 }
 0x181   : > { %7067 = vst [vmem:[#allocation71_spill] sm:$0xff] %v4348_v61  ;;  %v1883_v30 = vadd.f32 %v1867_v51, %v1848_v28  ;;  %v2078_v16 = vadd.f32 %v2062_v52, %v2043_v13  ;;  %v2074_v62 = vadd.f32 %v2058_v47, %v2039_v43  ;;  %v2041_v19 = vmul.f32 %v3836_v63, %v3915_v23 }
 0x182   : > { %v2080_v11 = vadd.f32 %v2064_v7, %v2045_v6  ;;  %v2095_v10 = vmul.f32 %v3855_v24, %v4133_v46  ;;  %v7068_v12 = vrot.slane %v3556_v33, 1  ;;  %v7069_v31 = vrot.slane %v7059_v4, 1  ;;  %1450 = vrot.lane.b32.xlu0 %v4230_v26, %s3379_s9  ;;  %1448 = vrot.lane.b32.xlu1 %v4232_v22, %s3379_s9 }
 0x183   : > { %v4364_v28 = vsel %vm581_vm3, %v616_v9, 0.0  ;;  %v4370_v6 = vadd.f32 %v1902_v37, %v1883_v30  ;;  %v4372_v51 = vadd.f32 %v2097_v59, %v2078_v16  ;;  %v789_v13 = vmul.f32 %v3573_v40, %v4348_v61 }
 0x184   : > { %v4360_v20 = vsel %vm678_vm2, %v7069_v31, %v7068_v12  ;;  %7071 = vst [vmem:[#allocation73_spill] sm:$0xff] %v4364_v28  ;;  %v4377_v12 = vadd.f32 %v2093_v14, %v2074_v62  ;;  %v4379_v31 = vadd.f32 %v2099_v60, %v2080_v11  ;;  %v2076_v52 = vadd.f32 %v2060_v58, %v2041_v19  ;;  %v7080_v19 = vld [vmem:[#allocation18_spill] sm:$0xff] }
 0x185   : > { %7070 = vst [vmem:[#allocation72_spill] sm:$0xff] %v4360_v20  ;;  %v2232_v26 = vmul.f32 %v3850_v38, %v3897_v0  ;;  %v840_v22 = vmul.f32 %v3611_v54, %v4360_v20  ;;  %v2251_v16 = vmul.f32 %v3858_v32, %v4068_v39  ;;  %v791_v37 = vmul.f32 %v3573_v40, %v4364_v28 }
 0x186   : > { %v7072_v47 = vrot.slane %v7061_v17, 7  ;;  %v7073_v62 = vrot.slane %v3584_v45, 7  ;;  %v4397_v48 = vadd.f32 %v2095_v10, %v2076_v52  ;;  %v2286_v59 = vmul.f32 %v3893_v57, %v4094_v34  ;;  %1466 = vrot.lane.b32.xlu0 %v4240_v35, %s3379_s9  ;;  %1464 = vrot.lane.b32.xlu1 %v4275_v53, %s3379_s9  ;;  %v7079_v10 = vld [vmem:[#allocation49_spill] sm:$0xff] }
 0x187   : > { %v7075_v43 = vrot.slane %v3563_v36, 1  ;;  %v7077_v14 = vrot.slane %v7059_v4, 1  ;;  %v7078_v9 = vrot.slane %v7061_v17, 1  ;;  %v805_v58 = vadd.f32 %v789_v13, %v7079_v10  ;;  %v7095_v45 = vld [vmem:[#allocation37_spill] sm:$0xff] }
 0x188   : > { %v4395_v11 = vsel %vm601_vm1, %v7073_v62, %v7072_v47  ;;  %v983_v30 = vmul.f32 %v3679_v15, %v4348_v61  ;;  %v7081_v52 = vrot.slane %v7080_v19, 7  ;;  %v2234_v62 = vmul.f32 %v3850_v38, %v3915_v23  ;;  %v7086_v19 = vld [vmem:[#allocation17_spill] sm:$0xff] }
 0x189   : > { %7074 = vst [vmem:[#allocation74_spill] sm:$0xff] %v4395_v11  ;;  %v4405_v7 = vsel %vm678_vm2, %v664_v5, %v7075_v43  ;;  %v691_v60 = vsel %vm678_vm2, %v7078_v9, %v7077_v14  ;;  %v2253_v35 = vmul.f32 %v3858_v32, %v4116_v21  ;;  %v801_v53 = vmul.f32 %v3573_v40, %v4395_v11  ;;  %v7084_v9 = vld [vmem:[#allocation50_spill] sm:$0xff] }
 0x18a   : > { %7076 = vst [vmem:[#allocation75_spill] sm:$0xff] %v4405_v7  ;;  %v4424_v47 = vsel %vm601_vm1, %v7081_v52, %v599_v18  ;;  %v7083_v13 = vrot.slane %v7062_v25, 1  ;;  %v2267_v14 = vadd.f32 %v2251_v16, %v2232_v26  ;;  %v807_v10 = vadd.f32 %v791_v37, %v7084_v9  ;;  %1748 = vrot.lane.b32.xlu0 %v4279_v8, %s3380_s10  ;;  %v7087_v37 = vld [vmem:[#allocation53_spill] sm:$0xff] }
 0x18b   : > { %7082 = vst [vmem:[#allocation49_spill] sm:$0xff] %v4424_v47  ;;  %v4439_v18 = vsel %vm661_vm4, %v691_v60, 0.0  ;;  %v985_v52 = vmul.f32 %v3679_v15, %v4364_v28  ;;  %v842_v21 = vmul.f32 %v3611_v54, %v4405_v7  ;;  %v2288_v36 = vmul.f32 %v3893_v57, %v4133_v46  ;;  %1746 = vrot.lane.b32.xlu1 %v4281_v27, %s3380_s10  ;;  %v7089_v27 = vld [vmem:[#allocation31_spill] sm:$0xff] }
 0x18c   : > { %v693_v43 = vsel %vm678_vm2, %v7083_v13, %v664_v5  ;;  %7085 = vst [vmem:[#allocation50_spill] sm:$0xff] %v4439_v18  ;;  %v767_v34 = vmul.f32 %v7086_v19, %v7061_v17  ;;  %v803_v5 = vmul.f32 %v3573_v40, %v4424_v47  ;;  %v4455_v26 = vadd.f32 %v840_v22, %v805_v58 }
 0x18d   : > { %v4457_v16 = vadd.f32 %v2286_v59, %v2267_v14  ;;  %v999_v60 = vadd.f32 %v983_v30, %v7087_v37  ;;  %v4462_v13 = vsel %vm661_vm4, %v693_v43, 0.0  ;;  %v2269_v9 = vadd.f32 %v2253_v35, %v2234_v62  ;;  %v7090_v59 = vld [vmem:[#allocation54_spill] sm:$0xff]  ;;  %v7091_v30 = vld [vmem:[#allocation32_spill] sm:$0xff] }
 0x18e   : > { %7088 = vst [vmem:[#allocation53_spill] sm:$0xff] %v4462_v13  ;;  %v817_v46 = vadd.f32 %v801_v53, %v767_v34  ;;  %v852_v33 = vmul.f32 %v3611_v54, %v4439_v18  ;;  %v769_v8 = vmul.f32 %v7086_v19, %v7062_v25  ;;  %v4468_v39 = vadd.f32 %v842_v21, %v807_v10 }
 0x18f   : > { %v1018_v22 = vmul.f32 %v7089_v27, %v4360_v20  ;;  %v1001_v58 = vadd.f32 %v985_v52, %v7090_v59  ;;  %v1176_v14 = vmul.f32 %v7091_v30, %v4348_v61  ;;  %v4475_v43 = vadd.f32 %v2288_v36, %v2269_v9  ;;  %1764 = vrot.lane.b32.xlu0 %v4285_v49, %s3380_s10  ;;  %v7093_v49 = vld [vmem:[#allocation29_spill] sm:$0xff] }
 0x190   : > { %v819_v62 = vadd.f32 %v803_v5, %v769_v8  ;;  %v854_v34 = vmul.f32 %v3611_v54, %v4462_v13  ;;  %v995_v35 = vmul.f32 %v3679_v15, %v4395_v11  ;;  %1762 = vrot.lane.b32.xlu1 %v4287_v50, %s3380_s10  ;;  %v1020_v53 = vmul.f32 %v7089_v27, %v4405_v7  ;;  %v7092_v5 = vld [vmem:[#allocation34_spill] sm:$0xff]  ;;  %v7094_v8 = vld [vmem:[#allocation56_spill] sm:$0xff] }
 0x191   : > { %v4485_v21 = vadd.f32 %v1018_v22, %v999_v60  ;;  %v1178_v36 = vmul.f32 %v7091_v30, %v4364_v28  ;;  %v4492_v10 = vsub.s32 1, %v3544_v29  ;;  %v4494_v52 = vadd.f32 %v852_v33, %v817_v46 }
 0x192   : > { %v1211_v37 = vmul.f32 %v7092_v5, %v4360_v20  ;;  %v976_v9 = vmul.f32 %v7093_v49, %v7061_v17  ;;  %v997_v50 = vmul.f32 %v3679_v15, %v4424_v47  ;;  %v4502_v60 = vadd.f32 %v1020_v53, %v1001_v58  ;;  %v7096_v58 = vld [vmem:[#allocation57_spill] sm:$0xff]  ;;  %v7097_v53 = vld [vmem:[#allocation35_spill] sm:$0xff] }
 0x193   : > { %v1192_v22 = vadd.f32 %v1176_v14, %v7094_v8  ;;  %v1030_v59 = vmul.f32 %v7089_v27, %v4439_v18  ;;  %v1369_v33 = vmul.f32 %v7095_v45, %v4348_v61  ;;  %v4509_v46 = vadd.f32 %v854_v34, %v819_v62  ;;  %1941 = vrot.lane.b32.xlu0 %v4296_v56, %s3381_s12  ;;  %v7099_v56 = vld [vmem:[#allocation33_spill] sm:$0xff] }
 0x194   : > { %v1011_v44 = vadd.f32 %v995_v35, %v976_v9  ;;  %v978_v23 = vmul.f32 %v7093_v49, %v7062_v25  ;;  %v1188_v54 = vmul.f32 %v7091_v30, %v4395_v11  ;;  %1939 = vrot.lane.b32.xlu1 %v4319_v2, %s3381_s12  ;;  %v1194_v14 = vadd.f32 %v1178_v36, %v7096_v58 }
 0x195   : > { %v1350_v8 = vmul.f32 %v7097_v53, %v7059_v4  ;;  %v1371_v62 = vmul.f32 %v7095_v45, %v4364_v28  ;;  %v4525_v34 = vsub.s32 2, %v3544_v29  ;;  %v1032_v9 = vmul.f32 %v7089_v27, %v4462_v13 }
 0x196   : > { %v1013_v35 = vadd.f32 %v997_v50, %v978_v23  ;;  %v1169_v49 = vmul.f32 %v7099_v56, %v7061_v17  ;;  %v1190_v2 = vmul.f32 %v7091_v30, %v4424_v47  ;;  %v4533_v36 = vadd.f32 %v1211_v37, %v1192_v22  ;;  %v7102_v22 = vld [vmem:[#allocation38_spill] sm:$0xff] }
 0x197   : > { %7098 = vst [vmem:[#allocation54_spill] sm:$0xff] %v4525_v34  ;;  %v1213_v58 = vmul.f32 %v7092_v5, %v4405_v7  ;;  %v1385_v15 = vadd.f32 %v1369_v33, %v1350_v8  ;;  %v1352_v19 = vmul.f32 %v7097_v53, %v7065_v42  ;;  %v4539_v0 = vadd.f32 %v1030_v59, %v1011_v44 }
 0x198   : > { %v1204_v23 = vadd.f32 %v1188_v54, %v1169_v49  ;;  %v1223_v50 = vmul.f32 %v7092_v5, %v4439_v18  ;;  %v1171_v27 = vmul.f32 %v7099_v56, %v7062_v25  ;;  %1957 = vrot.lane.b32.xlu0 %v4331_v41, %s3381_s12  ;;  %1955 = vrot.lane.b32.xlu1 %v4370_v6, %s3381_s12  ;;  %v4554_v54 = vsub.s32 0, %v3544_v29  ;;  %v7104_v41 = vld [vmem:[#allocation39_spill] sm:$0xff] }
 0x199   : > { %7100 = vst [vmem:[#allocation56_spill] sm:$0xff] %v4539_v0  ;;  %v4549_v37 = vadd.f32 %v1213_v58, %v1194_v14  ;;  %v1404_v33 = vmul.f32 %v7102_v22, %v4360_v20  ;;  %v1387_v44 = vadd.f32 %v1371_v62, %v1352_v19  ;;  %v4556_v49 = vadd.f32 %v1032_v9, %v1013_v35  ;;  %v7106_v14 = vld [vmem:[#allocation36_spill] sm:$0xff] }
 0x19a   : > { %v1206_v59 = vadd.f32 %v1190_v2, %v1171_v27  ;;  %v1225_v8 = vmul.f32 %v7092_v5, %v4462_v13  ;;  %v1667_v56 = vmul.f32 %v7104_v41, %v4348_v61  ;;  %v1406_v6 = vmul.f32 %v7102_v22, %v4405_v7  ;;  %v7108_v27 = vld [vmem:[#allocation40_spill] sm:$0xff] }
 0x19b   : > { %7101 = vst [vmem:[#allocation57_spill] sm:$0xff] %v4549_v37  ;;  %7103 = vst [vmem:[#allocation76_spill] sm:$0xff] %v4556_v49  ;;  %v4562_v30 = vadd.f32 %v1404_v33, %v1385_v15  ;;  %v1648_v19 = vmul.f32 %v7106_v14, %v7059_v4  ;;  %v1381_v62 = vmul.f32 %v7095_v45, %v4395_v11  ;;  %v4589_v33 = vsub.s32 3, %v3544_v29 }
 0x19c   : > { %v4570_v35 = vadd.f32 %v1223_v50, %v1204_v23  ;;  %v1702_v9 = vmul.f32 %v7108_v27, %v4360_v20  ;;  %v1362_v2 = vmul.f32 %v7097_v53, %v7061_v17  ;;  %v1669_v15 = vmul.f32 %v7104_v41, %v4364_v28  ;;  %2134 = vrot.lane.b32.xlu0 %v4372_v51, %s3382_s13 }
 0x19d   : > { %7105 = vst [vmem:[#allocation77_spill] sm:$0xff] %v4562_v30  ;;  %2132 = vrot.lane.b32.xlu1 %v4377_v12, %s3382_s13  ;;  %v4582_v58 = vadd.f32 %v1406_v6, %v1387_v44  ;;  %v1416_v23 = vmul.f32 %v7102_v22, %v4439_v18  ;;  %v1383_v50 = vmul.f32 %v7095_v45, %v4424_v47  ;;  %7110 = vst [vmem:[#allocation79_spill] sm:$0xff] %v4589_v33  ;;  %v4597_v44 = vpop.permute.xlu1 %875 }
 0x19e   : > { %7107 = vst [vmem:[#allocation78_spill] sm:$0xff] %v4570_v35  ;;  %v4591_v5 = vadd.f32 %v1225_v8, %v1206_v59  ;;  %v1683_v35 = vadd.f32 %v1667_v56, %v1648_v19  ;;  %v1650_v51 = vmul.f32 %v7106_v14, %v7065_v42  ;;  %v1860_v12 = vmul.f32 %v3830_v3, %v4348_v61 }
 0x19f   : > { %7109 = vst [vmem:[#allocation40_spill] sm:$0xff] %v4582_v58  ;;  %7112 = vst [vmem:[#allocation81_spill] sm:$0xff] %v4597_v44  ;;  %v1397_v6 = vadd.f32 %v1381_v62, %v1362_v2  ;;  %v1704_v58 = vmul.f32 %v7108_v27, %v4405_v7  ;;  %v1364_v45 = vmul.f32 %v7097_v53, %v7062_v25 }
 0x1a0   : > { %7111 = vst [vmem:[#allocation80_spill] sm:$0xff] %v4591_v5  ;;  %v1679_v59 = vmul.f32 %v7104_v41, %v4395_v11  ;;  %v1685_v8 = vadd.f32 %v1669_v15, %v1650_v51  ;;  %v1841_v56 = vmul.f32 %v3814_v1, %v7059_v4  ;;  %v1862_v19 = vmul.f32 %v3830_v3, %v4364_v28  ;;  %v7113_v51 = vld [vmem:[#allocation60_spill] sm:$0xff] }
 0x1a1   : > { %v1681_v44 = vmul.f32 %v7104_v41, %v4424_v47  ;;  %2150 = vrot.lane.b32.xlu0 %v4379_v31, %s3382_s13  ;;  %2148 = vrot.lane.b32.xlu1 %v4397_v48, %s3382_s13  ;;  %v1399_v62 = vadd.f32 %v1383_v50, %v1364_v45  ;;  %v1418_v2 = vmul.f32 %v7102_v22, %v4462_v13  ;;  %v4626_v48 = vpop.permute.xlu0 %877  ;;  %v4628_v45 = vpop.permute.xlu1 %891  ;;  %v7116_v22 = vld [vmem:[#allocation41_spill] sm:$0xff] }
 0x1a2   : > { %v1660_v15 = vmul.f32 %v7106_v14, %v7061_v17  ;;  %v1876_v5 = vadd.f32 %v1860_v12, %v1841_v56  ;;  %v1843_v30 = vmul.f32 %v3814_v1, %v7065_v42  ;;  %v1662_v41 = vmul.f32 %v7106_v14, %v7062_v25  ;;  %7114 = vst [vmem:[#allocation60_spill] sm:$0xff] %v4626_v48 }
 0x1a3   : > { %v2053_v31 = vmul.f32 %v7063_v55, %v4348_v61  ;;  %7115 = vst [vmem:[#allocation82_spill] sm:$0xff] %v4628_v45  ;;  %v4630_v50 = vadd.f32 %v1702_v9, %v1683_v35  ;;  %v1895_v49 = vmul.f32 %v7116_v22, %v4360_v20  ;;  %v1714_v12 = vmul.f32 %v7108_v27, %v4439_v18 }
 0x1a4   : > { %v1695_v53 = vadd.f32 %v1679_v59, %v1660_v15  ;;  %v1878_v56 = vadd.f32 %v1862_v19, %v1843_v30  ;;  %v1697_v37 = vadd.f32 %v1681_v44, %v1662_v41  ;;  %v1716_v14 = vmul.f32 %v7108_v27, %v4462_v13  ;;  %v7117_v30 = vld [vmem:[#allocation47_spill] sm:$0xff] }
 0x1a5   : > { %v2034_v0 = vmul.f32 %v3836_v63, %v7059_v4  ;;  %873 = vrot.lane.b32.xlu0 %v4455_v26, %s3376_s22  ;;  %2325 = vrot.lane.b32.xlu1 %v4457_v16, %s3383_s15  ;;  %v4644_v35 = vadd.f32 %v1416_v23, %v1397_v6  ;;  %v4646_v9 = vadd.f32 %v1704_v58, %v1685_v8  ;;  %v4657_v45 = vpop.permute.xlu0 %893  ;;  %v4659_v16 = vpop.permute.xlu1 %1054 }
 0x1a6   : > { %v4648_v59 = vadd.f32 %v1418_v2, %v1399_v62  ;;  %v4651_v44 = vadd.f32 %v1895_v49, %v1876_v5  ;;  %v1897_v19 = vmul.f32 %v7116_v22, %v4405_v7  ;;  %v1872_v26 = vmul.f32 %v3830_v3, %v4395_v11  ;;  %7118 = vst [vmem:[#allocation41_spill] sm:$0xff] %v4657_v45 }
 0x1a7   : > { %v2069_v15 = vadd.f32 %v2053_v31, %v2034_v0  ;;  %7119 = vst [vmem:[#allocation83_spill] sm:$0xff] %v4659_v16  ;;  %v4661_v23 = vadd.f32 %v1714_v12, %v1695_v53  ;;  %v2088_v58 = vmul.f32 %v3855_v24, %v4360_v20  ;;  %v1853_v5 = vmul.f32 %v3814_v1, %v7061_v17 }
 0x1a8   : > { %v2055_v49 = vmul.f32 %v7063_v55, %v4364_v28  ;;  %v4669_v6 = vadd.f32 %v1897_v19, %v1878_v56  ;;  %v4671_v0 = vadd.f32 %v1716_v14, %v1697_v37  ;;  %v1907_v8 = vmul.f32 %v7116_v22, %v4439_v18  ;;  %v7120_v14 = vld [vmem:[#allocation61_spill] sm:$0xff] }
 0x1a9   : > { %v1874_v53 = vmul.f32 %v3830_v3, %v4424_v47  ;;  %889 = vrot.lane.b32.xlu0 %v4468_v39, %s3376_s22  ;;  %2341 = vrot.lane.b32.xlu1 %v4475_v43, %s3383_s15  ;;  %v2036_v62 = vmul.f32 %v3836_v63, %v7065_v42  ;;  %v2246_v2 = vmul.f32 %v3858_v32, %v4348_v61  ;;  %v4694_v19 = vpop.permute.xlu0 %1056  ;;  %v4696_v41 = vpop.permute.xlu1 %1070 }
 0x1aa   : > { %v2065_v37 = vmul.f32 %v7063_v55, %v4395_v11  ;;  %v4688_v12 = vadd.f32 %v2088_v58, %v2069_v15  ;;  %v1888_v56 = vadd.f32 %v1872_v26, %v1853_v5  ;;  %v2090_v39 = vmul.f32 %v3855_v24, %v4405_v7  ;;  %7121 = vst [vmem:[#allocation61_spill] sm:$0xff] %v4694_v19 }
 0x1ab   : > { %v1855_v43 = vmul.f32 %v3814_v1, %v7062_v25  ;;  %7122 = vst [vmem:[#allocation84_spill] sm:$0xff] %v4696_v41  ;;  %v2071_v16 = vadd.f32 %v2055_v49, %v2036_v62  ;;  %v2227_v61 = vmul.f32 %v3850_v38, %v7059_v4  ;;  %v2046_v31 = vmul.f32 %v3836_v63, %v7061_v17  ;;  %v872_v49 = vld [vmem:[%s6681_s3] ss:$8 sm:$0xf] }
 0x1ac   : > { %v7123_v15 = vrot.slane %v7117_v30, 7  ;;  %v7124_v26 = vrot.slane %v7113_v51, 7  ;;  %v1909_v19 = vmul.f32 %v7116_v22, %v4462_v13  ;;  %v2248_v62 = vmul.f32 %v3858_v32, %v4364_v28 }
 0x1ad   : > { %v1890_v5 = vadd.f32 %v1874_v53, %v1855_v43  ;;  %v2067_v4 = vmul.f32 %v7063_v55, %v4424_v47  ;;  %1052 = vrot.lane.b32.xlu0 %v4485_v21, %s3377_s1  ;;  %879 = vrot.lane.b32.xlu1 %v4494_v52, %s3376_s22  ;;  %v2262_v53 = vadd.f32 %v2246_v2, %v2227_v61  ;;  %v7127_v61 = vrot.slane %v7120_v14, 7  ;;  %v4738_v2 = vpop.permute.xlu0 %1072 }
 0x1ae   : > { %v615_v58 = vsel %vm601_vm1, %v7124_v26, %v7123_v15  ;;  %v2081_v43 = vadd.f32 %v2065_v37, %v2046_v31  ;;  %v2100_v15 = vmul.f32 %v3855_v24, %v4439_v18  ;;  %v7125_v26 = vld [vmem:[#allocation48_spill] sm:$0xff]  ;;  %v2229_v48 = vmul.f32 %v3850_v38, %v7065_v42  ;;  %v4740_v37 = vpop.permute.xlu1 %1247 }
 0x1af   : > { %v665_v41 = vrot.slane %v7125_v26, 1  ;;  %v2048_v28 = vmul.f32 %v3836_v63, %v7062_v25  ;;  %v4730_v47 = vsel %vm581_vm3, %v615_v58, 0.0  ;;  %v7126_v21 = vrot.slane %v7125_v26, 7  ;;  %7128 = vst [vmem:[#allocation48_spill] sm:$0xff] %v4738_v2  ;;  %7129 = vst [vmem:[#allocation85_spill] sm:$0xff] %v4740_v37  ;;  %v7148_v37 = vld [vmem:[#allocation55_spill] sm:$0xff] }
 0x1b0   : > { %v4742_v31 = vadd.f32 %v1907_v8, %v1888_v56  ;;  %v4744_v42 = vadd.f32 %v2090_v39, %v2071_v16  ;;  %v2281_v25 = vmul.f32 %v3893_v57, %v4360_v20  ;;  %v4749_v58 = vrot.slane %v872_v49, %v4492_v10 }
 0x1b1   : > { %v617_v52 = vsel %vm601_vm1, %v7127_v61, %v7126_v21  ;;  %v4752_v55 = vrot.slane %v872_v49, %v4525_v34  ;;  %v2264_v63 = vadd.f32 %v2248_v62, %v2229_v48  ;;  %v2083_v45 = vadd.f32 %v2067_v4, %v2048_v28  ;;  %1068 = vrot.lane.b32.xlu0 %v4502_v60, %s3377_s1 }
 0x1b2   : > { %7130 = vst [vmem:[#allocation86_spill] sm:$0xff] %v4749_v58  ;;  %v2102_v21 = vmul.f32 %v3855_v24, %v4462_v13  ;;  %895 = vrot.lane.b32.xlu1 %v4509_v46, %s3376_s22  ;;  %v4760_v16 = vadd.f32 %v1909_v19, %v1890_v5  ;;  %v4762_v8 = vadd.f32 %v2281_v25, %v2262_v53  ;;  %v4768_v48 = vsel %vm581_vm3, %v617_v52, 0.0  ;;  %v7133_v46 = vld [vmem:[#allocation52_spill] sm:$0xff]  ;;  %v4785_v5 = vpop.permute.xlu0 %1249  ;;  %v4787_v62 = vpop.permute.xlu1 %1263 }
 0x1b3   : > { %7131 = vst [vmem:[#allocation87_spill] sm:$0xff] %v4752_v55  ;;  %v790_v56 = vmul.f32 %v3573_v40, %v4730_v47  ;;  %v4770_v4 = vadd.f32 %v2100_v15, %v2081_v43  ;;  %v2283_v28 = vmul.f32 %v3893_v57, %v4405_v7  ;;  %v4775_v60 = vrot.slane %v872_v49, %v4554_v54  ;;  %v7139_v43 = vld [vmem:[#allocation17_spill] sm:$0xff]  ;;  %v7141_v7 = vld [vmem:[#allocation58_spill] sm:$0xff] }
 0x1b4   : > { %v7134_v39 = vrot.slane %v7133_v46, 1  ;;  %v7135_v25 = vrot.slane %v7117_v30, 1  ;;  %7136 = vst [vmem:[#allocation52_spill] sm:$0xff] %v4785_v5  ;;  %7137 = vst [vmem:[#allocation89_spill] sm:$0xff] %v4787_v62  ;;  %v4790_v53 = vrot.slane %v872_v49, %v4589_v33  ;;  %v756_v15 = vmul.f32 %v7139_v43, %v7117_v30  ;;  %v7155_v55 = vld [vmem:[#allocation29_spill] sm:$0xff] }
 0x1b5   : > { %7132 = vst [vmem:[#allocation88_spill] sm:$0xff] %v4775_v60  ;;  %v2258_v61 = vmul.f32 %v3858_v32, %v4395_v11  ;;  %v7140_v52 = vrot.slane %v7113_v51, 7  ;;  %v7142_v20 = vrot.slane %v7141_v7, 7  ;;  %v4806_v13 = vadd.f32 %v2102_v21, %v2083_v45  ;;  %1245 = vrot.lane.b32.xlu0 %v4533_v36, %s3378_s24  ;;  %v7147_v45 = vld [vmem:[#allocation19_spill] sm:$0xff] }
 0x1b6   : > { %v4783_v19 = vsel %vm678_vm2, %v7135_v25, %v7134_v39  ;;  %7138 = vst [vmem:[#allocation90_spill] sm:$0xff] %v4790_v53  ;;  %v4804_v25 = vadd.f32 %v2283_v28, %v2264_v63  ;;  %v792_v49 = vmul.f32 %v3573_v40, %v4768_v48  ;;  %v7144_v24 = vrot.slane %v7117_v30, 1 }
 0x1b7   : > { %v4802_v39 = vsel %vm601_vm1, %v7142_v20, %v7140_v52  ;;  %7143 = vst [vmem:[#allocation17_spill] sm:$0xff] %v4806_v13  ;;  %v7145_v11 = vrot.slane %v7113_v51, 1  ;;  %v7146_v20 = vld [vmem:[#allocation56_spill] sm:$0xff]  ;;  %v806_v63 = vadd.f32 %v790_v56, %v756_v15  ;;  %v841_v21 = vmul.f32 %v7147_v45, %v4783_v19  ;;  %v7150_v56 = vld [vmem:[#allocation26_spill] sm:$0xff]  ;;  %v7157_v13 = vld [vmem:[#allocation59_spill] sm:$0xff] }
 0x1b8   : > { %1058 = vrot.lane.b32.xlu1 %v7146_v20, %s3377_s1  ;;  %v2239_v28 = vmul.f32 %v3850_v38, %v7061_v17  ;;  %v3181_v52 = vld [vmem:[%s6681_s3 + $0x1] ss:$8 sm:$0xf]  ;;  %v7149_v62 = vrot.slane %v7148_v37, 1  ;;  %v802_v36 = vmul.f32 %v3573_v40, %v4802_v39  ;;  %v984_v15 = vmul.f32 %v7150_v56, %v4730_v47  ;;  %v4840_v20 = vpop.permute.xlu0 %1265  ;;  %v4842_v17 = vpop.permute.xlu1 %1440 }
 0x1b9   : > { %v692_v32 = vsel %vm678_vm2, %v7145_v11, %v7144_v24  ;;  %v758_v11 = vmul.f32 %v7139_v43, %v7125_v26  ;;  %7151 = vst [vmem:[#allocation56_spill] sm:$0xff] %v4840_v20  ;;  %7152 = vst [vmem:[#allocation19_spill] sm:$0xff] %v4842_v17  ;;  %v2293_v5 = vmul.f32 %v3893_v57, %v4439_v18  ;;  %v7156_v20 = vrot.slane %v7120_v14, 7  ;;  %v7160_v18 = vld [vmem:[#allocation57_spill] sm:$0xff] }
 0x1ba   : > { %v4831_v24 = vsel %vm678_vm2, %v665_v41, %v7149_v62  ;;  %v2274_v38 = vadd.f32 %v2258_v61, %v2239_v28  ;;  %v4848_v53 = vsel %vm661_vm4, %v692_v32, 0.0  ;;  %v768_v60 = vmul.f32 %v7139_v43, %v7113_v51  ;;  %1261 = vrot.lane.b32.xlu0 %v7160_v18, %s3378_s24  ;;  %v7173_v62 = vld [vmem:[#allocation78_spill] sm:$0xff] }
 0x1bb   : > { %7154 = vst [vmem:[#allocation55_spill] sm:$0xff] %v4848_v53  ;;  %v808_v2 = vadd.f32 %v792_v49, %v758_v11  ;;  %v965_v58 = vmul.f32 %v7155_v55, %v7117_v30  ;;  %v7158_v17 = vrot.slane %v7157_v13, 7  ;;  %v7159_v28 = vrot.slane %v7120_v14, 1  ;;  %v7161_v49 = vld [vmem:[#allocation76_spill] sm:$0xff] }
 0x1bc   : > { %1074 = vrot.lane.b32.xlu1 %v7161_v49, %s3377_s1  ;;  %v4871_v11 = vrot.slane %v3181_v52, %v4492_v10  ;;  %v4874_v57 = vrot.slane %v3181_v52, %v4525_v34  ;;  %v818_v29 = vadd.f32 %v802_v36, %v768_v60  ;;  %v853_v18 = vmul.f32 %v7147_v45, %v4848_v53  ;;  %v4887_v49 = vpop.permute.xlu1 %1456  ;;  %v3182_v60 = vld [vmem:[%s6681_s3 + $0x2] ss:$8 sm:$0xf] }
 0x1bd   : > { %v4860_v61 = vsel %vm601_vm1, %v7158_v17, %v7156_v20  ;;  %v694_v32 = vsel %vm678_vm2, %v7159_v28, %v665_v41  ;;  %v843_v17 = vmul.f32 %v7147_v45, %v4831_v24  ;;  %v4880_v20 = vadd.f32 %v841_v21, %v806_v63  ;;  %v4885_v28 = vpop.permute.xlu0 %1442  ;;  %7166 = vst [vmem:[#allocation76_spill] sm:$0xff] %v4887_v49  ;;  %v7171_v36 = vld [vmem:[#allocation31_spill] sm:$0xff] }
 0x1be   : > { %7162 = vst [vmem:[#allocation26_spill] sm:$0xff] %v4871_v11  ;;  %7163 = vst [vmem:[#allocation70_spill] sm:$0xff] %v4874_v57  ;;  %v1000_v41 = vadd.f32 %v984_v15, %v965_v58  ;;  %v4889_v11 = vadd.f32 %v2293_v5, %v2274_v38  ;;  %v4893_v57 = vsel %vm661_vm4, %v694_v32, 0.0  ;;  %v804_v63 = vmul.f32 %v3573_v40, %v4860_v61  ;;  %v7172_v40 = vld [vmem:[#allocation77_spill] sm:$0xff] }
 0x1bf   : > { %7164 = vst [vmem:[#allocation29_spill] sm:$0xff] %v4880_v20  ;;  %7165 = vst [vmem:[#allocation57_spill] sm:$0xff] %v4885_v28  ;;  %v986_v58 = vmul.f32 %v7150_v56, %v4768_v48  ;;  %v4902_v21 = vadd.f32 %v843_v17, %v808_v2  ;;  %v4905_v38 = vrot.slane %v3181_v52, %v4554_v54  ;;  %1438 = vrot.lane.b32.xlu0 %v7172_v40, %s3379_s9 }
 0x1c0   : > { %7167 = vst [vmem:[#allocation91_spill] sm:$0xff] %v4889_v11  ;;  %v4908_v5 = vrot.slane %v3181_v52, %v4589_v33  ;;  %v1019_v15 = vmul.f32 %v7171_v36, %v4783_v19  ;;  %1251 = vrot.lane.b32.xlu1 %v7173_v62, %s3378_s24  ;;  %v770_v32 = vmul.f32 %v7139_v43, %v7120_v14  ;;  %v4936_v28 = vpop.permute.xlu1 %1738 }
 0x1c1   : > { %7168 = vst [vmem:[#allocation92_spill] sm:$0xff] %v4902_v21  ;;  %7169 = vst [vmem:[#allocation93_spill] sm:$0xff] %v4905_v38  ;;  %v967_v2 = vmul.f32 %v7155_v55, %v7125_v26  ;;  %v996_v17 = vmul.f32 %v7150_v56, %v4802_v39  ;;  %v4924_v52 = vadd.f32 %v853_v18, %v818_v29  ;;  %v4934_v43 = vpop.permute.xlu0 %1458  ;;  %v7179_v18 = vld [vmem:[#allocation32_spill] sm:$0xff] }
 0x1c2   : > { %7170 = vst [vmem:[#allocation94_spill] sm:$0xff] %v4908_v5  ;;  %v4926_v49 = vadd.f32 %v1019_v15, %v1000_v41  ;;  %v855_v40 = vmul.f32 %v7147_v45, %v4893_v57  ;;  %v4931_v62 = vrot.slane %v3182_v60, %v4492_v10  ;;  %7177 = vst [vmem:[#allocation95_spill] sm:$0xff] %v4934_v43 }
 0x1c3   : > { %7174 = vst [vmem:[#allocation31_spill] sm:$0xff] %v4924_v52  ;;  %7178 = vst [vmem:[#allocation96_spill] sm:$0xff] %v4936_v28  ;;  %v820_v5 = vadd.f32 %v804_v63, %v770_v32  ;;  %v1002_v38 = vadd.f32 %v986_v58, %v967_v2  ;;  %v977_v29 = vmul.f32 %v7155_v55, %v7113_v51  ;;  %v7181_v63 = vld [vmem:[#allocation40_spill] sm:$0xff]  ;;  %v7183_v2 = vld [vmem:[#allocation33_spill] sm:$0xff] }
 0x1c4   : > { %7175 = vst [vmem:[#allocation77_spill] sm:$0xff] %v4926_v49  ;;  %7176 = vst [vmem:[#allocation78_spill] sm:$0xff] %v4931_v62  ;;  %v1177_v41 = vmul.f32 %v7179_v18, %v4730_v47  ;;  %v4943_v15 = vrot.slane %v3182_v60, %v4525_v34  ;;  %v1021_v45 = vmul.f32 %v7171_v36, %v4831_v24  ;;  %1454 = vrot.lane.b32.xlu0 %v7181_v63, %s3379_s9  ;;  %v7182_v58 = vld [vmem:[#allocation80_spill] sm:$0xff] }
 0x1c5   : > { %v1031_v62 = vmul.f32 %v7171_v36, %v4848_v53  ;;  %v998_v28 = vmul.f32 %v7150_v56, %v4860_v61  ;;  %1267 = vrot.lane.b32.xlu1 %v7182_v58, %s3378_s24  ;;  %v1012_v32 = vadd.f32 %v996_v17, %v977_v29  ;;  %v1158_v43 = vmul.f32 %v7183_v2, %v7117_v30  ;;  %v4974_v29 = vpop.permute.xlu0 %1740  ;;  %v4976_v58 = vpop.permute.xlu1 %1754 }
 0x1c6   : > { %7180 = vst [vmem:[#allocation32_spill] sm:$0xff] %v4943_v15  ;;  %v1179_v15 = vmul.f32 %v7179_v18, %v4768_v48  ;;  %v4960_v49 = vstv %s4878_s25  ;;  %v4965_v52 = vrot.slane %v3182_v60, %v4554_v54  ;;  %v4968_v56 = vrot.slane %v3182_v60, %v4589_v33  ;;  %7187 = vst [vmem:[#allocation97_spill] sm:$0xff] %v4974_v29 }
 0x1c7   : > { %7184 = vst [vmem:[#allocation40_spill] sm:$0xff] %v4960_v49  ;;  %v979_v63 = vmul.f32 %v7155_v55, %v7120_v14  ;;  %v1189_v17 = vmul.f32 %v7179_v18, %v4802_v39  ;;  %7188 = vst [vmem:[#allocation98_spill] sm:$0xff] %v4976_v58  ;;  %v4978_v21 = vadd.f32 %v855_v40, %v820_v5  ;;  %v7190_v5 = vld [vmem:[#allocation37_spill] sm:$0xff]  ;;  %v7194_v58 = vld [vmem:[#allocation35_spill] sm:$0xff] }
 0x1c8   : > { %7185 = vst [vmem:[#allocation80_spill] sm:$0xff] %v4965_v52  ;;  %7186 = vst [vmem:[#allocation33_spill] sm:$0xff] %v4968_v56  ;;  %v4980_v11 = vadd.f32 %v1021_v45, %v1002_v38  ;;  %v1193_v20 = vadd.f32 %v1177_v41, %v1158_v43  ;;  %v1160_v60 = vmul.f32 %v7183_v2, %v7125_v26  ;;  %v3183_v52 = vld [vmem:[%s6681_s3 + $0x3] ss:$8 sm:$0xf]  ;;  %1736 = vrot.lane.b32.xlu0 %v4630_v50, %s3380_s10 }
 0x1c9   : > { %v1014_v56 = vadd.f32 %v998_v28, %v979_v63  ;;  %v1033_v55 = vmul.f32 %v7171_v36, %v4893_v57  ;;  %v1170_v29 = vmul.f32 %v7183_v2, %v7113_v51  ;;  %v1370_v40 = vmul.f32 %v7190_v5, %v4730_v47  ;;  %1444 = vrot.lane.b32.xlu1 %v4644_v35, %s3379_s9  ;;  %v7192_v38 = vld [vmem:[#allocation34_spill] sm:$0xff]  ;;  %v5010_v35 = vpop.permute.xlu0 %1756 }
 0x1ca   : > { %7189 = vst [vmem:[#allocation99_spill] sm:$0xff] %v4980_v11  ;;  %v4997_v28 = vadd.f32 %v1031_v62, %v1012_v32  ;;  %v1212_v36 = vmul.f32 %v7192_v38, %v4783_v19  ;;  %v1195_v43 = vadd.f32 %v1179_v15, %v1160_v60  ;;  %v5002_v41 = vstv %s4922_s19  ;;  %7195 = vst [vmem:[#allocation35_spill] sm:$0xff] %v5010_v35  ;;  %v5012_v62 = vpop.permute.xlu1 %1931  ;;  %s7487_s19 = sshll.u32 %s3485_s23, 6 }
 0x1cb   : > { %7193 = vst [vmem:[#allocation34_spill] sm:$0xff] %v5002_v41  ;;  %v1205_v45 = vadd.f32 %v1189_v17, %v1170_v29  ;;  %v1224_v63 = vmul.f32 %v7192_v38, %v4848_v53  ;;  %v1351_v11 = vmul.f32 %v7194_v58, %v7117_v30  ;;  %v1191_v50 = vmul.f32 %v7179_v18, %v4860_v61  ;;  %s332_s0 = scalar_lea.vmem %s6686_s8, %s7487_s19 }
 0x1cc   : > { %7191 = vst [vmem:[#allocation37_spill] sm:$0xff] %v4997_v28  ;;  %7196 = vst [vmem:[#allocation100_spill] sm:$0xff] %v5012_v62  ;;  %v5014_v32 = vadd.f32 %v1212_v36, %v1193_v20  ;;  %v5017_v15 = vrot.slane %v3183_v52, %v4492_v10  ;;  %v5020_v17 = vrot.slane %v3183_v52, %v4525_v34  ;;  %1752 = vrot.lane.b32.xlu0 %v4646_v9, %s3380_s10 }
 0x1cd   : > { %v1214_v29 = vmul.f32 %v7192_v38, %v4831_v24  ;;  %v5024_v60 = vadd.f32 %v1033_v55, %v1014_v56  ;;  %v5027_v18 = vrot.slane %v3183_v52, %v4554_v54  ;;  %v1386_v28 = vadd.f32 %v1370_v40, %v1351_v11  ;;  %1460 = vrot.lane.b32.xlu1 %v4648_v59, %s3379_s9  ;;  %v7202_v56 = vld [vmem:[#allocation38_spill] sm:$0xff]  ;;  %v7205_v40 = vld [vmem:[#allocation23_spill] sm:$0xff] }
 0x1ce   : > { %7197 = vst [vmem:[#allocation101_spill] sm:$0xff] %v5017_v15  ;;  %7198 = vst [vmem:[#allocation102_spill] sm:$0xff] %v5020_v17  ;;  %v1172_v62 = vmul.f32 %v7183_v2, %v7120_v14  ;;  %v5038_v36 = vrot.slane %v3183_v52, %v4589_v33  ;;  %v1405_v55 = vmul.f32 %v7202_v56, %v4783_v19  ;;  %v5043_v35 = vstv %s4962_s20  ;;  %v5048_v11 = vld [vmem:[%s6681_s3 + $0x5] ss:$8 sm:$0xf] }
 0x1cf   : > { %7199 = vst [vmem:[#allocation103_spill] sm:$0xff] %v5027_v18  ;;  %v5035_v20 = vadd.f32 %v1214_v29, %v1195_v43  ;;  %7203 = vst [vmem:[#allocation38_spill] sm:$0xff] %v5043_v35  ;;  %v5050_v2 = vadd.f32 %v1224_v63, %v1205_v45  ;;  %v1226_v59 = vmul.f32 %v7192_v38, %v4893_v57  ;;  %v5056_v43 = vpop.permute.xlu0 %1933  ;;  %v5058_v29 = vpop.permute.xlu1 %1947  ;;  %v7209_v17 = vld [vmem:[#allocation62_spill] sm:$0xff]  ;;  %v7210_v63 = vld [vmem:[#allocation28_spill] sm:$0xff] }
 0x1d0   : > { %7201 = vst [vmem:[#allocation105_spill] sm:$0xff] %v5038_v36  ;;  %v1207_v9 = vadd.f32 %v1191_v50, %v1172_v62  ;;  %v1570_v52 = vmul.f32 %v5002_v41, %v7205_v40  ;;  %7206 = vst [vmem:[#allocation23_spill] sm:$0xff] %v5056_v43  ;;  %v7208_v36 = vld [vmem:[#allocation15_spill] sm:$0xff]  ;;  %v1571_v45 = vmul.f32 %v5002_v41, %v7209_v17  ;;  %v7212_v62 = vld [vmem:[#allocation64_spill] sm:$0xff]  ;;  %1929 = vrot.lane.b32.xlu0 %v4651_v44, %s3381_s12 }
 0x1d1   : > { %7200 = vst [vmem:[#allocation104_spill] sm:$0xff] %v5035_v20  ;;  %7204 = vst [vmem:[#allocation106_spill] sm:$0xff] %v5050_v2  ;;  %v1551_v18 = vmul.f32 %v4960_v49, %v7208_v36  ;;  %v1552_v20 = vmul.f32 %v4960_v49, %v7141_v7  ;;  %v1605_v50 = vmul.f32 %v5043_v35, %v7210_v63  ;;  %1742 = vrot.lane.b32.xlu1 %v4661_v23, %s3380_s10  ;;  %v7220_v2 = vld [vmem:[#allocation13_spill] sm:$0xff] }
 0x1d2   : > { %7207 = vst [vmem:[#allocation107_spill] sm:$0xff] %v5058_v29  ;;  %v5068_v38 = vadd.f32 %v1405_v55, %v1386_v28  ;;  %v1606_v40 = vmul.f32 %v5043_v35, %v7212_v62  ;;  %v5074_v29 = vrot.slane %v5048_v11, %v4554_v54  ;;  %v1372_v36 = vmul.f32 %v7190_v5, %v4768_v48  ;;  %v7215_v55 = vld [vmem:[#allocation16_spill] sm:$0xff]  ;;  %v7216_v62 = vld [vmem:[#allocation63_spill] sm:$0xff] }
 0x1d3   : > { %v5084_v28 = vrot.slane %v5048_v11, %v4492_v10  ;;  %v1566_v63 = vmul.f32 %v5002_v41, %v7215_v55  ;;  %v1567_v7 = vmul.f32 %v5002_v41, %v7216_v62  ;;  %v5090_v17 = vadd.f32 %v1226_v59, %v1207_v9  ;;  %v5096_v23 = vpop.permute.xlu0 %1949  ;;  %v7221_v9 = vld [vmem:[#allocation22_spill] sm:$0xff] }
 0x1d4   : > { %7211 = vst [vmem:[#allocation15_spill] sm:$0xff] %v5068_v38  ;;  %7213 = vst [vmem:[#allocation28_spill] sm:$0xff] %v5074_v29  ;;  %v1586_v43 = vadd.f32 %v1570_v52, %v1551_v18  ;;  %v1353_v29 = vmul.f32 %v7194_v58, %v7125_v26  ;;  %v1382_v44 = vmul.f32 %v7190_v5, %v4802_v39  ;;  %v5098_v38 = vpop.permute.xlu1 %2124  ;;  %v7222_v52 = vld [vmem:[#allocation66_spill] sm:$0xff]  ;;  %1945 = vrot.lane.b32.xlu0 %v4669_v6, %s3381_s12 }
 0x1d5   : > { %7214 = vst [vmem:[#allocation108_spill] sm:$0xff] %v5084_v28  ;;  %7217 = vst [vmem:[#allocation16_spill] sm:$0xff] %v5090_v17  ;;  %v1587_v28 = vadd.f32 %v1571_v45, %v1552_v20  ;;  %v1547_v55 = vmul.f32 %v4960_v49, %v7220_v2  ;;  %v1548_v62 = vmul.f32 %v4960_v49, %v7133_v46  ;;  %1758 = vrot.lane.b32.xlu1 %v4671_v0, %s3380_s10  ;;  %v7223_v2 = vld [vmem:[#allocation27_spill] sm:$0xff] }
 0x1d6   : > { %7218 = vst [vmem:[#allocation63_spill] sm:$0xff] %v5096_v23  ;;  %7219 = vst [vmem:[#allocation109_spill] sm:$0xff] %v5098_v38  ;;  %v1601_v18 = vmul.f32 %v5043_v35, %v7221_v9  ;;  %v5106_v59 = vadd.f32 %v1605_v50, %v1586_v43  ;;  %v1602_v17 = vmul.f32 %v5043_v35, %v7222_v52  ;;  %v7229_v38 = vld [vmem:[#allocation67_spill] sm:$0xff] }
 0x1d7   : > { %v1388_v15 = vadd.f32 %v1372_v36, %v1353_v29  ;;  %v1363_v23 = vmul.f32 %v7194_v58, %v7113_v51  ;;  %v1582_v20 = vadd.f32 %v1566_v63, %v1547_v55  ;;  %v1583_v46 = vadd.f32 %v1567_v7, %v1548_v62  ;;  %v7224_v36 = vld [vmem:[#allocation65_spill] sm:$0xff]  ;;  %v5124_v52 = vpop.permute.xlu0 %2126  ;;  %v7227_v63 = vld [vmem:[#allocation18_spill] sm:$0xff] }
 0x1d8   : > { %v1572_v45 = vmul.f32 %v5002_v41, %v7223_v2  ;;  %v1407_v43 = vmul.f32 %v7202_v56, %v4831_v24  ;;  %v1417_v29 = vmul.f32 %v7202_v56, %v4848_v53  ;;  %v1573_v9 = vmul.f32 %v5002_v41, %v7224_v36  ;;  %7225 = vst [vmem:[#allocation13_spill] sm:$0xff] %v5124_v52  ;;  %v5126_v6 = vpop.permute.xlu1 %2140  ;;  %v7228_v62 = vld [vmem:[#allocation30_spill] sm:$0xff] }
 0x1d9   : > { %v1398_v50 = vadd.f32 %v1382_v44, %v1363_v23  ;;  %7226 = vst [vmem:[#allocation22_spill] sm:$0xff] %v5126_v6  ;;  %v5128_v0 = vadd.f32 %v1606_v40, %v1587_v28  ;;  %v5130_v7 = vadd.f32 %v1601_v18, %v1582_v20  ;;  %v1553_v55 = vmul.f32 %v4960_v49, %v7227_v63  ;;  %v7232_v20 = vld [vmem:[#allocation20_spill] sm:$0xff] }
 0x1da   : > { %v1607_v44 = vmul.f32 %v5043_v35, %v7228_v62  ;;  %v5136_v23 = vadd.f32 %v1602_v17, %v1583_v46  ;;  %v5138_v2 = vadd.f32 %v1407_v43, %v1388_v15  ;;  %v1554_v36 = vmul.f32 %v4960_v49, %v7157_v13  ;;  %2122 = vrot.lane.b32.xlu0 %v4688_v12, %s3382_s13  ;;  %v7231_v17 = vld [vmem:[#allocation14_spill] sm:$0xff]  ;;  %v7234_v12 = vld [vmem:[#allocation68_spill] sm:$0xff] }
 0x1db   : > { %v1608_v6 = vmul.f32 %v5043_v35, %v7229_v38  ;;  %1935 = vrot.lane.b32.xlu1 %v4742_v31, %s3381_s12  ;;  %v7230_v40 = vlaneseq  ;;  %v1588_v18 = vadd.f32 %v1572_v45, %v1553_v55  ;;  %v1549_v15 = vmul.f32 %v4960_v49, %v7231_v17  ;;  %v5163_v62 = vpop.permute.xlu0 %2142  ;;  %v7241_v17 = vld [vmem:[#allocation25_spill] sm:$0xff] }
 0x1dc   : > { %v1568_v46 = vmul.f32 %v5002_v41, %v7232_v20  ;;  %v5155_v43 = vadd.f32 %v1417_v29, %v1398_v50  ;;  %v1589_v13 = vadd.f32 %v1573_v9, %v1554_v36  ;;  %v5159_v38 = vrot.slane %v5048_v11, %v4525_v34  ;;  %7235 = vst [vmem:[#allocation14_spill] sm:$0xff] %v5163_v62  ;;  %v7239_v29 = vld [vmem:[#allocation39_spill] sm:$0xff] }
 0x1dd   : > { %v5149_v28 = vand.u32 127, %v7230_v40  ;;  %v1569_v31 = vmul.f32 %v5002_v41, %v7234_v12  ;;  %v5165_v40 = vpop.permute.xlu1 %2317  ;;  %v5167_v45 = vadd.f32 %v1607_v44, %v1588_v18  ;;  %v5171_v55 = vrot.slane %v5048_v11, %v4589_v33  ;;  %v7242_v12 = vld [vmem:[#allocation69_spill] sm:$0xff] }
 0x1de   : > { %7233 = vst [vmem:[#allocation66_spill] sm:$0xff] %v5159_v38  ;;  %7236 = vst [vmem:[#allocation20_spill] sm:$0xff] %v5165_v40  ;;  %v1550_v50 = vmul.f32 %v4960_v49, %v7148_v37  ;;  %v1668_v36 = vmul.f32 %v7239_v29, %v4730_v47  ;;  %v5177_v9 = vadd.f32 %v1608_v6, %v1589_v13  ;;  %2138 = vrot.lane.b32.xlu0 %v4744_v42, %s3382_s13  ;;  %v7243_v13 = vld [vmem:[#allocation36_spill] sm:$0xff] }
 0x1df   : > { %7237 = vst [vmem:[#allocation68_spill] sm:$0xff] %v5167_v45  ;;  %7238 = vst [vmem:[#allocation110_spill] sm:$0xff] %v5171_v55  ;;  %v1603_v20 = vmul.f32 %v5043_v35, %v7241_v17  ;;  %v1604_v41 = vmul.f32 %v5043_v35, %v7242_v12  ;;  %v1384_v44 = vmul.f32 %v7190_v5, %v4860_v61  ;;  %1951 = vrot.lane.b32.xlu1 %v4760_v16, %s3381_s12  ;;  %v5200_v16 = vpop.permute.xlu0 %2319  ;;  %v7280_v55 = vld [vmem:[#allocation90_spill] sm:$0xff] }
 0x1e0   : > { %7240 = vst [vmem:[#allocation39_spill] sm:$0xff] %v5177_v9  ;;  %vm907_vm5 = vcmp.lt.s32.totalorder %v5149_v28, 17  ;;  %v1584_v37 = vadd.f32 %v1568_v46, %v1549_v15  ;;  %v1649_v11 = vmul.f32 %v7243_v13, %v7117_v30  ;;  %v1670_v6 = vmul.f32 %v7239_v29, %v4768_v48  ;;  %7244 = vst [vmem:[#allocation25_spill] sm:$0xff] %v5200_v16 }
 0x1e1   : > { %v1585_v18 = vadd.f32 %v1569_v31, %v1550_v50  ;;  %v1703_v17 = vmul.f32 %v7108_v27, %v4783_v19  ;;  %v1365_v5 = vmul.f32 %v7194_v58, %v7120_v14  ;;  %v1680_v42 = vmul.f32 %v7239_v29, %v4802_v39  ;;  %v5202_v12 = vpop.permute.xlu1 %2333  ;;  %v3185_v31 = vld [vmem:[%s6681_s3 + $0x6] ss:$8 sm:$0xf] }
 0x1e2   : > { %7245 = vst [vmem:[#allocation69_spill] sm:$0xff] %v5202_v12  ;;  %v1684_v15 = vadd.f32 %v1668_v36, %v1649_v11  ;;  %v1419_v46 = vmul.f32 %v7202_v56, %v4893_v57  ;;  %v1651_v50 = vmul.f32 %v7243_v13, %v7125_v26  ;;  %v1861_v58 = vmul.f32 %v3830_v3, %v4730_v47 }
 0x1e3   : > { %v5213_v35 = vadd.f32 %v1603_v20, %v1584_v37  ;;  %v1400_v49 = vadd.f32 %v1384_v44, %v1365_v5  ;;  %v1661_v16 = vmul.f32 %v7243_v13, %v7113_v51  ;;  %v1682_v36 = vmul.f32 %v7239_v29, %v4860_v61  ;;  %2315 = vrot.lane.b32.xlu0 %v4762_v8, %s3383_s15  ;;  %v886_v5 = vpop.permute.xlu0 %885 }
 0x1e4   : > { %2128 = vrot.lane.b32.xlu1 %v4770_v4, %s3382_s13  ;;  %vm1084_vm6 = vcmp.lt.s32.totalorder %v5149_v28, 16  ;;  %v5224_v56 = vadd.f32 %v1604_v41, %v1585_v18  ;;  %v1686_v11 = vadd.f32 %v1670_v6, %v1651_v50  ;;  %v1842_v20 = vmul.f32 %v3814_v1, %v7117_v30 }
 0x1e5   : > { %7246 = vst [vmem:[#allocation36_spill] sm:$0xff] %v5213_v35  ;;  %v5229_v44 = vrot.slane %v3185_v31, %v4554_v54  ;;  %v1696_v37 = vadd.f32 %v1680_v42, %v1661_v16  ;;  %v1715_v29 = vmul.f32 %v7108_v27, %v4848_v53  ;;  %v1663_v8 = vmul.f32 %v7243_v13, %v7120_v14  ;;  %v884_v4 = vpop.permute.xlu1 %883  ;;  %v3186_v42 = vld [vmem:[%s6681_s3 + $0x7] ss:$8 sm:$0xf] }
 0x1e6   : > { %7247 = vst [vmem:[#allocation111_spill] sm:$0xff] %v5224_v56  ;;  %v5235_v63 = vadd.f32 %v1703_v17, %v1684_v15  ;;  %v5238_v41 = vrot.slane %v3185_v31, %v4492_v10  ;;  %v1705_v6 = vmul.f32 %v7108_v27, %v4831_v24  ;;  %v1877_v18 = vadd.f32 %v1861_v58, %v1842_v20  ;;  %v7278_v35 = vld [vmem:[#allocation92_spill] sm:$0xff] }
 0x1e7   : > { %7248 = vst [vmem:[#allocation112_spill] sm:$0xff] %v5229_v44  ;;  %v5245_v16 = vadd.f32 %v1419_v46, %v1400_v49  ;;  %v5248_v50 = vrot.slane %v3185_v31, %v4525_v34  ;;  %v1698_v13 = vadd.f32 %v1682_v36, %v1663_v8  ;;  %v1717_v17 = vmul.f32 %v7108_v27, %v4893_v57  ;;  %v7255_v46 = vld [vmem:[#allocation17_spill] sm:$0xff]  ;;  %v7276_v44 = vld [vmem:[#allocation26_spill] sm:$0xff] }
 0x1e8   : > { %7249 = vst [vmem:[#allocation113_spill] sm:$0xff] %v5235_v63  ;;  %7250 = vst [vmem:[#allocation114_spill] sm:$0xff] %v5238_v41  ;;  %2331 = vrot.lane.b32.xlu0 %v4804_v25, %s3383_s15  ;;  %v5254_v15 = vadd.f32 %v1705_v6, %v1686_v11  ;;  %v5257_v58 = vrot.slane %v3185_v31, %v4589_v33  ;;  %v1896_v20 = vmul.f32 %v7116_v22, %v4783_v19  ;;  %v7259_v11 = vld [vmem:[#allocation41_spill] sm:$0xff]  ;;  %v7260_v6 = vld [vmem:[#allocation60_spill] sm:$0xff] }
 0x1e9   : > { %7251 = vst [vmem:[#allocation115_spill] sm:$0xff] %v5245_v16  ;;  %7252 = vst [vmem:[#allocation116_spill] sm:$0xff] %v5248_v50  ;;  %v1863_v49 = vmul.f32 %v3830_v3, %v4768_v48  ;;  %2144 = vrot.lane.b32.xlu1 %v7255_v46, %s3382_s13  ;;  %v5265_v36 = vadd.f32 %v1715_v29, %v1696_v37  ;;  %v5268_v27 = vrot.slane %v3186_v42, %v4554_v54  ;;  %v902_v46 = vpop.permute.xlu0 %901  ;;  %v900_v37 = vpop.permute.xlu1 %899  ;;  %v7268_v50 = vld [vmem:[#allocation87_spill] sm:$0xff]  ;;  %v7274_v41 = vld [vmem:[#allocation84_spill] sm:$0xff] }
 0x1ea   : > { %7253 = vst [vmem:[#allocation117_spill] sm:$0xff] %v5254_v15  ;;  %7254 = vst [vmem:[#allocation118_spill] sm:$0xff] %v5257_v58  ;;  %v5271_v25 = vrot.slane %v3186_v42, %v4492_v10  ;;  %v1844_v31 = vmul.f32 %v3814_v1, %v7125_v26  ;;  %v914_v8 = vsel %vm907_vm5, %v886_v5, %v7259_v11  ;;  %vm1277_vm7 = vcmp.lt.s32.totalorder %v5149_v28, 15  ;;  %v7269_v15 = vld [vmem:[#allocation82_spill] sm:$0xff] }
 0x1eb   : > { %7256 = vst [vmem:[#allocation17_spill] sm:$0xff] %v5265_v36  ;;  %7257 = vst [vmem:[#allocation119_spill] sm:$0xff] %v5268_v27  ;;  %v918_v40 = vsel %vm907_vm5, %v7260_v6, %v886_v5  ;;  %v5281_v29 = vadd.f32 %v1896_v20, %v1877_v18  ;;  %v5285_v12 = vmul.f32 %v7116_v22, %v4831_v24  ;;  %v7263_v5 = vld [vmem:[#allocation29_spill] sm:$0xff]  ;;  %v7266_v20 = vld [vmem:[#allocation42_spill] sm:$0xff]  ;;  %vm1470_vm8 = vcmp.lt.s32.totalorder %v5149_v28, 1 }
 0x1ec   : > { %7258 = vst [vmem:[#allocation120_spill] sm:$0xff] %v5271_v25  ;;  %v5287_v25 = vadd.f32 %v1717_v17, %v1698_v13  ;;  %v1854_v27 = vmul.f32 %v3814_v1, %v7113_v51  ;;  %v1873_v52 = vmul.f32 %v3830_v3, %v4802_v39  ;;  %v5295_v62 = vmul.f32 %v7116_v22, %v4848_v53  ;;  %v7277_v16 = vld [vmem:[#allocation70_spill] sm:$0xff] }
 0x1ed   : > { %7261 = vst [vmem:[#allocation41_spill] sm:$0xff] %v5281_v29  ;;  %881 = vrot.lane.b32.xlu0 %v7263_v5, %s3376_s22  ;;  %v5300_v18 = vadd.f32 %v1863_v49, %v1844_v31  ;;  %v5303_v13 = vrot.slane %v3186_v42, %v4525_v34  ;;  %v5306_v17 = vrot.slane %v3186_v42, %v4589_v33  ;;  %v7267_v29 = vld [vmem:[#allocation86_spill] sm:$0xff]  ;;  %v7270_v49 = vld [vmem:[#allocation81_spill] sm:$0xff]  ;;  %vm1768_vm9 = vcmp.lt.s32.totalorder %v5149_v28, 127 }
 0x1ee   : > { %7262 = vst [vmem:[#allocation60_spill] sm:$0xff] %v5287_v25  ;;  %v5310_v25 = vmul.f32 %v7266_v20, %v7117_v30  ;;  %v954_v58 = vmul.f32 %v7267_v29, %v918_v40  ;;  %v955_v36 = vmul.f32 %v7268_v50, %v914_v8  ;;  %v913_v5 = vsel %vm907_vm5, %v884_v4, %v7269_v15  ;;  %v7272_v30 = vld [vmem:[#allocation48_spill] sm:$0xff]  ;;  %v7273_v34 = vld [vmem:[#allocation61_spill] sm:$0xff] }
 0x1ef   : > { %7264 = vst [vmem:[#allocation29_spill] sm:$0xff] %v5303_v13  ;;  %7265 = vst [vmem:[#allocation121_spill] sm:$0xff] %v5306_v17  ;;  %v917_v31 = vsel %vm907_vm5, %v7270_v49, %v884_v4  ;;  %v7271_v13 = vld [vmem:[#allocation91_spill] sm:$0xff]  ;;  %v910_v42 = vsel %vm907_vm5, %v7259_v11, %v902_v46  ;;  %v922_v40 = vsel %vm907_vm5, %v902_v46, %v7260_v6  ;;  %v1065_v4 = vpop.permute.xlu0 %1064  ;;  %v1063_v17 = vpop.permute.xlu1 %1062  ;;  %vm1961_vm10 = vcmp.lt.s32.totalorder %v5149_v28, 113 }
 0x1f0   : > { %2321 = vrot.lane.b32.xlu1 %v7271_v13, %s3383_s15  ;;  %v909_v8 = vsel %vm907_vm5, %v7269_v15, %v900_v37  ;;  %v921_v33 = vsel %vm907_vm5, %v900_v37, %v7270_v49  ;;  %v1091_v13 = vsel %vm1084_vm6, %v1065_v4, %v7272_v30  ;;  %v1095_v11 = vsel %vm1084_vm6, %v7273_v34, %v1065_v4  ;;  %v7275_v46 = vld [vmem:[#allocation83_spill] sm:$0xff]  ;;  %v7279_v4 = vld [vmem:[#allocation88_spill] sm:$0xff] }
 0x1f1   : > { %v1090_v6 = vsel %vm1084_vm6, %v1063_v17, %v7274_v41  ;;  %v1094_v15 = vsel %vm1084_vm6, %v7275_v46, %v1063_v17  ;;  %v950_v37 = vmul.f32 %v7267_v29, %v917_v31  ;;  %v951_v49 = vmul.f32 %v7268_v50, %v913_v5  ;;  %897 = vrot.lane.b32.xlu0 %v7278_v35, %s3376_s22  ;;  %v7281_v17 = vld [vmem:[#allocation31_spill] sm:$0xff] }
 0x1f2   : > { %v1127_v53 = vmul.f32 %v7276_v44, %v1094_v15  ;;  %v1128_v56 = vmul.f32 %v7277_v16, %v1090_v6  ;;  %v953_v63 = vmul.f32 %v7279_v4, %v922_v40  ;;  %v956_v38 = vmul.f32 %v7280_v55, %v910_v42 }
 0x1f3   : > { %v1131_v9 = vmul.f32 %v7276_v44, %v1095_v11  ;;  %v1132_v45 = vmul.f32 %v7277_v16, %v1091_v13  ;;  %v949_v5 = vmul.f32 %v7279_v4, %v921_v33  ;;  %v952_v31 = vmul.f32 %v7280_v55, %v909_v8  ;;  %v1081_v29 = vpop.permute.xlu0 %1080  ;;  %v1079_v50 = vpop.permute.xlu1 %1078  ;;  %v7283_v8 = vld [vmem:[#allocation94_spill] sm:$0xff]  ;;  %v7287_v4 = vld [vmem:[#allocation52_spill] sm:$0xff] }
 0x1f4   : > { %887 = vrot.lane.b32.xlu1 %v7281_v17, %s3376_s22  ;;  %v1143_v15 = vadd.f32 %v1127_v53, %v950_v37  ;;  %v1144_v6 = vadd.f32 %v1128_v56, %v951_v49  ;;  %v1087_v35 = vsel %vm1084_vm6, %v7272_v30, %v1081_v29  ;;  %v1099_v42 = vsel %vm1084_vm6, %v1081_v29, %v7273_v34  ;;  %v7282_v53 = vld [vmem:[#allocation93_spill] sm:$0xff] }
 0x1f5   : > { %v1086_v40 = vsel %vm1084_vm6, %v7274_v41, %v1079_v50  ;;  %v1098_v33 = vsel %vm1084_vm6, %v1079_v50, %v7275_v46  ;;  %v1130_v56 = vmul.f32 %v7282_v53, %v1099_v42  ;;  %v1133_v13 = vmul.f32 %v7283_v8, %v1087_v35  ;;  %v7284_v37 = vld [vmem:[#allocation77_spill] sm:$0xff]  ;;  %v7285_v50 = vld [vmem:[#allocation43_spill] sm:$0xff] }
 0x1f6   : > { %v1126_v11 = vmul.f32 %v7282_v53, %v1098_v33  ;;  %v1129_v30 = vmul.f32 %v7283_v8, %v1086_v40  ;;  %1060 = vrot.lane.b32.xlu0 %v7284_v37, %s3377_s1  ;;  %v1147_v34 = vadd.f32 %v1131_v9, %v954_v58  ;;  %v1148_v29 = vadd.f32 %v1132_v45, %v955_v36  ;;  %v7286_v53 = vld [vmem:[#allocation56_spill] sm:$0xff]  ;;  %v7288_v9 = vld [vmem:[#allocation89_spill] sm:$0xff] }
 0x1f7   : > { %v1889_v41 = vadd.f32 %v1873_v52, %v1854_v27  ;;  %v2054_v46 = vmul.f32 %v7285_v50, %v4730_v47  ;;  %v1146_v49 = vadd.f32 %v1130_v56, %v953_v63  ;;  %v1149_v17 = vadd.f32 %v1133_v13, %v956_v38  ;;  %v1258_v33 = vpop.permute.xlu0 %1257  ;;  %v1256_v40 = vpop.permute.xlu1 %1255  ;;  %v7289_v52 = vld [vmem:[#allocation85_spill] sm:$0xff]  ;;  %v7290_v63 = vld [vmem:[#allocation78_spill] sm:$0xff]  ;;  %v7291_v36 = vld [vmem:[#allocation32_spill] sm:$0xff] }
 0x1f8   : > { %903 = vrot.lane.b32.xlu1 %v4978_v21, %s3376_s22  ;;  %v1142_v35 = vadd.f32 %v1126_v11, %v949_v5  ;;  %v1145_v42 = vadd.f32 %v1129_v30, %v952_v31  ;;  %v1284_v37 = vsel %vm1277_vm7, %v1258_v33, %v7286_v53  ;;  %v1288_v45 = vsel %vm1277_vm7, %v7287_v4, %v1258_v33  ;;  %v7292_v56 = vld [vmem:[#allocation99_spill] sm:$0xff]  ;;  %v7293_v13 = vld [vmem:[#allocation37_spill] sm:$0xff] }
 0x1f9   : > { %v1283_v21 = vsel %vm1277_vm7, %v1256_v40, %v7288_v9  ;;  %v1287_v38 = vsel %vm1277_vm7, %v7289_v52, %v1256_v40  ;;  %v1324_v58 = vmul.f32 %v7290_v63, %v1288_v45  ;;  %v1325_v27 = vmul.f32 %v7291_v36, %v1284_v37  ;;  %v7294_v30 = vld [vmem:[#allocation45_spill] sm:$0xff] }
 0x1fa   : > { %v1320_v5 = vmul.f32 %v7290_v63, %v1287_v38  ;;  %v1321_v31 = vmul.f32 %v7291_v36, %v1283_v21  ;;  %1076 = vrot.lane.b32.xlu0 %v7292_v56, %s3377_s1  ;;  %v5405_v11 = vadd.f32 %v5285_v12, %v5300_v18  ;;  %v5409_v33 = vmul.f32 %v7294_v30, %v4783_v19  ;;  %v5418_v12 = vld [vmem:[%s6681_s3 + $0x20] ss:$8 sm:$0xf] }
 0x1fb   : > { %v1856_v40 = vmul.f32 %v3814_v1, %v7120_v14  ;;  %v1875_v37 = vmul.f32 %v3830_v3, %v4860_v61  ;;  %v1340_v45 = vadd.f32 %v1324_v58, %v1147_v34  ;;  %v1341_v21 = vadd.f32 %v1325_v27, %v1148_v29  ;;  %v1274_v63 = vpop.permute.xlu0 %1273  ;;  %v7296_v29 = vld [vmem:[#allocation33_spill] sm:$0xff] }
 0x1fc   : > { %1066 = vrot.lane.b32.xlu1 %v7293_v13, %s3377_s1  ;;  %v1336_v38 = vadd.f32 %v1320_v5, %v1143_v15  ;;  %v1337_v56 = vadd.f32 %v1321_v31, %v1144_v6  ;;  %v1272_v13 = vpop.permute.xlu1 %1271  ;;  %v1280_v18 = vsel %vm1277_vm7, %v7286_v53, %v1274_v63  ;;  %v1292_v1 = vsel %vm1277_vm7, %v1274_v63, %v7287_v4  ;;  %v7295_v6 = vld [vmem:[#allocation80_spill] sm:$0xff] }
 0x1fd   : > { %v1279_v3 = vsel %vm1277_vm7, %v7288_v9, %v1272_v13  ;;  %v1291_v15 = vsel %vm1277_vm7, %v1272_v13, %v7289_v52  ;;  %v1323_v34 = vmul.f32 %v7295_v6, %v1292_v1  ;;  %v1326_v58 = vmul.f32 %v7296_v29, %v1280_v18 }
 0x1fe   : > { %v1319_v27 = vmul.f32 %v7295_v6, %v1291_v15  ;;  %v1322_v53 = vmul.f32 %v7296_v29, %v1279_v3  ;;  %1253 = vrot.lane.b32.xlu0 %v5014_v32, %s3378_s24  ;;  %v5442_v4 = vadd.f32 %v5295_v62, %v1889_v41  ;;  %v2070_v9 = vadd.f32 %v2054_v46, %v5310_v25  ;;  %v7299_v41 = vld [vmem:[#allocation57_spill] sm:$0xff] }
 0x1ff   : > { %v5447_v52 = vmul.f32 %v7116_v22, %v4893_v57  ;;  %v5451_v63 = vrot.slane %v5418_v12, %v4554_v54  ;;  %v1339_v5 = vadd.f32 %v1323_v34, %v1146_v49  ;;  %v1342_v32 = vadd.f32 %v1326_v58, %v1149_v17  ;;  %v1451_v18 = vpop.permute.xlu0 %1450  ;;  %v7300_v22 = vld [vmem:[#allocation76_spill] sm:$0xff]  ;;  %v7301_v54 = vld [vmem:[#allocation19_spill] sm:$0xff]  ;;  %v7302_v17 = vld [vmem:[#allocation101_spill] sm:$0xff] }
 0x200   : > { %1082 = vrot.lane.b32.xlu1 %v5024_v60, %s3377_s1  ;;  %v1335_v31 = vadd.f32 %v1319_v27, %v1142_v35  ;;  %v1338_v13 = vadd.f32 %v1322_v53, %v1145_v42  ;;  %v1449_v1 = vpop.permute.xlu1 %1448  ;;  %v7298_v60 = vld [vmem:[#allocation95_spill] sm:$0xff]  ;;  %v1481_v25 = vsel %vm1470_vm8, %v7299_v41, %v1451_v18  ;;  %v7303_v42 = vld [vmem:[#allocation102_spill] sm:$0xff]  ;;  %v7304_v58 = vld [vmem:[#allocation104_spill] sm:$0xff]  ;;  %v5473_v53 = vadd.f32 %v1875_v37, %v1856_v40  ;;  %s2417_s1 = sld [smem:[#allocation7 + %s3436_s28]] }
 0x201   : > { %7297 = vst [vmem:[#allocation42_spill] sm:$0xff] %v5451_v63  ;;  %v1477_v62 = vsel %vm1470_vm8, %v1451_v18, %v7298_v60  ;;  %v1476_v46 = vsel %vm1470_vm8, %v1449_v1, %v7300_v22  ;;  %v1480_v49 = vsel %vm1470_vm8, %v7301_v54, %v1449_v1  ;;  %v1517_v35 = vmul.f32 %v7302_v17, %v1481_v25  ;;  %v7305_v27 = vld [vmem:[#allocation106_spill] sm:$0xff] }
 0x202   : > { %v1518_v3 = vmul.f32 %v7303_v42, %v1477_v62  ;;  %v1513_v15 = vmul.f32 %v7302_v17, %v1480_v49  ;;  %v1514_v34 = vmul.f32 %v7303_v42, %v1476_v46  ;;  %1269 = vrot.lane.b32.xlu0 %v7304_v58, %s3378_s24  ;;  %v5477_v18 = vrot.slane %v5418_v12, %v4492_v10 }
 0x203   : > { %v5481_v1 = vmul.f32 %v7266_v20, %v7125_v26  ;;  %v5485_v62 = vmul.f32 %v7285_v50, %v4768_v48  ;;  %v1533_v25 = vadd.f32 %v1517_v35, %v1340_v45  ;;  %v1467_v17 = vpop.permute.xlu0 %1466  ;;  %vm2154_vm11 = vcmp.lt.s32.totalorder %v5149_v28, 112 }
 0x204   : > { %1259 = vrot.lane.b32.xlu1 %v7305_v27, %s3378_s24  ;;  %7306 = vst [vmem:[#allocation82_spill] sm:$0xff] %v5477_v18  ;;  %v1534_v46 = vadd.f32 %v1518_v3, %v1341_v21  ;;  %v1529_v49 = vadd.f32 %v1513_v15, %v1336_v38  ;;  %v1530_v58 = vadd.f32 %v1514_v34, %v1337_v56  ;;  %v1465_v27 = vpop.permute.xlu1 %1464  ;;  %v7307_v21 = vld [vmem:[#allocation103_spill] sm:$0xff]  ;;  %v7308_v56 = vld [vmem:[#allocation105_spill] sm:$0xff]  ;;  %vm2347_vm12 = vcmp.lt.s32.totalorder %v5149_v28, 111 }
 0x205   : > { %v1473_v40 = vsel %vm1470_vm8, %v7298_v60, %v1467_v17  ;;  %v1485_v10 = vsel %vm1470_vm8, %v1467_v17, %v7299_v41  ;;  %v1472_v37 = vsel %vm1470_vm8, %v7300_v22, %v1465_v27  ;;  %v1484_v45 = vsel %vm1470_vm8, %v1465_v27, %v7301_v54  ;;  %v7309_v15 = vld [vmem:[#allocation15_spill] sm:$0xff]  ;;  %v7310_v41 = vld [vmem:[#allocation16_spill] sm:$0xff] }
 0x206   : > { %v1516_v38 = vmul.f32 %v7307_v21, %v1485_v10  ;;  %v1519_v35 = vmul.f32 %v7308_v56, %v1473_v40  ;;  %v1512_v3 = vmul.f32 %v7307_v21, %v1484_v45  ;;  %v1515_v60 = vmul.f32 %v7308_v56, %v1472_v37  ;;  %1446 = vrot.lane.b32.xlu0 %v7309_v15, %s3379_s9  ;;  %v7314_v56 = vld [vmem:[#allocation96_spill] sm:$0xff] }
 0x207   : > { %v1638_v22 = vadd.f32 %v5128_v0, %v1533_v25  ;;  %v5510_v54 = vadd.f32 %v5409_v33, %v2070_v9  ;;  %v5514_v17 = vmul.f32 %v7294_v30, %v4831_v24  ;;  %v5518_v34 = vmul.f32 %v7266_v20, %v7113_v51  ;;  %v1749_v45 = vpop.permute.xlu0 %1748  ;;  %v7312_v33 = vld [vmem:[#allocation97_spill] sm:$0xff]  ;;  %v7313_v25 = vld [vmem:[#allocation98_spill] sm:$0xff] }
 0x208   : > { %1275 = vrot.lane.b32.xlu1 %v7310_v41, %s3378_s24  ;;  %v1532_v27 = vadd.f32 %v1516_v38, %v1339_v5  ;;  %v1535_v40 = vadd.f32 %v1519_v35, %v1342_v32  ;;  %v1528_v10 = vadd.f32 %v1512_v3, %v1335_v31  ;;  %v1531_v37 = vadd.f32 %v1515_v60, %v1338_v13  ;;  %v1747_v15 = vpop.permute.xlu1 %1746  ;;  %v7311_v41 = vld [vmem:[#allocation35_spill] sm:$0xff]  ;;  %v7315_v31 = vld [vmem:[#allocation28_spill] sm:$0xff] }
 0x209   : > { %v1775_v0 = vsel %vm1768_vm9, %v1749_v45, %v7311_v41  ;;  %v1779_v9 = vsel %vm1768_vm9, %v7312_v33, %v1749_v45  ;;  %v1774_v21 = vsel %vm1768_vm9, %v1747_v15, %v7313_v25  ;;  %v1778_v5 = vsel %vm1768_vm9, %v7314_v56, %v1747_v15  ;;  %v7316_v38 = vld [vmem:[#allocation108_spill] sm:$0xff] }
 0x20a   : > { %v1637_v32 = vadd.f32 %v5106_v59, %v1532_v27  ;;  %v1814_v13 = vmul.f32 %v7315_v31, %v1779_v9  ;;  %v1815_v35 = vmul.f32 %v7316_v38, %v1775_v0  ;;  %v1633_v3 = vadd.f32 %v5130_v7, %v1528_v10  ;;  %1462 = vrot.lane.b32.xlu0 %v5138_v2, %s3379_s9  ;;  %v7317_v0 = vld [vmem:[#allocation68_spill] sm:$0xff]  ;;  %v7318_v7 = vld [vmem:[#allocation39_spill] sm:$0xff] }
 0x20b   : > { %v1634_v60 = vadd.f32 %v5136_v23, %v1529_v49  ;;  %v1810_v45 = vmul.f32 %v7315_v31, %v1778_v5  ;;  %v1811_v6 = vmul.f32 %v7316_v38, %v1774_v21  ;;  %v2066_v59 = vmul.f32 %v7285_v50, %v4802_v39  ;;  %v1765_v42 = vpop.permute.xlu0 %1764  ;;  %v7319_v21 = vld [vmem:[#allocation66_spill] sm:$0xff]  ;;  %v7349_v38 = vld [vmem:[#allocation109_spill] sm:$0xff] }
 0x20c   : > { %1452 = vrot.lane.b32.xlu1 %v5155_v43, %s3379_s9  ;;  %v1830_v27 = vadd.f32 %v1814_v13, %v1637_v32  ;;  %v1831_v15 = vadd.f32 %v1815_v35, %v1638_v22  ;;  %v1639_v9 = vadd.f32 %v7317_v0, %v1534_v46  ;;  %v1640_v10 = vadd.f32 %v7318_v7, %v1535_v40  ;;  %v1763_v2 = vpop.permute.xlu1 %1762  ;;  %v7320_v32 = vld [vmem:[#allocation110_spill] sm:$0xff]  ;;  %v7321_v40 = vld [vmem:[#allocation113_spill] sm:$0xff] }
 0x20d   : > { %v1826_v29 = vadd.f32 %v1810_v45, %v1633_v3  ;;  %v1827_v23 = vadd.f32 %v1811_v6, %v1634_v60  ;;  %v1771_v49 = vsel %vm1768_vm9, %v7311_v41, %v1765_v42  ;;  %v1783_v43 = vsel %vm1768_vm9, %v1765_v42, %v7312_v33  ;;  %v7322_v41 = vld [vmem:[#allocation36_spill] sm:$0xff]  ;;  %v7323_v42 = vld [vmem:[#allocation111_spill] sm:$0xff] }
 0x20e   : > { %v1816_v5 = vmul.f32 %v7319_v21, %v1771_v49  ;;  %v1817_v22 = vmul.f32 %v7320_v32, %v1783_v43  ;;  %v1770_v46 = vsel %vm1768_vm9, %v7313_v25, %v1763_v2  ;;  %v1782_v6 = vsel %vm1768_vm9, %v1763_v2, %v7314_v56  ;;  %1744 = vrot.lane.b32.xlu0 %v7321_v40, %s3380_s10  ;;  %v7324_v60 = vld [vmem:[#allocation115_spill] sm:$0xff] }
 0x20f   : > { %v1635_v13 = vadd.f32 %v7322_v41, %v1530_v58  ;;  %v1636_v33 = vadd.f32 %v7323_v42, %v1531_v37  ;;  %v1812_v35 = vmul.f32 %v7319_v21, %v1770_v46  ;;  %v1813_v3 = vmul.f32 %v7320_v32, %v1782_v6  ;;  %v1942_v0 = vpop.permute.xlu0 %1941  ;;  %v7325_v2 = vld [vmem:[#allocation55_spill] sm:$0xff]  ;;  %v7332_v42 = vld [vmem:[#allocation117_spill] sm:$0xff] }
 0x210   : > { %1468 = vrot.lane.b32.xlu1 %v7324_v60, %s3379_s9  ;;  %v1832_v25 = vadd.f32 %v1816_v5, %v1639_v9  ;;  %v1833_v45 = vadd.f32 %v1817_v22, %v1640_v10  ;;  %v1940_v56 = vpop.permute.xlu1 %1939  ;;  %v2072_v7 = vadd.f32 %v5485_v62, %v5481_v1  ;;  %v2101_v49 = vmul.f32 %v7294_v30, %v7325_v2  ;;  %v7326_v37 = vld [vmem:[#allocation63_spill] sm:$0xff]  ;;  %v7328_v9 = vld [vmem:[#allocation112_spill] sm:$0xff]  ;;  %v7329_v5 = vld [vmem:[#allocation114_spill] sm:$0xff] }
 0x211   : > { %v1828_v58 = vadd.f32 %v1812_v35, %v1635_v13  ;;  %v1829_v43 = vadd.f32 %v1813_v3, %v1636_v33  ;;  %v1968_v46 = vsel %vm1961_vm10, %v1942_v0, %v7326_v37  ;;  %v7327_v6 = vld [vmem:[#allocation23_spill] sm:$0xff]  ;;  %v7331_v62 = vld [vmem:[#allocation100_spill] sm:$0xff]  ;;  %v7333_v3 = vld [vmem:[#allocation17_spill] sm:$0xff]  ;;  %v1926_v60 = vadd.f32 %v5447_v52, %v5473_v53 }
 0x212   : > { %v1972_v40 = vsel %vm1961_vm10, %v7327_v6, %v1942_v0  ;;  %v2008_v22 = vmul.f32 %v7329_v5, %v1968_v46  ;;  %v7330_v41 = vld [vmem:[#allocation107_spill] sm:$0xff]  ;;  %v1971_v13 = vsel %vm1961_vm10, %v7331_v62, %v1940_v56  ;;  %1760 = vrot.lane.b32.xlu0 %v7332_v42, %s3380_s10  ;;  %v7334_v0 = vld [vmem:[#allocation54_spill] sm:$0xff]  ;;  %v5601_v42 = vadd.f32 %v5514_v17, %v2072_v7  ;;  %v7336_v53 = vld [vmem:[#allocation116_spill] sm:$0xff] }
 0x213   : > { %v2007_v10 = vmul.f32 %v7328_v9, %v1972_v40  ;;  %v1967_v1 = vsel %vm1961_vm10, %v1940_v56, %v7330_v41  ;;  %v2003_v33 = vmul.f32 %v7328_v9, %v1971_v13  ;;  %v5598_v46 = vrot.slane %v5418_v12, %v7334_v0  ;;  %v1958_v56 = vpop.permute.xlu0 %1957  ;;  %v7339_v7 = vld [vmem:[#allocation60_spill] sm:$0xff] }
 0x214   : > { %v2004_v35 = vmul.f32 %v7329_v5, %v1967_v1  ;;  %1750 = vrot.lane.b32.xlu1 %v7333_v3, %s3380_s10  ;;  %v2024_v32 = vadd.f32 %v2008_v22, %v1831_v15  ;;  %v1956_v31 = vpop.permute.xlu1 %1955  ;;  %v2082_v13 = vadd.f32 %v2066_v59, %v5518_v34  ;;  %v1964_v3 = vsel %vm1961_vm10, %v7326_v37, %v1958_v56  ;;  %v7337_v15 = vld [vmem:[#allocation118_spill] sm:$0xff]  ;;  %v7338_v34 = vld [vmem:[#allocation41_spill] sm:$0xff]  ;;  %v7340_v37 = vld [vmem:[#allocation47_spill] sm:$0xff] }
 0x215   : > { %7335 = vst [vmem:[#allocation81_spill] sm:$0xff] %v5598_v46  ;;  %v2023_v40 = vadd.f32 %v2007_v10, %v1830_v27  ;;  %v2019_v1 = vadd.f32 %v2003_v33, %v1826_v29  ;;  %v1976_v52 = vsel %vm1961_vm10, %v1958_v56, %v7327_v6  ;;  %v2009_v27 = vmul.f32 %v7336_v53, %v1964_v3  ;;  %v7341_v6 = vld [vmem:[#allocation44_spill] sm:$0xff]  ;;  %v7343_v56 = vld [vmem:[#allocation51_spill] sm:$0xff]  ;;  %v7348_v5 = vld [vmem:[#allocation22_spill] sm:$0xff] }
 0x216   : > { %v2020_v9 = vadd.f32 %v2004_v35, %v1827_v23  ;;  %v2010_v10 = vmul.f32 %v7337_v15, %v1976_v52  ;;  %v1963_v17 = vsel %vm1961_vm10, %v7330_v41, %v1956_v31  ;;  %v1975_v29 = vsel %vm1961_vm10, %v1956_v31, %v7331_v62  ;;  %1937 = vrot.lane.b32.xlu0 %v7338_v34, %s3381_s12  ;;  %v7342_v41 = vld [vmem:[#allocation46_spill] sm:$0xff] }
 0x217   : > { %v2005_v59 = vmul.f32 %v7336_v53, %v1963_v17  ;;  %v2006_v23 = vmul.f32 %v7337_v15, %v1975_v29  ;;  %v2228_v22 = vmul.f32 %v7341_v6, %v7340_v37  ;;  %v2247_v33 = vmul.f32 %v7342_v41, %v4730_v47  ;;  %v2135_v62 = vpop.permute.xlu0 %2134  ;;  %v7344_v34 = vld [vmem:[#allocation14_spill] sm:$0xff]  ;;  %v7345_v15 = vld [vmem:[#allocation13_spill] sm:$0xff] }
 0x218   : > { %1766 = vrot.lane.b32.xlu1 %v7339_v7, %s3380_s10  ;;  %v2025_v35 = vadd.f32 %v2009_v27, %v1832_v25  ;;  %v2026_v31 = vadd.f32 %v2010_v10, %v1833_v45  ;;  %v2133_v0 = vpop.permute.xlu1 %2132  ;;  %v2282_v3 = vmul.f32 %v7343_v56, %v4783_v19  ;;  %v2049_v52 = vmul.f32 %v7266_v20, %v7120_v14  ;;  %v7346_v25 = vld [vmem:[#allocation119_spill] sm:$0xff]  ;;  %v7347_v27 = vld [vmem:[#allocation120_spill] sm:$0xff] }
 0x219   : > { %v2021_v17 = vadd.f32 %v2005_v59, %v1828_v58  ;;  %v2022_v29 = vadd.f32 %v2006_v23, %v1829_v43  ;;  %v2161_v7 = vsel %vm2154_vm11, %v2135_v62, %v7344_v34  ;;  %v2165_v53 = vsel %vm2154_vm11, %v7345_v15, %v2135_v62 }
 0x21a   : > { %v2200_v45 = vmul.f32 %v7346_v25, %v2165_v53  ;;  %v2201_v10 = vmul.f32 %v7347_v27, %v2161_v7  ;;  %v2160_v21 = vsel %vm2154_vm11, %v2133_v0, %v7348_v5  ;;  %v2164_v20 = vsel %vm2154_vm11, %v7349_v38, %v2133_v0  ;;  %1953 = vrot.lane.b32.xlu0 %v5405_v11, %s3381_s12 }
 0x21b   : > { %v2196_v58 = vmul.f32 %v7346_v25, %v2164_v20  ;;  %v2197_v43 = vmul.f32 %v7347_v27, %v2160_v21  ;;  %v2068_v53 = vmul.f32 %v7285_v50, %v4860_v61  ;;  %v2103_v59 = vmul.f32 %v7294_v30, %v4893_v57  ;;  %v2151_v0 = vpop.permute.xlu0 %2150  ;;  %v7352_v21 = vld [vmem:[#allocation29_spill] sm:$0xff] }
 0x21c   : > { %1943 = vrot.lane.b32.xlu1 %v5442_v4, %s3381_s12  ;;  %v5657_v23 = vadd.f32 %v2200_v45, %v2023_v40  ;;  %v5659_v62 = vadd.f32 %v2201_v10, %v2024_v32  ;;  %v2149_v7 = vpop.permute.xlu1 %2148  ;;  %v2117_v11 = vadd.f32 %v2101_v49, %v2082_v13  ;;  %v2263_v36 = vadd.f32 %v2247_v33, %v2228_v22  ;;  %v7353_v40 = vld [vmem:[#allocation121_spill] sm:$0xff] }
 0x21d   : > { %v2212_v20 = vadd.f32 %v2196_v58, %v2019_v1  ;;  %v2213_v25 = vadd.f32 %v2197_v43, %v2020_v9  ;;  %v2157_v4 = vsel %vm2154_vm11, %v7344_v34, %v2151_v0  ;;  %v2169_v50 = vsel %vm2154_vm11, %v2151_v0, %v7345_v15  ;;  %v7357_v43 = vld [vmem:[#allocation20_spill] sm:$0xff]  ;;  %v7358_v0 = vld [vmem:[#allocation79_spill] sm:$0xff] }
 0x21e   : > { %7350 = vst [vmem:[#allocation91_spill] sm:$0xff] %v5657_v23  ;;  %7351 = vst [vmem:[#allocation48_spill] sm:$0xff] %v5659_v62  ;;  %v2202_v30 = vmul.f32 %v7352_v21, %v2157_v4  ;;  %v2203_v45 = vmul.f32 %v7353_v40, %v2169_v50  ;;  %v2156_v32 = vsel %vm2154_vm11, %v7348_v5, %v2149_v7  ;;  %2130 = vrot.lane.b32.xlu0 %v5510_v54, %s3382_s13 }
 0x21f   : > { %v2168_v49 = vsel %vm2154_vm11, %v2149_v7, %v7349_v38  ;;  %v2198_v9 = vmul.f32 %v7352_v21, %v2156_v32  ;;  %v2084_v1 = vadd.f32 %v2068_v53, %v2049_v52  ;;  %v2249_v15 = vmul.f32 %v7342_v41, %v4768_v48  ;;  %v5686_v33 = vpop.permute.xlu0 %873 }
 0x220   : > { %v2199_v13 = vmul.f32 %v7353_v40, %v2168_v49  ;;  %1959 = vrot.lane.b32.xlu1 %v1926_v60, %s3381_s12  ;;  %v5682_v22 = vadd.f32 %v2202_v30, %v2025_v35  ;;  %v5684_v5 = vadd.f32 %v2203_v45, %v2026_v31  ;;  %v2326_v38 = vpop.permute.xlu1 %2325  ;;  %v2230_v54 = vmul.f32 %v7341_v6, %v7125_v26  ;;  %v7356_v60 = vld [vmem:[#allocation69_spill] sm:$0xff] }
 0x221   : > { %v2259_v34 = vmul.f32 %v7342_v41, %v4802_v39  ;;  %v2214_v10 = vadd.f32 %v2198_v9, %v2021_v17  ;;  %v2353_v52 = vsel %vm2347_vm12, %v2326_v38, %v7356_v60  ;;  %v2357_v35 = vsel %vm2347_vm12, %v7357_v43, %v2326_v38 }
 0x222   : > { %7354 = vst [vmem:[#allocation61_spill] sm:$0xff] %v5682_v22  ;;  %7355 = vst [vmem:[#allocation84_spill] sm:$0xff] %v5684_v5  ;;  %v2215_v58 = vadd.f32 %v2199_v13, %v2022_v29  ;;  %v2389_v31 = vmul.f32 %v5451_v63, %v2357_v35  ;;  %v2390_v53 = vmul.f32 %v5477_v18, %v2353_v52  ;;  %2146 = vrot.lane.b32.xlu0 %v5601_v42, %s3382_s13  ;;  %v7363_v35 = vld [vmem:[#allocation58_spill] sm:$0xff]  ;;  %v7391_v63 = vld [vmem:[#allocation71_spill] sm:$0xff] }
 0x223   : > { %v5704_v7 = vrot.slane %v5418_v12, %v7358_v0  ;;  %v2240_v17 = vmul.f32 %v7341_v6, %v7113_v51  ;;  %v2298_v29 = vadd.f32 %v2282_v3, %v2263_v36  ;;  %v2265_v4 = vadd.f32 %v2249_v15, %v2230_v54  ;;  %v5713_v32 = vpop.permute.xlu0 %889  ;;  %v7361_v15 = vld [vmem:[#allocation62_spill] sm:$0xff] }
 0x224   : > { %2136 = vrot.lane.b32.xlu1 %v2117_v11, %s3382_s13  ;;  %v2284_v50 = vmul.f32 %v7343_v56, %v4831_v24  ;;  %v5711_v30 = vadd.f32 %v2389_v31, %v2212_v20  ;;  %v2406_v45 = vadd.f32 %v2390_v53, %v2213_v25  ;;  %v2342_v42 = vpop.permute.xlu1 %2341  ;;  %v2294_v12 = vmul.f32 %v7343_v56, %v7325_v2  ;;  %v7360_v20 = vld [vmem:[#allocation49_spill] sm:$0xff]  ;;  %v7364_v53 = vld [vmem:[#allocation64_spill] sm:$0xff] }
 0x225   : > { %7359 = vst [vmem:[#allocation83_spill] sm:$0xff] %v5704_v7  ;;  %v2275_v49 = vadd.f32 %v2259_v34, %v2240_v17  ;;  %v2349_v11 = vsel %vm2347_vm12, %v7356_v60, %v2342_v42  ;;  %v2361_v36 = vsel %vm2347_vm12, %v2342_v42, %v7357_v43  ;;  %v2119_v3 = vadd.f32 %v2103_v59, %v2084_v1  ;;  %v7362_v34 = vld [vmem:[#allocation24_spill] sm:$0xff]  ;;  %v7365_v42 = vld [vmem:[#allocation53_spill] sm:$0xff] }
 0x226   : > { %v2260_v25 = vmul.f32 %v7342_v41, %v7360_v20  ;;  %v2391_v9 = vmul.f32 %v5598_v46, %v2349_v11  ;;  %v2392_v13 = vmul.f32 %v5704_v7, %v2361_v36  ;;  %2323 = vrot.lane.b32.xlu0 %v2298_v29, %s3383_s15  ;;  %v2255_v38 = vmul.f32 %v7342_v41, %v7361_v15  ;;  %v7366_v11 = vld [vmem:[#allocation27_spill] sm:$0xff] }
 0x227   : > { %v2300_v54 = vadd.f32 %v2284_v50, %v2265_v4  ;;  %v2241_v60 = vmul.f32 %v7341_v6, %v7362_v34  ;;  %v5734_v1 = vpop.permute.xlu0 %1052  ;;  %v2310_v43 = vadd.f32 %v2294_v12, %v2275_v49  ;;  %v2236_v31 = vmul.f32 %v7341_v6, %v7363_v35  ;;  %v7369_v35 = vld [vmem:[#allocation65_spill] sm:$0xff] }
 0x228   : > { %2152 = vrot.lane.b32.xlu1 %v2119_v3, %s3382_s13  ;;  %v2407_v59 = vadd.f32 %v2391_v9, %v2214_v10  ;;  %v5736_v52 = vpop.permute.xlu1 %879  ;;  %v2290_v0 = vmul.f32 %v7343_v56, %v7364_v53  ;;  %v2408_v17 = vadd.f32 %v2392_v13, %v2215_v58  ;;  %v2295_v4 = vmul.f32 %v7343_v56, %v7365_v42  ;;  %v7368_v13 = vld [vmem:[#allocation30_spill] sm:$0xff] }
 0x229   : > { %v2276_v29 = vadd.f32 %v2260_v25, %v2241_v60  ;;  %v2261_v50 = vmul.f32 %v7342_v41, %v4860_v61  ;;  %v2271_v10 = vadd.f32 %v2255_v38, %v2236_v31  ;;  %v2256_v49 = vmul.f32 %v7342_v41, %v7366_v11  ;;  %v7367_v25 = vld [vmem:[#allocation18_spill] sm:$0xff] }
 0x22a   : > { %2339 = vrot.lane.b32.xlu0 %v2300_v54, %s3383_s15  ;;  %v2242_v12 = vmul.f32 %v7341_v6, %v7120_v14  ;;  %v2237_v9 = vmul.f32 %v7341_v6, %v7367_v25  ;;  %v2291_v15 = vmul.f32 %v7343_v56, %v7368_v13  ;;  %v2296_v60 = vmul.f32 %v7343_v56, %v4893_v57 }
 0x22b   : > { %v5752_v36 = vpop.permute.xlu0 %1068  ;;  %v2306_v3 = vadd.f32 %v2290_v0, %v2271_v10  ;;  %v2311_v38 = vadd.f32 %v2295_v4, %v2276_v29  ;;  %v2257_v31 = vmul.f32 %v7342_v41, %v7369_v35  ;;  %v5766_v53 = vstv %s2417_s1  ;;  %v7372_v29 = vld [vmem:[#allocation59_spill] sm:$0xff] }
 0x22c   : > { %2329 = vrot.lane.b32.xlu1 %v2310_v43, %s3383_s15  ;;  %v5754_v58 = vpop.permute.xlu1 %895  ;;  %v2277_v54 = vadd.f32 %v2261_v50, %v2242_v12  ;;  %v2272_v43 = vadd.f32 %v2256_v49, %v2237_v9  ;;  %7370 = vst [vmem:[#allocation26_spill] sm:$0xff] %v5766_v53  ;;  %v2238_v4 = vmul.f32 %v7341_v6, %v7372_v29  ;;  %v7373_v50 = vld [vmem:[#allocation67_spill] sm:$0xff]  ;;  %v2902_v6 = vld [vmem:[%s6685_s7 + $0x8] sm:$0xff] }
 0x22d   : > { %v2292_v12 = vmul.f32 %v7343_v56, %v7373_v50  ;;  %v5778_v41 = vadd.f32 %v5766_v53, %v2406_v45  ;;  %v2901_v45 = vld [vmem:[%s6685_s7] sm:$0xff]  ;;  %v5819_v50 = vadd.f32 %v5766_v53, %v2407_v59 }
 0x22e   : > { %2327 = vrot.lane.b32.xlu0 %v2306_v3, %s3383_s15  ;;  %v2307_v11 = vadd.f32 %v2291_v15, %v2272_v43  ;;  %v2312_v3 = vadd.f32 %v2296_v60, %v2277_v54  ;;  %v2273_v49 = vadd.f32 %v2257_v31, %v2238_v4  ;;  %v5801_v54 = vadd.f32 %v5766_v53, %v5711_v30 }
 0x22f   : > { %v5768_v0 = vpop.permute.xlu0 %1245  ;;  %7374 = vst [vmem:[#allocation92_spill] sm:$0xff] %v5778_v41  ;;  %v5790_v56 = vmul.f32 0.70710677, %v5778_v41  ;;  %v5822_v30 = vadd.f32 %v5766_v53, %v2408_v17 }
 0x230   : > { %2337 = vrot.lane.b32.xlu1 %v2311_v38, %s3383_s15  ;;  %7371 = vst [vmem:[#allocation70_spill] sm:$0xff] %v5768_v0  ;;  %v5770_v10 = vpop.permute.xlu1 %1058  ;;  %v2308_v13 = vadd.f32 %v2292_v12, %v2273_v49  ;;  %v5811_v31 = vmul.f32 0.70710677, %v5801_v54 }
 0x231   : > { %7375 = vst [vmem:[#allocation90_spill] sm:$0xff] %v5790_v56  ;;  %v5804_v60 = vand.u32 2147483647, %v5790_v56  ;;  %7380 = vst [vmem:[#allocation56_spill] sm:$0xff] %v5822_v30 }
 0x232   : > { %2335 = vrot.lane.b32.xlu0 %v2307_v11, %s3383_s15  ;;  %v2503_v12 = vand.u32 2147483647, %v5811_v31  ;;  %vm2471_vm13 = vcmp.lt.f32.partialorder %v5811_v31, 0.0 }
 0x233   : > { %v5781_v25 = vpop.permute.xlu0 %1261  ;;  %v2520_v11 = vmul.f32 0.3275911, %v5804_v60 }
 0x234   : > { %2345 = vrot.lane.b32.xlu1 %v2312_v3, %s3383_s15  ;;  %v5783_v9 = vpop.permute.xlu1 %1074  ;;  %v2519_v5 = vmul.f32 0.3275911, %v2503_v12 }
 0x235   : > { %v2536_v3 = vadd.f32 1.0, %v2520_v11 }
 0x236   : > { %2343 = vrot.lane.b32.xlu0 %v2308_v13, %s3383_s15  ;;  %v2535_v62 = vadd.f32 1.0, %v2519_v5  ;;  %v7392_v5 = vld [vmem:[#allocation34_spill] sm:$0xff] }
 0x237   : > { %v5795_v15 = vpop.permute.xlu0 %1438  ;;  %3262 = vrcp.f32 %v2536_v3  ;;  %v1562_v21 = vmul.f32 %v7392_v5, %v7391_v63  ;;  %v7397_v63 = vld [vmem:[#allocation73_spill] sm:$0xff] }
 0x238   : > { %2910 = vperm.xlu1 %3261, %v2902_v6   ;;  %7376 = vst [vmem:[#allocation31_spill] sm:$0xff] %v5795_v15  ;;  %v5797_v38 = vpop.permute.xlu1 %1251  ;;  %v5830_v6 = vmul.f32 0.70710677, %v5819_v50  ;;  %3264 = vrcp.f32 %v2535_v62 }
 0x23a   : > { %2905 = vperm.xlu0 %3260, %v2901_v45   ;;  %7383 = vst [vmem:[#allocation85_spill] sm:$0xff] %v5830_v6  ;;  %v5833_v45 = vmul.f32 0.70710677, %v5822_v30  ;;  %v5840_v17 = vand.u32 2147483647, %v5830_v6 }
 0x23b   : > { %v5806_v43 = vpop.permute.xlu0 %1454 }
 0x23c   : > { %7377 = vst [vmem:[#allocation94_spill] sm:$0xff] %v5806_v43  ;;  %v5808_v35 = vpop.permute.xlu1 %1267  ;;  %7384 = vst [vmem:[#allocation99_spill] sm:$0xff] %v5833_v45  ;;  %v5843_v11 = vand.u32 2147483647, %v5833_v45  ;;  %v2521_v30 = vmul.f32 0.3275911, %v5840_v17  ;;  %v1563_v45 = vmul.f32 %v7392_v5, %v4730_v47 }
 0x23e   : > { %v2522_v7 = vmul.f32 0.3275911, %v5843_v11  ;;  %v5855_v6 = vadd.f32 1.0, %v2521_v30 }
 0x23f   : > { %v5814_v29 = vpop.permute.xlu0 %1736 }
 0x240   : > { %7378 = vst [vmem:[#allocation77_spill] sm:$0xff] %v5814_v29  ;;  %v5816_v4 = vpop.permute.xlu1 %1444  ;;  %v5857_v18 = vadd.f32 1.0, %v2522_v7  ;;  %3266 = vrcp.f32 %v5855_v6 }
 0x241   : > { %7379 = vst [vmem:[#allocation43_spill] sm:$0xff] %v5816_v4  ;;  %v3263_v40 = vpop.eup %3262 }
 0x242   : > { %v2568_v27 = vmul.f32 %v3263_v40, %v2536_v3  ;;  %3268 = vrcp.f32 %v5857_v18  ;;  %v1565_v3 = vmul.f32 %v7392_v5, %v4768_v48  ;;  %v3265_v15 = vpop.eup %3264  ;;  %v2760_v48 = vsub.f32 0.0, %v5804_v60 }
 0x243   : > { %v5825_v49 = vpop.permute.xlu0 %1752  ;;  %v2567_v0 = vmul.f32 %v3265_v15, %v2535_v62 }
 0x244   : > { %7381 = vst [vmem:[#allocation52_spill] sm:$0xff] %v5825_v49  ;;  %v5827_v13 = vpop.permute.xlu1 %1460  ;;  %v7401_v49 = vld [vmem:[#allocation38_spill] sm:$0xff] }
 0x245   : > { %7382 = vst [vmem:[#allocation89_spill] sm:$0xff] %v5827_v13  ;;  %v7402_v13 = vld [vmem:[#allocation12_spill] sm:$0xff] }
 0x247   : > { %v5835_v59 = vpop.permute.xlu0 %1929 }
 0x248   : > { %7385 = vst [vmem:[#allocation37_spill] sm:$0xff] %v5835_v59  ;;  %v5837_v22 = vpop.permute.xlu1 %1742 }
 0x249   : > { %7386 = vst [vmem:[#allocation45_spill] sm:$0xff] %v5837_v22 }
 0x24b   : > { %v5845_v23 = vpop.permute.xlu0 %1945 }
 0x24c   : > { %7387 = vst [vmem:[#allocation95_spill] sm:$0xff] %v5845_v23  ;;  %v5847_v41 = vpop.permute.xlu1 %1758  ;;  %v7395_v23 = vld [vmem:[#allocation11_spill] sm:$0xff] }
 0x24d   : > { %7388 = vst [vmem:[#allocation57_spill] sm:$0xff] %v5847_v41 }
 0x24f   : > { %v5851_v46 = vpop.permute.xlu0 %2122 }
 0x250   : > { %7389 = vst [vmem:[#allocation76_spill] sm:$0xff] %v5851_v46  ;;  %v5853_v53 = vpop.permute.xlu1 %1935  ;;  %v7396_v46 = vld [vmem:[#allocation40_spill] sm:$0xff] }
 0x251   : > { %7390 = vst [vmem:[#allocation19_spill] sm:$0xff] %v5853_v53  ;;  %v1543_v22 = vmul.f32 %v7396_v46, %v7395_v23  ;;  %v1544_v7 = vmul.f32 %v7396_v46, %v7340_v37  ;;  %v1564_v53 = vmul.f32 %v7392_v5, %v7397_v63  ;;  %v7400_v23 = vld [vmem:[#allocation72_spill] sm:$0xff]  ;;  %v1545_v37 = vmul.f32 %v7396_v46, %v7402_v13  ;;  %v7404_v13 = vld [vmem:[#allocation74_spill] sm:$0xff] }
 0x252   : > { %v1597_v4 = vmul.f32 %v7401_v49, %v7400_v23  ;;  %v7403_v23 = vld [vmem:[#allocation75_spill] sm:$0xff]  ;;  %v1574_v43 = vmul.f32 %v7392_v5, %v7404_v13 }
 0x253   : > { %v5863_v59 = vpop.permute.xlu0 %2138  ;;  %v1578_v30 = vadd.f32 %v1562_v21, %v1543_v22  ;;  %v1579_v47 = vadd.f32 %v1563_v45, %v1544_v7  ;;  %v2759_v21 = vsub.f32 0.0, %v2503_v12  ;;  %v1598_v22 = vmul.f32 %v7401_v49, %v4783_v19 }
 0x254   : > { %7393 = vst [vmem:[#allocation104_spill] sm:$0xff] %v5863_v59  ;;  %v5865_v29 = vpop.permute.xlu1 %1951  ;;  %v2584_v59 = vsub.f32 2.0, %v2568_v27  ;;  %v1546_v45 = vmul.f32 %v7396_v46, %v7125_v26  ;;  %v1580_v7 = vadd.f32 %v1564_v53, %v1545_v37  ;;  %v2761_v19 = vsub.f32 0.0, %v5840_v17  ;;  %v7406_v37 = vld [vmem:[#allocation21_spill] sm:$0xff] }
 0x255   : > { %7394 = vst [vmem:[#allocation106_spill] sm:$0xff] %v5865_v29  ;;  %v5890_v27 = vadd.f32 %v1597_v4, %v1578_v30  ;;  %v5892_v63 = vadd.f32 %v1598_v22, %v1579_v47  ;;  %v1575_v4 = vmul.f32 %v7392_v5, %v4802_v39  ;;  %v2775_v53 = vmul.f32 %v2759_v21, %v2503_v12  ;;  %v3267_v12 = vpop.eup %3266 }
 0x256   : > { %v5898_v56 = vmul.f32 %v3263_v40, %v2584_v59  ;;  %v2762_v30 = vsub.f32 0.0, %v5843_v11  ;;  %v1555_v62 = vmul.f32 %v7396_v46, %v7406_v37  ;;  %v2776_v40 = vmul.f32 %v2760_v48, %v5804_v60  ;;  %v3269_v13 = vpop.eup %3268 }
 0x257   : > { %v5877_v29 = vpop.permute.xlu0 %2315  ;;  %v1556_v39 = vmul.f32 %v7396_v46, %v7113_v51  ;;  %v5919_v21 = vmul.f32 0.5, %v5801_v54  ;;  %v2583_v37 = vsub.f32 2.0, %v2567_v0  ;;  %v2795_v54 = vmul.f32 1.442695, %v2775_v53 }
 0x258   : > { %7398 = vst [vmem:[#allocation15_spill] sm:$0xff] %v5877_v29  ;;  %v5879_v41 = vpop.permute.xlu1 %2128  ;;  %v1581_v29 = vadd.f32 %v1565_v3, %v1546_v45  ;;  %v1600_v3 = vmul.f32 %v7401_v49, %v4831_v24  ;;  %v1590_v45 = vadd.f32 %v1574_v43, %v1555_v62  ;;  %v7407_v24 = vld [vmem:[#allocation50_spill] sm:$0xff]  ;;  %v2616_v48 = vmul.f32 1.0614054, %v5898_v56 }
 0x259   : > { %7399 = vst [vmem:[#allocation16_spill] sm:$0xff] %v5879_v41  ;;  %v1599_v41 = vmul.f32 %v7401_v49, %v7403_v23  ;;  %v1609_v23 = vmul.f32 %v7401_v49, %v7407_v24  ;;  %v2778_v43 = vmul.f32 %v2762_v30, %v5843_v11  ;;  %v1576_v0 = vmul.f32 %v7392_v5, %v7360_v20 }
 0x25a   : > { %v5921_v22 = vadd.f32 %v1600_v3, %v1581_v29  ;;  %v2797_v3 = vmul.f32 1.442695, %v2776_v40  ;;  %v2569_v31 = vmul.f32 %v3267_v12, %v5855_v6  ;;  %v2570_v62 = vmul.f32 %v3269_v13, %v5857_v18 }
 0x25b   : > { %v5901_v26 = vpop.permute.xlu0 %2331  ;;  %v5914_v59 = vadd.f32 %v1599_v41, %v1580_v7  ;;  %v1591_v41 = vadd.f32 %v1575_v4, %v1556_v39  ;;  %v6965_v7 = vmov 1.0   ;;  %v2632_v4 = vadd.f32 -1.4531521, %v2616_v48 }
 0x25c   : > { %7405 = vst [vmem:[#allocation35_spill] sm:$0xff] %v5901_v26  ;;  %v5906_v47 = vpop.permute.xlu1 %2144  ;;  %v2777_v26 = vmul.f32 %v2761_v19, %v5840_v17  ;;  %v5930_v51 = vsel %vm2471_vm13, -1.0, %v6965_v7  ;;  %v1610_v17 = vmul.f32 %v7401_v49, %v7325_v2  ;;  %v1577_v19 = vmul.f32 %v7392_v5, %v4860_v61 }
 0x25d   : > { %v5943_v53 = vadd.f32 %v1609_v23, %v1590_v45  ;;  %v1557_v11 = vmul.f32 %v7396_v46, %v7362_v34  ;;  %v5947_v30 = vmul.f32 %v3265_v15, %v2583_v37  ;;  %v1558_v2 = vmul.f32 %v7396_v46, %v7120_v14 }
 0x25e   : > { %v2799_v20 = vmul.f32 1.442695, %v2777_v26  ;;  %v2648_v39 = vmul.f32 %v2632_v4, %v5898_v56  ;;  %3270 = vpow2.f32 %v2795_v54  ;;  %v2801_v61 = vmul.f32 1.442695, %v2778_v43 }
 0x25f   : > { %v882_v60 = vpop.permute.xlu0 %881  ;;  %v1592_v6 = vadd.f32 %v1576_v0, %v1557_v11  ;;  %v1611_v18 = vmul.f32 %v7401_v49, %v7365_v42  ;;  %3272 = vpow2.f32 %v2797_v3  ;;  %v1593_v15 = vadd.f32 %v1577_v19, %v1558_v2 }
 0x260   : > { %v1612_v26 = vmul.f32 %v7401_v49, %v4893_v57  ;;  %v2585_v45 = vsub.f32 2.0, %v2569_v31  ;;  %v2586_v14 = vsub.f32 2.0, %v2570_v62  ;;  %v912_v46 = vsel %vm907_vm5, %v882_v60, %v5713_v32  ;;  %v7409_v62 = vld [vmem:[#allocation86_spill] sm:$0xff] }
 0x261   : > { %v2664_v24 = vadd.f32 1.4214138, %v2648_v39  ;;  %v5963_v23 = vmul.f32 0.5, %v5819_v50  ;;  %3274 = vpow2.f32 %v2799_v20  ;;  %v5965_v37 = vadd.f32 %v1610_v17, %v1591_v41  ;;  %v7408_v50 = vld [vmem:[#allocation87_spill] sm:$0xff] }
 0x262   : > { %v5933_v29 = vpop.permute.xlu1 %2321  ;;  %v2615_v48 = vmul.f32 1.0614054, %v5947_v30  ;;  %3276 = vpow2.f32 %v2801_v61  ;;  %v916_v57 = vsel %vm907_vm5, %v5686_v33, %v882_v60  ;;  %v5974_v43 = vadd.f32 %v1611_v18, %v1592_v6 }
 0x263   : > { %v898_v40 = vpop.permute.xlu0 %897  ;;  %v947_v0 = vmul.f32 %v7408_v50, %v912_v46  ;;  %v5984_v60 = vmul.f32 %v3267_v12, %v2585_v45  ;;  %v5986_v19 = vmul.f32 %v3269_v13, %v2586_v14  ;;  %v5988_v4 = vadd.f32 %v1612_v26, %v1593_v15 }
 0x264   : > { %v908_v41 = vsel %vm907_vm5, %v5713_v32, %v898_v40  ;;  %v2680_v31 = vmul.f32 %v2664_v24, %v5898_v56  ;;  %v946_v11 = vmul.f32 %v7409_v62, %v916_v57  ;;  %v920_v32 = vsel %vm907_vm5, %v898_v40, %v5686_v33 }
 0x265   : > { %v2631_v39 = vadd.f32 -1.4531521, %v2615_v48  ;;  %v948_v61 = vmul.f32 %v7280_v55, %v908_v41 }
 0x266   : > { %v888_v5 = vpop.permute.xlu1 %887  ;;  %v2696_v14 = vadd.f32 -0.28449672, %v2680_v31 }
 0x267   : > { %v915_v34 = vsel %vm907_vm5, %v888_v5, %v5754_v58  ;;  %v919_v3 = vsel %vm907_vm5, %v5736_v52, %v888_v5  ;;  %v2647_v57 = vmul.f32 %v2631_v39, %v5947_v30 }
 0x268   : > { %v1061_v42 = vpop.permute.xlu0 %1060  ;;  %v958_v12 = vmul.f32 %v7409_v62, %v919_v3  ;;  %v959_v13 = vmul.f32 %v7408_v50, %v915_v34  ;;  %v6011_v34 = vpop.eup %3270 }
 0x269   : > { %v1089_v49 = vsel %vm1084_vm6, %v1061_v42, %v5752_v36  ;;  %v1093_v18 = vsel %vm1084_vm6, %v5734_v1, %v1061_v42  ;;  %v6018_v46 = vpop.eup %3272 }
 0x26a   : > { %v904_v54 = vpop.permute.xlu1 %903  ;;  %v1124_v17 = vmul.f32 %v7277_v16, %v1089_v49  ;;  %v2618_v49 = vmul.f32 1.0614054, %v5986_v19  ;;  %v1123_v50 = vmul.f32 %v7276_v44, %v1093_v18 }
 0x26b   : > { %v911_v24 = vsel %vm907_vm5, %v5754_v58, %v904_v54  ;;  %v6029_v3 = vpop.eup %3274  ;;  %v7411_v58 = vld [vmem:[#allocation32_spill] sm:$0xff] }
 0x26c   : > { %v1140_v20 = vadd.f32 %v1124_v17, %v947_v0  ;;  %v1077_v2 = vpop.permute.xlu0 %1076  ;;  %v7410_v17 = vld [vmem:[#allocation88_spill] sm:$0xff]  ;;  %v6039_v39 = vpop.eup %3276 }
 0x26d   : > { %v1085_v5 = vsel %vm1084_vm6, %v5752_v36, %v1077_v2  ;;  %v923_v36 = vsel %vm907_vm5, %v904_v54, %v5736_v52  ;;  %v945_v18 = vmul.f32 %v7410_v17, %v920_v32 }
 0x26e   : > { %v1067_v6 = vpop.permute.xlu1 %1066  ;;  %v1125_v33 = vmul.f32 %v7283_v8, %v1085_v5  ;;  %v957_v31 = vmul.f32 %v7410_v17, %v923_v36  ;;  %v1139_v36 = vadd.f32 %v1123_v50, %v946_v11 }
 0x26f   : > { %v1092_v40 = vsel %vm1084_vm6, %v1067_v6, %v5783_v9  ;;  %v1096_v15 = vsel %vm1084_vm6, %v5770_v10, %v1067_v6  ;;  %v2712_v6 = vmul.f32 %v2696_v14, %v5898_v56 }
 0x270   : > { %v1135_v26 = vmul.f32 %v7276_v44, %v1096_v15  ;;  %v1136_v45 = vmul.f32 %v7277_v16, %v1092_v40  ;;  %v1141_v42 = vadd.f32 %v1125_v33, %v948_v61  ;;  %v1254_v48 = vpop.permute.xlu0 %1253  ;;  %v960_v61 = vmul.f32 %v7280_v55, %v911_v24  ;;  %v7413_v24 = vld [vmem:[#allocation33_spill] sm:$0xff] }
 0x271   : > { %v1282_v16 = vsel %vm1277_vm7, %v1254_v48, %v5781_v25  ;;  %v2663_v15 = vadd.f32 1.4214138, %v2647_v57  ;;  %v7415_v57 = vld [vmem:[#allocation70_spill] sm:$0xff] }
 0x272   : > { %v1151_v52 = vadd.f32 %v1135_v26, %v958_v12  ;;  %v1152_v0 = vadd.f32 %v1136_v45, %v959_v13  ;;  %v1083_v41 = vpop.permute.xlu1 %1082  ;;  %v1317_v54 = vmul.f32 %v7411_v58, %v1282_v16  ;;  %v7412_v12 = vld [vmem:[#allocation93_spill] sm:$0xff] }
 0x273   : > { %v1088_v62 = vsel %vm1084_vm6, %v5783_v9, %v1083_v41  ;;  %v1100_v44 = vsel %vm1084_vm6, %v1083_v41, %v5770_v10  ;;  %v2634_v9 = vadd.f32 -1.4531521, %v2618_v49  ;;  %v7416_v49 = vld [vmem:[#allocation78_spill] sm:$0xff]  ;;  %v2679_v17 = vmul.f32 %v2663_v15, %v5947_v30 }
 0x274   : > { %v1134_v13 = vmul.f32 %v7412_v12, %v1100_v44  ;;  %v1137_v5 = vmul.f32 %v7283_v8, %v1088_v62  ;;  %v1333_v33 = vadd.f32 %v1317_v54, %v1140_v20  ;;  %v1270_v40 = vpop.permute.xlu0 %1269  ;;  %v1097_v8 = vsel %vm1084_vm6, %v1077_v2, %v5734_v1  ;;  %v7414_v20 = vld [vmem:[#allocation90_spill] sm:$0xff] }
 0x275   : > { %v1278_v10 = vsel %vm1277_vm7, %v5781_v25, %v1270_v40  ;;  %vm2472_vm14 = vcmp.lt.f32.partialorder %v7414_v20, 0.0  ;;  %v1286_v25 = vsel %vm1277_vm7, %v7415_v57, %v1254_v48  ;;  %v2728_v2 = vadd.f32 0.2548296, %v2712_v6  ;;  %v7418_v6 = vld [vmem:[#allocation102_spill] sm:$0xff] }
 0x276   : > { %v1150_v26 = vadd.f32 %v1134_v13, %v957_v31  ;;  %v1153_v45 = vadd.f32 %v1137_v5, %v960_v61  ;;  %v1260_v55 = vpop.permute.xlu1 %1259  ;;  %v1318_v14 = vmul.f32 %v7413_v24, %v1278_v10  ;;  %v2650_v31 = vmul.f32 %v2634_v9, %v5986_v19  ;;  %v7417_v13 = vld [vmem:[#allocation94_spill] sm:$0xff] }
 0x277   : > { %v1285_v32 = vsel %vm1277_vm7, %v1260_v55, %v5808_v35  ;;  %v1289_v11 = vsel %vm1277_vm7, %v5797_v38, %v1260_v55  ;;  %v2617_v54 = vmul.f32 1.0614054, %v5984_v60  ;;  %v1122_v62 = vmul.f32 %v7412_v12, %v1097_v8 }
 0x278   : > { %v1328_v50 = vmul.f32 %v7416_v49, %v1289_v11  ;;  %v1329_v1 = vmul.f32 %v7411_v58, %v1285_v32  ;;  %v1334_v16 = vadd.f32 %v1318_v14, %v1141_v42  ;;  %v1447_v41 = vpop.permute.xlu0 %1446  ;;  %v1316_v58 = vmul.f32 %v7416_v49, %v1286_v25 }
 0x279   : > { %v1475_v48 = vsel %vm1470_vm8, %v1447_v41, %v7417_v13  ;;  %v2744_v55 = vmul.f32 %v2728_v2, %v5898_v56  ;;  %v2695_v32 = vadd.f32 -0.28449672, %v2679_v17  ;;  %v2666_v11 = vadd.f32 1.4214138, %v2650_v31  ;;  %v7423_v17 = vld [vmem:[#allocation43_spill] sm:$0xff] }
 0x27a   : > { %v1344_v44 = vadd.f32 %v1328_v50, %v1151_v52  ;;  %v1345_v61 = vadd.f32 %v1329_v1, %v1152_v0  ;;  %v1276_v5 = vpop.permute.xlu1 %1275  ;;  %v1510_v42 = vmul.f32 %v7418_v6, %v1475_v48  ;;  %v1290_v52 = vsel %vm1277_vm7, %v1270_v40, %v7415_v57  ;;  %v7419_v0 = vld [vmem:[#allocation80_spill] sm:$0xff]  ;;  %v7421_v1 = vld [vmem:[#allocation105_spill] sm:$0xff] }
 0x27b   : > { %v1281_v15 = vsel %vm1277_vm7, %v5808_v35, %v1276_v5  ;;  %v1293_v9 = vsel %vm1277_vm7, %v1276_v5, %v5797_v38  ;;  %v2633_v25 = vadd.f32 -1.4531521, %v2617_v54  ;;  %v7420_v35 = vld [vmem:[#allocation31_spill] sm:$0xff] }
 0x27c   : > { %v1327_v12 = vmul.f32 %v7419_v0, %v1293_v9  ;;  %v1330_v10 = vmul.f32 %v7413_v24, %v1281_v15  ;;  %v1526_v8 = vadd.f32 %v1510_v42, %v1333_v33  ;;  %v1463_v14 = vpop.permute.xlu0 %1462  ;;  %v1479_v49 = vsel %vm1470_vm8, %v7420_v35, %v1447_v41  ;;  %v7422_v33 = vld [vmem:[#allocation89_spill] sm:$0xff] }
 0x27d   : > { %v1471_v40 = vsel %vm1470_vm8, %v7417_v13, %v1463_v14  ;;  %v1315_v24 = vmul.f32 %v7419_v0, %v1290_v52  ;;  %v1138_v41 = vadd.f32 %v1122_v62, %v945_v18  ;;  %v6103_v13 = vmul.f32 %v6018_v46, %v2744_v55 }
 0x27e   : > { %v1343_v38 = vadd.f32 %v1327_v12, %v1150_v26  ;;  %v1346_v50 = vadd.f32 %v1330_v10, %v1153_v45  ;;  %v1453_v57 = vpop.permute.xlu1 %1452  ;;  %v1511_v56 = vmul.f32 %v7421_v1, %v1471_v40  ;;  %v7424_v26 = vld [vmem:[#allocation101_spill] sm:$0xff]  ;;  %v2711_v15 = vmul.f32 %v2695_v32, %v5947_v30 }
 0x27f   : > { %v1478_v2 = vsel %vm1470_vm8, %v1453_v57, %v7422_v33  ;;  %v1482_v31 = vsel %vm1470_vm8, %v7423_v17, %v1453_v57  ;;  %v1509_v48 = vmul.f32 %v7424_v26, %v1479_v49  ;;  %v2682_v9 = vmul.f32 %v2666_v11, %v5986_v19 }
 0x280   : > { %v1521_v45 = vmul.f32 %v7424_v26, %v1482_v31  ;;  %v1522_v54 = vmul.f32 %v7418_v6, %v1478_v2  ;;  %v6106_v5 = vadd.f32 %v1511_v56, %v1334_v16  ;;  %v1745_v42 = vpop.permute.xlu0 %1744  ;;  %v1332_v52 = vadd.f32 %v1316_v58, %v1139_v36  ;;  %v7425_v36 = vld [vmem:[#allocation52_spill] sm:$0xff] }
 0x281   : > { %v6113_v62 = vsel %vm2472_vm14, -1.0, %v6965_v7  ;;  %v1331_v46 = vadd.f32 %v1315_v24, %v1138_v41  ;;  %v1483_v16 = vsel %vm1470_vm8, %v1463_v14, %v7420_v35  ;;  %v2649_v10 = vmul.f32 %v2633_v25, %v5984_v60  ;;  %v7426_v14 = vld [vmem:[#allocation103_spill] sm:$0xff]  ;;  %v7429_v41 = vld [vmem:[#allocation57_spill] sm:$0xff] }
 0x282   : > { %v1537_v0 = vadd.f32 %v1521_v45, %v1344_v44  ;;  %v1538_v12 = vadd.f32 %v1522_v54, %v1345_v61  ;;  %v1469_v18 = vpop.permute.xlu1 %1468  ;;  %v1773_v44 = vsel %vm1768_vm9, %v1745_v42, %v7425_v36  ;;  %v2840_v58 = vsub.f32 1.0, %v6103_v13  ;;  %v7430_v54 = vld [vmem:[#allocation45_spill] sm:$0xff] }
 0x283   : > { %v1474_v6 = vsel %vm1470_vm8, %v7422_v33, %v1469_v18  ;;  %v1486_v20 = vsel %vm1470_vm8, %v1469_v18, %v7423_v17  ;;  %v1525_v55 = vadd.f32 %v1509_v48, %v1332_v52  ;;  %v2727_v35 = vadd.f32 0.2548296, %v2711_v15  ;;  %v7427_v33 = vld [vmem:[#allocation108_spill] sm:$0xff]  ;;  %v7428_v17 = vld [vmem:[#allocation66_spill] sm:$0xff] }
 0x284   : > { %v1523_v61 = vmul.f32 %v7421_v1, %v1474_v6  ;;  %v1520_v32 = vmul.f32 %v7426_v14, %v1486_v20  ;;  %v1761_v11 = vpop.permute.xlu0 %1760  ;;  %v2698_v49 = vadd.f32 -0.28449672, %v2682_v9  ;;  %v1508_v25 = vmul.f32 %v7426_v14, %v1483_v16  ;;  %v7431_v9 = vld [vmem:[#allocation28_spill] sm:$0xff] }
 0x285   : > { %v1631_v57 = vadd.f32 %v5914_v59, %v1526_v8  ;;  %v1769_v24 = vsel %vm1768_vm9, %v7425_v36, %v1761_v11  ;;  %v1807_v1 = vmul.f32 %v7427_v33, %v1773_v44  ;;  %v1642_v45 = vadd.f32 %v5965_v37, %v1537_v0  ;;  %v7432_v36 = vld [vmem:[#allocation95_spill] sm:$0xff] }
 0x286   : > { %v1539_v40 = vadd.f32 %v1523_v61, %v1346_v50  ;;  %v1751_v56 = vpop.permute.xlu1 %1750  ;;  %v1536_v2 = vadd.f32 %v1520_v32, %v1343_v38  ;;  %v1808_v31 = vmul.f32 %v7428_v17, %v1769_v24  ;;  %v6146_v50 = vadd.f32 1.4214138, %v2649_v10  ;;  %v7433_v61 = vld [vmem:[#allocation114_spill] sm:$0xff] }
 0x287   : > { %v1776_v26 = vsel %vm1768_vm9, %v1751_v56, %v7429_v41  ;;  %v1780_v59 = vsel %vm1768_vm9, %v7430_v54, %v1751_v56  ;;  %v1630_v48 = vadd.f32 %v5892_v63, %v1525_v55  ;;  %v1524_v16 = vadd.f32 %v1508_v25, %v1331_v46  ;;  %v7435_v24 = vld [vmem:[#allocation110_spill] sm:$0xff] }
 0x288   : > { %v1819_v8 = vmul.f32 %v7427_v33, %v1776_v26  ;;  %v1824_v15 = vadd.f32 %v1808_v31, %v1631_v57  ;;  %v1641_v38 = vadd.f32 %v5943_v53, %v1536_v2  ;;  %v1818_v52 = vmul.f32 %v7431_v9, %v1780_v59  ;;  %v1938_v18 = vpop.permute.xlu0 %1937  ;;  %v7434_v53 = vld [vmem:[#allocation77_spill] sm:$0xff]  ;;  %v7437_v26 = vld [vmem:[#allocation106_spill] sm:$0xff] }
 0x289   : > { %v1966_v37 = vsel %vm1961_vm10, %v1938_v18, %v7432_v36  ;;  %v2743_v44 = vmul.f32 %v2727_v35, %v5947_v30  ;;  %v1823_v20 = vadd.f32 %v1807_v1, %v1630_v48  ;;  %v1777_v46 = vsel %vm1768_vm9, %v7434_v53, %v1745_v42 }
 0x28a   : > { %v1835_v6 = vadd.f32 %v1819_v8, %v1642_v45  ;;  %v1767_v0 = vpop.permute.xlu1 %1766  ;;  %v1834_v10 = vadd.f32 %v1818_v52, %v1641_v38  ;;  %v2000_v14 = vmul.f32 %v7433_v61, %v1966_v37  ;;  %v1643_v55 = vadd.f32 %v5974_v43, %v1538_v12  ;;  %v7440_v38 = vld [vmem:[#allocation112_spill] sm:$0xff] }
 0x28b   : > { %v1772_v63 = vsel %vm1768_vm9, %v7429_v41, %v1767_v0  ;;  %v1784_v32 = vsel %vm1768_vm9, %v1767_v0, %v7430_v54  ;;  %v1781_v35 = vsel %vm1768_vm9, %v1761_v11, %v7434_v53  ;;  %v1644_v57 = vadd.f32 %v5988_v4, %v1539_v40  ;;  %v7436_v11 = vld [vmem:[#allocation116_spill] sm:$0xff]  ;;  %v7439_v54 = vld [vmem:[#allocation19_spill] sm:$0xff] }
 0x28c   : > { %v1820_v30 = vmul.f32 %v7428_v17, %v1772_v63  ;;  %v2016_v25 = vadd.f32 %v2000_v14, %v1823_v20  ;;  %v1821_v56 = vmul.f32 %v7435_v24, %v1784_v32  ;;  %v1954_v33 = vpop.permute.xlu0 %1953  ;;  %v1629_v42 = vadd.f32 %v5890_v27, %v1524_v16  ;;  %v7438_v27 = vld [vmem:[#allocation37_spill] sm:$0xff]  ;;  %v7441_v37 = vld [vmem:[#allocation104_spill] sm:$0xff]  ;;  %v7444_v32 = vld [vmem:[#allocation119_spill] sm:$0xff] }
 0x28d   : > { %v1962_v43 = vsel %vm1961_vm10, %v7432_v36, %v1954_v33  ;;  %v2714_v2 = vmul.f32 %v2698_v49, %v5986_v19  ;;  %v1806_v17 = vmul.f32 %v7431_v9, %v1777_v46  ;;  %v1809_v40 = vmul.f32 %v7435_v24, %v1781_v35  ;;  %v7442_v0 = vld [vmem:[#allocation76_spill] sm:$0xff]  ;;  %v7445_v35 = vld [vmem:[#allocation118_spill] sm:$0xff] }
 0x28e   : > { %v1836_v1 = vadd.f32 %v1820_v30, %v1643_v55  ;;  %v1944_v12 = vpop.permute.xlu1 %1943  ;;  %v1837_v31 = vadd.f32 %v1821_v56, %v1644_v57  ;;  %v2001_v41 = vmul.f32 %v7436_v11, %v1962_v43  ;;  %v1970_v45 = vsel %vm1961_vm10, %v7438_v27, %v1938_v18 }
 0x28f   : > { %v1969_v4 = vsel %vm1961_vm10, %v1944_v12, %v7437_v26  ;;  %v1973_v59 = vsel %vm1961_vm10, %v7439_v54, %v1944_v12  ;;  %v1632_v8 = vadd.f32 %v5921_v22, %v6106_v5  ;;  %v6194_v16 = vmul.f32 %v6011_v34, %v2743_v44 }
 0x290   : > { %v2012_v49 = vmul.f32 %v7433_v61, %v1969_v4  ;;  %v2017_v48 = vadd.f32 %v2001_v41, %v1824_v15  ;;  %v2011_v9 = vmul.f32 %v7440_v38, %v1973_v59  ;;  %v2131_v52 = vpop.permute.xlu0 %2130  ;;  %v2730_v14 = vadd.f32 0.2548296, %v2714_v2  ;;  %v7443_v15 = vld [vmem:[#allocation120_spill] sm:$0xff]  ;;  %v7446_v2 = vld [vmem:[#allocation99_spill] sm:$0xff]  ;;  %v7447_v41 = vld [vmem:[#allocation29_spill] sm:$0xff] }
 0x291   : > { %v2159_v18 = vsel %vm2154_vm11, %v2131_v52, %v7441_v37  ;;  %v2163_v20 = vsel %vm2154_vm11, %v7442_v0, %v2131_v52  ;;  %v1999_v22 = vmul.f32 %v7440_v38, %v1970_v45  ;;  %v1825_v44 = vadd.f32 %v1809_v40, %v1632_v8  ;;  %v7448_v4 = vld [vmem:[#allocation16_spill] sm:$0xff]  ;;  %v7449_v38 = vld [vmem:[#allocation35_spill] sm:$0xff] }
 0x292   : > { %v2028_v36 = vadd.f32 %v2012_v49, %v1835_v6  ;;  %v1960_v61 = vpop.permute.xlu1 %1959  ;;  %v2027_v5 = vadd.f32 %v2011_v9, %v1834_v10  ;;  %v2193_v63 = vmul.f32 %v7443_v15, %v2159_v18  ;;  %v1822_v6 = vadd.f32 %v1806_v17, %v1629_v42  ;;  %v7450_v52 = vld [vmem:[#allocation15_spill] sm:$0xff] }
 0x293   : > { %v1965_v34 = vsel %vm1961_vm10, %v7437_v26, %v1960_v61  ;;  %v1977_v53 = vsel %vm1961_vm10, %v1960_v61, %v7439_v54  ;;  %v1974_v55 = vsel %vm1961_vm10, %v1954_v33, %v7438_v27  ;;  %v2192_v10 = vmul.f32 %v7444_v32, %v2163_v20  ;;  %v7451_v20 = vld [vmem:[#allocation42_spill] sm:$0xff] }
 0x294   : > { %v2013_v46 = vmul.f32 %v7436_v11, %v1965_v34  ;;  %v2209_v30 = vadd.f32 %v2193_v63, %v2016_v25  ;;  %v2014_v57 = vmul.f32 %v7445_v35, %v1977_v53  ;;  %v2147_v24 = vpop.permute.xlu0 %2146  ;;  %v2839_v12 = vsub.f32 1.0, %v6194_v16 }
 0x295   : > { %v2155_v42 = vsel %vm2154_vm11, %v7441_v37, %v2147_v24  ;;  %vm2474_vm15 = vcmp.lt.f32.partialorder %v7446_v2, 0.0  ;;  %v2746_v17 = vmul.f32 %v2730_v14, %v5986_v19  ;;  %v2015_v11 = vadd.f32 %v1999_v22, %v1822_v6  ;;  %v7453_v14 = vld [vmem:[#allocation121_spill] sm:$0xff] }
 0x296   : > { %v2029_v56 = vadd.f32 %v2013_v46, %v1836_v1  ;;  %v2137_v43 = vpop.permute.xlu1 %2136  ;;  %v2030_v33 = vadd.f32 %v2014_v57, %v1837_v31  ;;  %v2194_v26 = vmul.f32 %v7447_v41, %v2155_v42  ;;  %v2002_v1 = vmul.f32 %v7445_v35, %v1974_v55  ;;  %v7454_v55 = vld [vmem:[#allocation85_spill] sm:$0xff]  ;;  %v7455_v57 = vld [vmem:[#allocation26_spill] sm:$0xff] }
 0x297   : > { %v2162_v25 = vsel %vm2154_vm11, %v2137_v43, %v5906_v47  ;;  %v2166_v40 = vsel %vm2154_vm11, %v7448_v4, %v2137_v43  ;;  %v2681_v45 = vmul.f32 %v6146_v50, %v5984_v60  ;;  %v2208_v19 = vadd.f32 %v2192_v10, %v2015_v11  ;;  %v7457_v11 = vld [vmem:[#allocation83_spill] sm:$0xff] }
 0x298   : > { %v2205_v27 = vmul.f32 %v7443_v15, %v2162_v25  ;;  %v2167_v31 = vsel %vm2154_vm11, %v2147_v24, %v7442_v0  ;;  %v2210_v54 = vadd.f32 %v2194_v26, %v2017_v48  ;;  %v2204_v59 = vmul.f32 %v7444_v32, %v2166_v40  ;;  %v2324_v49 = vpop.permute.xlu0 %2323  ;;  %v7452_v48 = vld [vmem:[#allocation82_spill] sm:$0xff] }
 0x299   : > { %v2352_v9 = vsel %vm2347_vm12, %v2324_v49, %v7449_v38  ;;  %v2356_v16 = vsel %vm2347_vm12, %v7450_v52, %v2324_v49  ;;  %v2826_v37 = vmul.f32 %v6039_v39, %v2746_v17  ;;  %v2195_v22 = vmul.f32 %v7453_v14, %v2167_v31 }
 0x29a   : > { %v6237_v8 = vadd.f32 %v2205_v27, %v2028_v36  ;;  %v2153_v50 = vpop.permute.xlu1 %2152  ;;  %v2220_v18 = vadd.f32 %v2204_v59, %v2027_v5  ;;  %v2385_v0 = vmul.f32 %v7451_v20, %v2356_v16  ;;  %v2386_v61 = vmul.f32 %v7452_v48, %v2352_v9  ;;  %v7458_v16 = vld [vmem:[#allocation25_spill] sm:$0xff] }
 0x29b   : > { %v2158_v36 = vsel %vm2154_vm11, %v5906_v47, %v2153_v50  ;;  %v2170_v15 = vsel %vm2154_vm11, %v2153_v50, %v7448_v4  ;;  %v2697_v34 = vadd.f32 -0.28449672, %v2681_v45  ;;  %v2018_v6 = vadd.f32 %v2002_v1, %v1825_v44 }
 0x29c   : > { %v2206_v63 = vmul.f32 %v7447_v41, %v2158_v36  ;;  %v2401_v39 = vadd.f32 %v2385_v0, %v2208_v19  ;;  %v2402_v5 = vadd.f32 %v2386_v61, %v2209_v30  ;;  %v2207_v53 = vmul.f32 %v7453_v14, %v2170_v15  ;;  %v2340_v46 = vpop.permute.xlu0 %2339 }
 0x29d   : > { %vm2473_vm0 = vcmp.lt.f32.partialorder %v7454_v55, 0.0  ;;  %v2348_v47 = vsel %vm2347_vm12, %v7449_v38, %v2340_v46  ;;  %v2360_v10 = vsel %vm2347_vm12, %v2340_v46, %v7450_v52  ;;  %v2842_v44 = vsub.f32 1.0, %v2826_v37  ;;  %v7462_v55 = vld [vmem:[#allocation91_spill] sm:$0xff] }
 0x29e   : > { %v6258_v32 = vadd.f32 %v2206_v63, %v2029_v56  ;;  %v6266_v35 = vpop.permute.xlu1 %2329  ;;  %v2419_v30 = vadd.f32 %v7455_v57, %v2401_v39  ;;  %v6270_v24 = vadd.f32 %v7455_v57, %v2402_v5  ;;  %v6272_v42 = vadd.f32 %v2207_v53, %v2030_v33  ;;  %v7456_v56 = vld [vmem:[#allocation81_spill] sm:$0xff] }
 0x29f   : > { %v2387_v43 = vmul.f32 %v7456_v56, %v2348_v47  ;;  %v2211_v17 = vadd.f32 %v2195_v22, %v2018_v6  ;;  %v2388_v41 = vmul.f32 %v7457_v11, %v2360_v10  ;;  %v2359_v26 = vsel %vm2347_vm12, %v5933_v29, %v6266_v35 }
 0x2a0   : > { %v2713_v25 = vmul.f32 %v2697_v34, %v5984_v60  ;;  %v2451_v1 = vmul.f32 0.70710677, %v2419_v30  ;;  %v6282_v4 = vmul.f32 0.70710677, %v6270_v24  ;;  %v6284_v27 = vpop.permute.xlu0 %2327  ;;  %v2490_v33 = vsel %vm2474_vm15, -1.0, %v6965_v7 }
 0x2a1   : > { %v2403_v40 = vadd.f32 %v2387_v43, %v2210_v54  ;;  %v2404_v45 = vadd.f32 %v2388_v41, %v2211_v17  ;;  %v2397_v19 = vmul.f32 %v7451_v20, %v2359_v26  ;;  %v2856_v31 = vmul.f32 %v2840_v58, %v6113_v62  ;;  %v7461_v43 = vld [vmem:[#allocation56_spill] sm:$0xff] }
 0x2a2   : > { %v2855_v59 = vmul.f32 %v2839_v12, %v5930_v51  ;;  %v2499_v49 = vand.u32 2147483647, %v2451_v1  ;;  %v2500_v38 = vand.u32 2147483647, %v6282_v4  ;;  %v2858_v9 = vmul.f32 %v2842_v44, %v2490_v33  ;;  %v7459_v51 = vld [vmem:[#allocation92_spill] sm:$0xff] }
 0x2a3   : > { %v2421_v54 = vadd.f32 %v7455_v57, %v2403_v40  ;;  %v6297_v52 = vadd.f32 %v7455_v57, %v2404_v45  ;;  %v2413_v2 = vadd.f32 %v2397_v19, %v2220_v18  ;;  %v2358_v50 = vsel %vm2347_vm12, %v7458_v16, %v6284_v27 }
 0x2a4   : > { %v2729_v37 = vadd.f32 0.2548296, %v2713_v25  ;;  %v2515_v13 = vmul.f32 0.3275911, %v2499_v49  ;;  %v2516_v62 = vmul.f32 0.3275911, %v2500_v38  ;;  %v2393_v15 = vmul.f32 %v7451_v20, %v2358_v50  ;;  %v2338_v25 = vpop.permute.xlu1 %2337 }
 0x2a5   : > { %v2755_v58 = vsub.f32 0.0, %v2499_v49  ;;  %v2440_v12 = vmul.f32 0.5, %v7459_v51  ;;  %v6304_v0 = vmul.f32 0.70710677, %v2421_v54  ;;  %v6307_v61 = vmul.f32 0.70710677, %v6297_v52 }
 0x2a6   : > { %v2872_v36 = vadd.f32 1.0, %v2856_v31  ;;  %v2871_v14 = vadd.f32 1.0, %v2855_v59  ;;  %v6309_v22 = vadd.f32 1.0, %v2515_v13  ;;  %v6312_v18 = vadd.f32 %v7455_v57, %v2413_v2 }
 0x2a7   : > { %v2874_v63 = vadd.f32 1.0, %v2858_v9  ;;  %v2756_v34 = vsub.f32 0.0, %v2500_v38  ;;  %v2501_v6 = vand.u32 2147483647, %v6304_v0  ;;  %v2502_v39 = vand.u32 2147483647, %v6307_v61 }
 0x2a8   : > { %7460 = vst [vmem:[#allocation97_spill] sm:$0xff] %v6312_v18  ;;  %v2745_v5 = vmul.f32 %v2729_v37, %v5984_v60  ;;  %v6321_v53 = vsel %vm2473_vm0, -1.0, %v6965_v7  ;;  %v6323_v46 = vadd.f32 1.0, %v2516_v62  ;;  %3278 = vrcp.f32 %v6309_v22 }
 0x2a9   : > { %v2771_v47 = vmul.f32 %v2755_v58, %v2499_v49  ;;  %v2517_v10 = vmul.f32 0.3275911, %v2501_v6  ;;  %v6326_v20 = vmul.f32 %v2872_v36, %v2440_v12  ;;  %v6329_v44 = vmul.f32 %v2871_v14, %v5919_v21  ;;  %v2346_v36 = vpop.permute.xlu1 %2345 }
 0x2aa   : > { %v2442_v17 = vmul.f32 0.5, %v7461_v43  ;;  %vm2467_vm1 = vcmp.lt.f32.partialorder %v2451_v1, 0.0  ;;  %v2518_v60 = vmul.f32 0.3275911, %v2502_v39  ;;  %v6333_v41 = vmul.f32 0.70710677, %v6312_v18 }
 0x2ab   : > { %v2409_v26 = vadd.f32 %v2393_v15, %v7462_v55  ;;  %v6336_v40 = vmul.f32 0.5, %v2419_v30  ;;  %v2772_v33 = vmul.f32 %v2756_v34, %v2500_v38  ;;  %v6341_v19 = vmul.f32 %v6029_v3, %v2745_v5  ;;  %v6356_v38 = vpop.permute.xlu0 %2335  ;;  %v7464_v43 = vld [vmem:[#allocation48_spill] sm:$0xff] }
 0x2ac   : > { %v6338_v45 = vmul.f32 %v2874_v63, %v2442_v17  ;;  %3280 = vrcp.f32 %v6323_v46  ;;  %v2787_v21 = vmul.f32 1.442695, %v2771_v47  ;;  %v2511_v1 = vand.u32 2147483647, %v6333_v41 }
 0x2ad   : > { %v6346_v31 = vadd.f32 %v7455_v57, %v2409_v26  ;;  %v6349_v59 = vsel %vm2467_vm1, -1.0, %v6965_v7  ;;  %v6351_v49 = vadd.f32 1.0, %v2517_v10  ;;  %v2355_v30 = vsel %vm2347_vm12, %v6266_v35, %v2338_v25 }
 0x2ae   : > { %v6359_v3 = vmul.f32 0.5, %v6270_v24  ;;  %v6361_v9 = vadd.f32 1.0, %v2518_v60  ;;  %v2757_v2 = vsub.f32 0.0, %v2501_v6  ;;  %v2758_v50 = vsub.f32 0.0, %v2502_v39 }
 0x2af   : > { %7463 = vst [vmem:[#allocation98_spill] sm:$0xff] %v6346_v31  ;;  %v2527_v37 = vmul.f32 0.3275911, %v2511_v1  ;;  %v2789_v13 = vmul.f32 1.442695, %v2772_v33  ;;  %v6363_v62 = vmul.f32 0.5, %v2421_v54  ;;  %v2398_v51 = vmul.f32 %v7452_v48, %v2355_v30 }
 0x2b0   : > { %v6366_v58 = vmul.f32 0.70710677, %v6346_v31  ;;  %3282 = vpow2.f32 %v2787_v21  ;;  %v2767_v12 = vsub.f32 0.0, %v2511_v1  ;;  %v2354_v24 = vsel %vm2347_vm12, %v6284_v27, %v6356_v38 }
 0x2b1   : > { %v6369_v35 = vadd.f32 1.0, %v2527_v37  ;;  %3284 = vrcp.f32 %v6351_v49  ;;  %v2414_v14 = vadd.f32 %v2398_v51, %v6237_v8  ;;  %v2394_v15 = vmul.f32 %v7452_v48, %v2354_v24 }
 0x2b2   : > { %v2507_v54 = vand.u32 2147483647, %v6366_v58  ;;  %v3279_v63 = vpop.eup %3278  ;;  %vm2469_vm2 = vcmp.lt.f32.partialorder %v6304_v0, 0.0  ;;  %3286 = vrcp.f32 %v6361_v9  ;;  %v2773_v34 = vmul.f32 %v2757_v2, %v2501_v6 }
 0x2b3   : > { %v2774_v5 = vmul.f32 %v2758_v50, %v2502_v39  ;;  %3288 = vrcp.f32 %v6369_v35  ;;  %v6383_v27 = vadd.f32 %v7455_v57, %v2414_v14  ;;  %v2351_v10 = vsel %vm2347_vm12, %v2338_v25, %v2346_v36 }
 0x2b4   : > { %v2523_v47 = vmul.f32 0.3275911, %v2507_v54  ;;  %3290 = vpow2.f32 %v2789_v13  ;;  %v2783_v8 = vmul.f32 %v2767_v12, %v2511_v1  ;;  %v2410_v48 = vadd.f32 %v2394_v15, %v7464_v43 }
 0x2b5   : > { %v2363_v17 = vsel %vm2347_vm12, %v2346_v36, %v5933_v29  ;;  %v2563_v6 = vmul.f32 %v3279_v63, %v6309_v22  ;;  %v2763_v60 = vsub.f32 0.0, %v2507_v54  ;;  %v6393_v55 = vmul.f32 0.70710677, %v6383_v27 }
 0x2b6   : > { %v2539_v39 = vadd.f32 1.0, %v2523_v47  ;;  %v3281_v26 = vpop.eup %3280  ;;  %v2791_v33 = vmul.f32 1.442695, %v2773_v34  ;;  %v6396_v21 = vadd.f32 %v7455_v57, %v2410_v48  ;;  %v2399_v25 = vmul.f32 %v7456_v56, %v2351_v10 }
 0x2b7   : > { %v2400_v1 = vmul.f32 %v7457_v11, %v2363_v17  ;;  %v6403_v29 = vsel %vm2469_vm2, -1.0, %v6965_v7  ;;  %v2793_v22 = vmul.f32 1.442695, %v2774_v5  ;;  %v2512_v30 = vand.u32 2147483647, %v6393_v55 }
 0x2b8   : > { %3292 = vrcp.f32 %v2539_v39  ;;  %vm2479_vm3 = vcmp.lt.f32.partialorder %v6333_v41, 0.0  ;;  %v2811_v2 = vmul.f32 1.442695, %v2783_v8  ;;  %v6408_v50 = vmul.f32 0.70710677, %v6396_v21 }
 0x2b9   : > { %v2415_v37 = vadd.f32 %v2399_v25, %v6258_v32  ;;  %v2564_v13 = vmul.f32 %v3281_v26, %v6323_v46  ;;  %v2579_v51 = vsub.f32 2.0, %v2563_v6  ;;  %v2779_v12 = vmul.f32 %v2763_v60, %v2507_v54  ;;  %v2344_v54 = vpop.permute.xlu0 %2343 }
 0x2ba   : > { %v2528_v24 = vmul.f32 0.3275911, %v2512_v30  ;;  %v6412_v0 = vpop.eup %3282  ;;  %3294 = vpow2.f32 %v2791_v33  ;;  %v2508_v36 = vand.u32 2147483647, %v6408_v50  ;;  %v2416_v14 = vadd.f32 %v2400_v1, %v6272_v42 }
 0x2bb   : > { %v6417_v41 = vadd.f32 %v7455_v57, %v2415_v37  ;;  %v3285_v15 = vpop.eup %3284  ;;  %3296 = vpow2.f32 %v2793_v22  ;;  %v6420_v34 = vsel %vm2479_vm3, -1.0, %v6965_v7  ;;  %v2768_v46 = vsub.f32 0.0, %v2512_v30 }
 0x2bc   : > { %v6422_v32 = vadd.f32 1.0, %v2528_v24  ;;  %v3287_v5 = vpop.eup %3286  ;;  %3298 = vpow2.f32 %v2811_v2  ;;  %vm2475_vm4 = vcmp.lt.f32.partialorder %v6366_v58, 0.0  ;;  %v2524_v47 = vmul.f32 0.3275911, %v2508_v36 }
 0x2bd   : > { %7465 = vst [vmem:[#allocation96_spill] sm:$0xff] %v6417_v41  ;;  %v6426_v10 = vadd.f32 %v7455_v57, %v2416_v14  ;;  %v3289_v42 = vpop.eup %3288  ;;  %v2580_v8 = vsub.f32 2.0, %v2564_v13  ;;  %v6428_v43 = vmul.f32 %v3279_v63, %v2579_v51  ;;  %v2803_v48 = vmul.f32 1.442695, %v2779_v12 }
 0x2be   : > { %v2764_v17 = vsub.f32 0.0, %v2508_v36  ;;  %v6430_v6 = vpop.eup %3290  ;;  %v2565_v60 = vmul.f32 %v3285_v15, %v6351_v49  ;;  %v6433_v33 = vadd.f32 1.0, %v2524_v47  ;;  %v6436_v25 = vmul.f32 0.70710677, %v6417_v41  ;;  %v7469_v41 = vld [vmem:[#allocation61_spill] sm:$0xff] }
 0x2bf   : > { %7466 = vst [vmem:[#allocation68_spill] sm:$0xff] %v6426_v10  ;;  %v2350_v1 = vsel %vm2347_vm12, %v6356_v38, %v2344_v54  ;;  %v2566_v22 = vmul.f32 %v3287_v5, %v6361_v9  ;;  %3300 = vrcp.f32 %v6422_v32  ;;  %v2784_v63 = vmul.f32 %v2768_v46, %v2512_v30 }
 0x2c0   : > { %7467 = vst [vmem:[#allocation39_spill] sm:$0xff] %v6436_v25  ;;  %v6444_v2 = vmul.f32 0.70710677, %v6426_v10  ;;  %v2575_v37 = vmul.f32 %v3289_v42, %v6369_v35  ;;  %3302 = vrcp.f32 %v6433_v33  ;;  %v2513_v49 = vand.u32 2147483647, %v6436_v25 }
 0x2c1   : > { %v2362_v13 = vsel %vm2347_vm12, %v2344_v54, %v7458_v16  ;;  %v6452_v38 = vmul.f32 %v3281_v26, %v2580_v8  ;;  %v2780_v9 = vmul.f32 %v2764_v17, %v2508_v36  ;;  %v2395_v30 = vmul.f32 %v7456_v56, %v2350_v1 }
 0x2c2   : > { %7468 = vst [vmem:[#allocation113_spill] sm:$0xff] %v6444_v2  ;;  %v3293_v51 = vpop.eup %3292  ;;  %v2514_v12 = vand.u32 2147483647, %v6444_v2  ;;  %v2581_v24 = vsub.f32 2.0, %v2565_v60  ;;  %3304 = vpow2.f32 %v2803_v48  ;;  %v2529_v35 = vmul.f32 0.3275911, %v2513_v49 }
 0x2c3   : > { %v2571_v14 = vmul.f32 %v3293_v51, %v2539_v39  ;;  %v2396_v7 = vmul.f32 %v7457_v11, %v2362_v13  ;;  %v2411_v10 = vadd.f32 %v2395_v30, %v7469_v41  ;;  %v2582_v16 = vsub.f32 2.0, %v2566_v22  ;;  %v7470_v60 = vld [vmem:[#allocation84_spill] sm:$0xff] }
 0x2c4   : > { %v2530_v46 = vmul.f32 0.3275911, %v2514_v12  ;;  %v2770_v47 = vsub.f32 0.0, %v2514_v12  ;;  %v6458_v28 = vpop.eup %3294  ;;  %v2591_v26 = vsub.f32 2.0, %v2575_v37  ;;  %v2813_v54 = vmul.f32 1.442695, %v2784_v63 }
 0x2c5   : > { %v2545_v36 = vadd.f32 1.0, %v2529_v35  ;;  %v6460_v8 = vpop.eup %3296  ;;  %v2805_v17 = vmul.f32 1.442695, %v2780_v9  ;;  %v2412_v39 = vadd.f32 %v2396_v7, %v7470_v60  ;;  %v6464_v48 = vadd.f32 %v7455_v57, %v2411_v10 }
 0x2c6   : > { %v2546_v56 = vadd.f32 1.0, %v2530_v46  ;;  %v6466_v1 = vpop.eup %3298  ;;  %v7472_v11 = vmov 1.0   ;;  %v2769_v22 = vsub.f32 0.0, %v2513_v49  ;;  %v2786_v63 = vmul.f32 %v2770_v47, %v2514_v12 }
 0x2c7   : > { %7471 = vst [vmem:[#allocation36_spill] sm:$0xff] %v6464_v48  ;;  %v6471_v41 = vsel %vm2475_vm4, -1.0, %v7472_v11  ;;  %3306 = vrcp.f32 %v2545_v36  ;;  %v6473_v37 = vmul.f32 %v3285_v15, %v2581_v24  ;;  %v2587_v13 = vsub.f32 2.0, %v2571_v14 }
 0x2c8   : > { %3308 = vrcp.f32 %v2546_v56  ;;  %v6476_v9 = vadd.f32 %v7455_v57, %v2412_v39  ;;  %v6478_v7 = vmul.f32 %v3287_v5, %v2582_v16  ;;  %v6481_v10 = vmul.f32 0.70710677, %v6464_v48 }
 0x2c9   : > { %3310 = vpow2.f32 %v2813_v54  ;;  %v2612_v58 = vmul.f32 1.0614054, %v6452_v38  ;;  %v3301_v30 = vpop.eup %3300  ;;  %v6484_v35 = vmul.f32 %v3289_v42, %v2591_v26  ;;  %v2611_v12 = vmul.f32 1.0614054, %v6428_v43 }
 0x2ca   : > { %7473 = vst [vmem:[#allocation111_spill] sm:$0xff] %v6476_v9  ;;  %7474 = vst [vmem:[#allocation115_spill] sm:$0xff] %v6481_v10  ;;  %3312 = vpow2.f32 %v2805_v17  ;;  %v6487_v15 = vmul.f32 0.70710677, %v6476_v9  ;;  %v3303_v24 = vpop.eup %3302  ;;  %v2785_v57 = vmul.f32 %v2769_v22, %v2513_v49  ;;  %v2817_v14 = vmul.f32 1.442695, %v2786_v63 }
 0x2cb   : > { %v2509_v5 = vand.u32 2147483647, %v6481_v10  ;;  %v2628_v46 = vadd.f32 -1.4531521, %v2612_v58  ;;  %v6491_v47 = vmul.f32 %v3293_v51, %v2587_v13  ;;  %vm2468_vm5 = vcmp.lt.f32.partialorder %v6282_v4, 0.0 }
 0x2cc   : > { %7475 = vst [vmem:[#allocation55_spill] sm:$0xff] %v6487_v15  ;;  %v2510_v16 = vand.u32 2147483647, %v6487_v15  ;;  %v2627_v42 = vadd.f32 -1.4531521, %v2611_v12  ;;  %v6495_v26 = vpop.eup %3304  ;;  %v2576_v54 = vmul.f32 %v3301_v30, %v6422_v32  ;;  %v2572_v17 = vmul.f32 %v3303_v24, %v6433_v33 }
 0x2cd   : > { %v2525_v60 = vmul.f32 0.3275911, %v2509_v5  ;;  %v2644_v49 = vmul.f32 %v2628_v46, %v6452_v38  ;;  %v2765_v22 = vsub.f32 0.0, %v2509_v5  ;;  %v6501_v13 = vmul.f32 1.442695, %v2785_v57 }
 0x2ce   : > { %v2526_v39 = vmul.f32 0.3275911, %v2510_v16  ;;  %v2766_v63 = vsub.f32 0.0, %v2510_v16  ;;  %v2643_v51 = vmul.f32 %v2627_v42, %v6428_v43  ;;  %3314 = vpow2.f32 %v2817_v14 }
 0x2cf   : > { %v6504_v4 = vsel %vm2468_vm5, -1.0, %v7472_v11  ;;  %v2660_v58 = vadd.f32 1.4214138, %v2644_v49  ;;  %v6506_v12 = vadd.f32 1.0, %v2525_v60  ;;  %v2592_v25 = vsub.f32 2.0, %v2576_v54 }
 0x2d0   : > { %v2542_v32 = vadd.f32 1.0, %v2526_v39  ;;  %v2782_v48 = vmul.f32 %v2766_v63, %v2510_v16  ;;  %v2659_v33 = vadd.f32 1.4214138, %v2643_v51  ;;  %v2588_v46 = vsub.f32 2.0, %v2572_v17 }
 0x2d1   : > { %v3307_v9 = vpop.eup %3306  ;;  %v2676_v10 = vmul.f32 %v2660_v58, %v6452_v38  ;;  %v6510_v2 = vmul.f32 0.5, %v6297_v52  ;;  %v2781_v14 = vmul.f32 %v2765_v22, %v2509_v5  ;;  %vm2470_vm6 = vcmp.lt.f32.partialorder %v6307_v61, 0.0 }
 0x2d2   : > { %v3309_v57 = vpop.eup %3308  ;;  %v2577_v42 = vmul.f32 %v3307_v9, %v2545_v36  ;;  %3316 = vrcp.f32 %v2542_v32  ;;  %v2675_v15 = vmul.f32 %v2659_v33, %v6428_v43  ;;  %v2614_v16 = vmul.f32 1.0614054, %v6478_v7 }
 0x2d3   : > { %v6513_v49 = vpop.eup %3310  ;;  %v2578_v60 = vmul.f32 %v3309_v57, %v2546_v56  ;;  %v2692_v39 = vadd.f32 -0.28449672, %v2676_v10  ;;  %3318 = vrcp.f32 %v6506_v12  ;;  %v2809_v52 = vmul.f32 1.442695, %v2782_v48 }
 0x2d4   : > { %v6517_v54 = vpop.eup %3312  ;;  %v2691_v17 = vadd.f32 -0.28449672, %v2675_v15  ;;  %v2613_v36 = vmul.f32 1.0614054, %v6473_v37  ;;  %v2593_v63 = vsub.f32 2.0, %v2577_v42  ;;  %v2841_v51 = vsub.f32 1.0, %v6341_v19 }
 0x2d5   : > { %v2708_v5 = vmul.f32 %v2692_v39, %v6452_v38  ;;  %v2630_v22 = vadd.f32 -1.4531521, %v2614_v16  ;;  %v6523_v56 = vmul.f32 %v3301_v30, %v2592_v25  ;;  %v2594_v10 = vsub.f32 2.0, %v2578_v60 }
 0x2d6   : > { %v2707_v58 = vmul.f32 %v2691_v17, %v6428_v43  ;;  %v2629_v33 = vadd.f32 -1.4531521, %v2613_v36  ;;  %v6526_v18 = vmul.f32 %v3303_v24, %v2588_v46  ;;  %v6528_v31 = vmul.f32 1.442695, %v2781_v14 }
 0x2d7   : > { %v2724_v48 = vadd.f32 0.2548296, %v2708_v5  ;;  %v2646_v15 = vmul.f32 %v2630_v22, %v6478_v7  ;;  %3320 = vpow2.f32 %v2809_v52  ;;  %v6534_v39 = vsel %vm2470_vm6, -1.0, %v7472_v11 }
 0x2d8   : > { %v2723_v42 = vadd.f32 0.2548296, %v2707_v58  ;;  %v2645_v19 = vmul.f32 %v2629_v33, %v6473_v37  ;;  %v6537_v25 = vpop.eup %3314  ;;  %v6539_v30 = vmul.f32 %v3307_v9, %v2593_v63  ;;  %v2857_v14 = vmul.f32 %v2841_v51, %v6321_v53 }
 0x2d9   : > { %v2740_v24 = vmul.f32 %v2724_v48, %v6452_v38  ;;  %v2662_v46 = vadd.f32 1.4214138, %v2646_v15  ;;  %v6543_v60 = vmul.f32 %v3309_v57, %v2594_v10  ;;  %v6547_v61 = vmul.f32 0.5, %v6396_v21 }
 0x2da   : > { %v2739_v16 = vmul.f32 %v2723_v42, %v6428_v43  ;;  %v2661_v52 = vadd.f32 1.4214138, %v2645_v19  ;;  %v6552_v9 = vmul.f32 0.5, %v6383_v27  ;;  %v2620_v38 = vmul.f32 1.0614054, %v6526_v18 }
 0x2db   : > { %v2820_v17 = vmul.f32 %v6430_v6, %v2740_v24  ;;  %v2678_v36 = vmul.f32 %v2662_v46, %v6478_v7  ;;  %vm2476_vm7 = vcmp.lt.f32.partialorder %v6408_v50, 0.0  ;;  %v2624_v43 = vmul.f32 1.0614054, %v6523_v56 }
 0x2dc   : > { %v3317_v63 = vpop.eup %3316  ;;  %v2819_v53 = vmul.f32 %v6412_v0, %v2739_v16  ;;  %v2677_v57 = vmul.f32 %v2661_v52, %v6473_v37  ;;  %v2873_v22 = vadd.f32 1.0, %v2857_v14  ;;  %v2636_v6 = vadd.f32 -1.4531521, %v2620_v38 }
 0x2dd   : > { %v2836_v21 = vsub.f32 1.0, %v2820_v17  ;;  %v2694_v5 = vadd.f32 -0.28449672, %v2678_v36  ;;  %v3319_v51 = vpop.eup %3318  ;;  %v2574_v10 = vmul.f32 %v3317_v63, %v2542_v32  ;;  %v2640_v33 = vadd.f32 -1.4531521, %v2624_v43 }
 0x2de   : > { %v2835_v58 = vsub.f32 1.0, %v2819_v53  ;;  %v2693_v27 = vadd.f32 -0.28449672, %v2677_v57  ;;  %vm2480_vm8 = vcmp.lt.f32.partialorder %v6393_v55, 0.0  ;;  %v2652_v0 = vmul.f32 %v2636_v6, %v6526_v18 }
 0x2df   : > { %v2852_v48 = vmul.f32 %v2836_v21, %v6504_v4  ;;  %v2710_v15 = vmul.f32 %v2694_v5, %v6478_v7  ;;  %v6568_v24 = vsel %vm2476_vm7, -1.0, %v7472_v11  ;;  %v2656_v32 = vmul.f32 %v2640_v33, %v6523_v56 }
 0x2e0   : > { %v2851_v42 = vmul.f32 %v2835_v58, %v6349_v59  ;;  %v2709_v19 = vmul.f32 %v2693_v27, %v6473_v37  ;;  %v2573_v46 = vmul.f32 %v3319_v51, %v6506_v12  ;;  %v2668_v16 = vadd.f32 1.4214138, %v2652_v0 }
 0x2e1   : > { %v2868_v4 = vadd.f32 1.0, %v2852_v48  ;;  %v2726_v14 = vadd.f32 0.2548296, %v2710_v15  ;;  %v6572_v52 = vpop.eup %3320  ;;  %v2590_v17 = vsub.f32 2.0, %v2574_v10  ;;  %v2672_v59 = vadd.f32 1.4214138, %v2656_v32 }
 0x2e2   : > { %v2867_v36 = vadd.f32 1.0, %v2851_v42  ;;  %v2725_v38 = vadd.f32 0.2548296, %v2709_v19  ;;  %v2684_v50 = vmul.f32 %v2668_v16, %v6526_v18  ;;  %v2619_v43 = vmul.f32 1.0614054, %v6491_v47 }
 0x2e3   : > { %v2884_v53 = vmul.f32 %v2868_v4, %v6359_v3  ;;  %v2742_v57 = vmul.f32 %v2726_v14, %v6478_v7  ;;  %v2688_v5 = vmul.f32 %v2672_v59, %v6523_v56  ;;  %v2623_v6 = vmul.f32 1.0614054, %v6484_v35 }
 0x2e4   : > { %v2883_v21 = vmul.f32 %v2867_v36, %v6336_v40  ;;  %v2741_v12 = vmul.f32 %v2725_v38, %v6473_v37  ;;  %v2700_v27 = vadd.f32 -0.28449672, %v2684_v50  ;;  %v2635_v3 = vadd.f32 -1.4531521, %v2619_v43 }
 0x2e5   : > { %v3204_v10 = vpack.c.bf16 %v6326_v20, %v2884_v53  ;;  %v2822_v58 = vmul.f32 %v6460_v8, %v2742_v57  ;;  %v2704_v48 = vadd.f32 -0.28449672, %v2688_v5  ;;  %v2639_v15 = vadd.f32 -1.4531521, %v2623_v6 }
 0x2e6   : > { %v3206_v7 = vpack.c.bf16 %v6329_v44, %v2883_v21  ;;  %v2821_v33 = vmul.f32 %v6458_v28, %v2741_v12  ;;  %v2589_v0 = vsub.f32 2.0, %v2573_v46  ;;  %v2716_v37 = vmul.f32 %v2700_v27, %v6526_v18 }
 0x2e7   : > { %3205 = vmatprep.subr.bf16.mxu0 %v3204_v10  ;;  %v2838_v40 = vsub.f32 1.0, %v2822_v58  ;;  %v2651_v42 = vmul.f32 %v2635_v3, %v6491_v47  ;;  %v6588_v19 = vmul.f32 %v3317_v63, %v2590_v17  ;;  %v2720_v8 = vmul.f32 %v2704_v48, %v6523_v56 }
 0x2e8   : > { %3207 = vmatpush1.bf16.msra.mxu0 %v3206_v7  ;;  %v2837_v20 = vsub.f32 1.0, %v2821_v33  ;;  %v2655_v32 = vmul.f32 %v2639_v15, %v6484_v35  ;;  %v2496_v28 = vsel %vm2480_vm8, -1.0, %v7472_v11  ;;  %v2732_v46 = vadd.f32 0.2548296, %v2716_v37 }
 0x2e9   : > { %v2854_v44 = vmul.f32 %v2838_v40, %v6534_v39  ;;  %v2667_v4 = vadd.f32 1.4214138, %v2651_v42  ;;  %v2889_v16 = vmul.f32 %v2873_v22, %v5963_v23  ;;  %v2736_v63 = vadd.f32 0.2548296, %v2720_v8 }
 0x2ea   : > { %v2853_v14 = vmul.f32 %v2837_v20, %v6403_v29  ;;  %v2671_v17 = vadd.f32 1.4214138, %v2655_v32  ;;  %v6598_v36 = vmul.f32 %v3319_v51, %v2589_v0  ;;  %v2748_v59 = vmul.f32 %v2732_v46, %v6526_v18 }
 0x2eb   : > { %v2870_v38 = vadd.f32 1.0, %v2854_v44  ;;  %v2683_v53 = vmul.f32 %v2667_v4, %v6491_v47  ;;  %v2752_v57 = vmul.f32 %v2736_v63, %v6523_v56  ;;  %v2622_v50 = vmul.f32 1.0614054, %v6588_v19 }
 0x2ec   : > { %v2869_v39 = vadd.f32 1.0, %v2853_v14  ;;  %v2687_v55 = vmul.f32 %v2671_v17, %v6484_v35  ;;  %v2828_v23 = vmul.f32 %v6517_v54, %v2748_v59  ;;  %v2626_v51 = vmul.f32 1.0614054, %v6543_v60 }
 0x2ed   : > { %v2886_v29 = vmul.f32 %v2870_v38, %v6510_v2  ;;  %v2699_v22 = vadd.f32 -0.28449672, %v2683_v53  ;;  %v2832_v18 = vmul.f32 %v6513_v49, %v2752_v57  ;;  %v2638_v12 = vadd.f32 -1.4531521, %v2622_v50  ;;  %v7476_v50 = vld [vmem:[#allocation98_spill] sm:$0xff] }
 0x2ee   : > { %v2885_v43 = vmul.f32 %v2869_v39, %v6363_v62  ;;  %v2703_v21 = vadd.f32 -0.28449672, %v2687_v55  ;;  %v2844_v56 = vsub.f32 1.0, %v2828_v23  ;;  %v2642_v10 = vadd.f32 -1.4531521, %v2626_v51 }
 0x2ef   : > { %v3212_v5 = vpack.c.bf16 %v6338_v45, %v2886_v29  ;;  %v2715_v6 = vmul.f32 %v2699_v22, %v6491_v47  ;;  %v2848_v27 = vsub.f32 1.0, %v2832_v18  ;;  %v2654_v54 = vmul.f32 %v2638_v12, %v6588_v19 }
 0x2f0   : > { %v3214_v58 = vpack.c.bf16 %v2889_v16, %v2885_v43  ;;  %v2719_v2 = vmul.f32 %v2703_v21, %v6484_v35  ;;  %v2860_v3 = vmul.f32 %v2844_v56, %v6568_v24  ;;  %v2658_v49 = vmul.f32 %v2642_v10, %v6543_v60  ;;  %v7477_v43 = vld [vmem:[#allocation97_spill] sm:$0xff] }
 0x2f1   : > { %3213 = vmatprep.subr.bf16.mxu1 %v3212_v5  ;;  %v2731_v62 = vadd.f32 0.2548296, %v2715_v6  ;;  %v2621_v7 = vmul.f32 1.0614054, %v6598_v36  ;;  %v2864_v45 = vmul.f32 %v2848_v27, %v2496_v28  ;;  %v2670_v48 = vadd.f32 1.4214138, %v2654_v54 }
 0x2f2   : > { %3215 = vmatpush1.bf16.msra.mxu1 %v3214_v58  ;;  %v2735_v33 = vadd.f32 0.2548296, %v2719_v2  ;;  %v2625_v15 = vmul.f32 1.0614054, %v6539_v30  ;;  %v2876_v0 = vadd.f32 1.0, %v2860_v3  ;;  %3322 = vpow2.f32 %v6528_v31  ;;  %v7478_v6 = vld [vmem:[#allocation55_spill] sm:$0xff] }
 0x2f3   : > { %v2747_v40 = vmul.f32 %v2731_v62, %v6491_v47  ;;  %v2674_v37 = vadd.f32 1.4214138, %v2658_v49  ;;  %v2637_v42 = vadd.f32 -1.4531521, %v2621_v7  ;;  %v2880_v20 = vadd.f32 1.0, %v2864_v45  ;;  %v7479_v27 = vld [vmem:[#allocation113_spill] sm:$0xff] }
 0x2f4   : > { %v2751_v8 = vmul.f32 %v2735_v33, %v6484_v35  ;;  %v2686_v24 = vmul.f32 %v2670_v48, %v6588_v19  ;;  %v2641_v32 = vadd.f32 -1.4531521, %v2625_v15  ;;  %v2892_v44 = vmul.f32 %v2876_v0, %v6547_v61  ;;  %v7480_v0 = vld [vmem:[#allocation115_spill] sm:$0xff] }
 0x2f5   : > { %v2827_v46 = vmul.f32 %v6495_v26, %v2747_v40  ;;  %v2690_v28 = vmul.f32 %v2674_v37, %v6543_v60  ;;  %v2653_v4 = vmul.f32 %v2637_v42, %v6598_v36  ;;  %v2896_v14 = vmul.f32 %v2880_v20, %v6552_v9  ;;  %v7481_v42 = vld [vmem:[#allocation39_spill] sm:$0xff] }
 0x2f6   : > { %v2831_v47 = vmul.f32 %v6466_v1, %v2751_v8  ;;  %v2702_v16 = vadd.f32 -0.28449672, %v2686_v24  ;;  %v2657_v63 = vmul.f32 %v2641_v32, %v6539_v30  ;;  %3324 = vpow2.f32 %v6501_v13  ;;  %v7482_v20 = vld [vmem:[#allocation111_spill] sm:$0xff]  ;;  %v7483_v32 = vld [vmem:[#allocation68_spill] sm:$0xff] }
 0x2f7   : > { %v2843_v35 = vsub.f32 1.0, %v2827_v46  ;;  %v2706_v17 = vadd.f32 -0.28449672, %v2690_v28  ;;  %v2669_v38 = vadd.f32 1.4214138, %v2653_v4  ;;  %v3208_v59 = vpack.c.bf16 %v2896_v14, %v2892_v44 }
 0x2f8   : > { %v2847_v61 = vsub.f32 1.0, %v2831_v47  ;;  %v2718_v26 = vmul.f32 %v2702_v16, %v6588_v19  ;;  %v2673_v53 = vadd.f32 1.4214138, %v2657_v63  ;;  %v2443_v29 = vmul.f32 0.5, %v7476_v50  ;;  %v2900_v16 = vld [vmem:[%s6684_s6 + $0x8] sm:$0xff] }
 0x2f9   : > { %v2859_v39 = vmul.f32 %v2843_v35, %v6471_v41  ;;  %v2722_v9 = vmul.f32 %v2706_v17, %v6543_v60  ;;  %v2685_v1 = vmul.f32 %v2669_v38, %v6598_v36  ;;  %3209 = vmatprep.subr.bf16.mxu0 %v3208_v59  ;;  %v2447_v18 = vmul.f32 0.5, %v7477_v43  ;;  %v7485_v59 = vld [vmem:[#allocation36_spill] sm:$0xff] }
 0x2fa   : > { %v2863_v57 = vmul.f32 %v2847_v61, %v6420_v34  ;;  %v2734_v31 = vadd.f32 0.2548296, %v2718_v26  ;;  %v2689_v55 = vmul.f32 %v2673_v53, %v6539_v30  ;;  %vm2478_vm9 = vcmp.lt.f32.partialorder %v7478_v6, 0.0 }
 0x2fb   : > { %v2875_v23 = vadd.f32 1.0, %v2859_v39  ;;  %v2738_v22 = vadd.f32 0.2548296, %v2722_v9  ;;  %v2701_v51 = vadd.f32 -0.28449672, %v2685_v1  ;;  %vm2482_vm10 = vcmp.lt.f32.partialorder %v7479_v27, 0.0 }
 0x2fc   : > { %v2879_v13 = vadd.f32 1.0, %v2863_v57  ;;  %v2750_v41 = vmul.f32 %v2734_v31, %v6588_v19  ;;  %v2705_v21 = vadd.f32 -0.28449672, %v2689_v55  ;;  %v3323_v49 = vpop.eup %3322  ;;  %vm2913_vm11 = vcmask 261120   ;;  %v7486_v39 = vld [vmem:[#allocation96_spill] sm:$0xff] }
 0x2fd   : > { %v2891_v12 = vmul.f32 %v2875_v23, %v2443_v29  ;;  %v2754_v5 = vmul.f32 %v2738_v22, %v6543_v60  ;;  %v2717_v56 = vmul.f32 %v2701_v51, %v6598_v36  ;;  %v2494_v60 = vsel %vm2478_vm9, -1.0, %v7472_v11  ;;  %v2911_v51 = vpop.permute.xlu1 %2910 }
 0x2fe   : > { %v2895_v34 = vmul.f32 %v2879_v13, %v2447_v18  ;;  %v2830_v10 = vmul.f32 %v6572_v52, %v2750_v41  ;;  %v2721_v58 = vmul.f32 %v2705_v21, %v6539_v30  ;;  %v2899_v52 = vld [vmem:[%s6684_s6] sm:$0xff]  ;;  %v2498_v33 = vsel %vm2482_vm10, -1.0, %v7472_v11 }
 0x2ff   : > { %v2834_v2 = vmul.f32 %v6537_v25, %v2754_v5  ;;  %v2733_v54 = vadd.f32 0.2548296, %v2717_v56  ;;  %vm2477_vm12 = vcmp.lt.f32.partialorder %v7480_v0, 0.0  ;;  %vm2481_vm13 = vcmp.lt.f32.partialorder %v7481_v42, 0.0 }
 0x300   : > { %v3210_v3 = vpack.c.bf16 %v2895_v34, %v2891_v12  ;;  %v2846_v19 = vsub.f32 1.0, %v2830_v10  ;;  %v2737_v62 = vadd.f32 0.2548296, %v2721_v58  ;;  %v3325_v15 = vpop.eup %3324  ;;  %v2450_v44 = vmul.f32 0.5, %v7483_v32 }
 0x301   : > { %v2850_v7 = vsub.f32 1.0, %v2834_v2  ;;  %v2749_v45 = vmul.f32 %v2733_v54, %v6598_v36  ;;  %v2446_v36 = vmul.f32 0.5, %v7482_v20  ;;  %v2493_v4 = vsel %vm2477_vm12, -1.0, %v7472_v11 }
 0x302   : > { %3211 = vmatpush1.bf16.msra.mxu0 %v3210_v3  ;;  %v2862_v48 = vmul.f32 %v2846_v19, %v2494_v60  ;;  %v2753_v25 = vmul.f32 %v2737_v62, %v6539_v30  ;;  %v7484_v47 = vmov 0.0   ;;  %v2497_v63 = vsel %vm2481_vm13, -1.0, %v7472_v11  ;;  %v2906_v11 = vpop.permute.xlu0 %2905 }
 0x303   : > { %v2866_v40 = vmul.f32 %v2850_v7, %v2498_v33  ;;  %v2829_v37 = vmul.f32 %v3323_v49, %v2749_v45  ;;  %v2445_v61 = vmul.f32 0.5, %v7485_v59  ;;  %v2449_v9 = vmul.f32 0.5, %v7486_v39 }
 0x304   : > { %v2878_v8 = vadd.f32 1.0, %v2862_v48  ;;  %v2833_v24 = vmul.f32 %v3325_v15, %v2753_v25 }
 0x305   : > { %3188 = vmatmul.mubr.msk.f32.vlgmr.msra.gmra.mrb[8].mxu0 %vm2913_vm11, %v2899_v52  ;;  %v2882_v46 = vadd.f32 1.0, %v2866_v40  ;;  %v2845_v28 = vsub.f32 1.0, %v2829_v37 }
 0x306   : > { %v2894_v30 = vmul.f32 %v2878_v8, %v2446_v36  ;;  %v2849_v14 = vsub.f32 1.0, %v2833_v24  ;;  %2990 = vmatprep.mubr.f32.mxu0 %v7484_v47 }
 0x307   : > { %v2898_v35 = vmul.f32 %v2882_v46, %v2450_v44  ;;  %v2861_v17 = vmul.f32 %v2845_v28, %v2493_v4 }
 0x308   : > { %v2865_v38 = vmul.f32 %v2849_v14, %v2497_v63 }
 0x309   : > { %v3216_v26 = vpack.c.bf16 %v2898_v35, %v2894_v30  ;;  %v2877_v53 = vadd.f32 1.0, %v2861_v17  ;;  %3189 = vmatmul.mubr.msk.f32.gmra.mrb[10].mxu0 %vm2913_vm11, %v2900_v16 }
 0x30a   : > { %v2881_v1 = vadd.f32 1.0, %v2865_v38 }
 0x30b   : > { %3217 = vmatprep.subr.bf16.mxu1 %v3216_v26  ;;  %v2893_v57 = vmul.f32 %v2877_v53, %v2445_v61 }
 0x30c   : > { %v2897_v31 = vmul.f32 %v2881_v1, %v2449_v9 }
 0x30e   : > { %v3218_v55 = vpack.c.bf16 %v2897_v31, %v2893_v57 }
 0x310   : > { %3219 = vmatpush1.bf16.msra.mxu1 %v3218_v55 }
 0x313   : > { %3190 = vmatmul.mubr.msk.f32.vlgmr.msra.gmra.mrb[8].mxu1 %vm2913_vm11, %v2899_v52 }
 0x314   : > { %3067 = vmatprep.mubr.f32.mxu1 %v7484_v47 }
 0x317   : > { %3191 = vmatmul.mubr.msk.f32.gmra.mrb[10].mxu1 %vm2913_vm11, %v2900_v16 }
 0x3d8   : > { %v2986_v50 = vpop.f32.mrb[8].mxu0 }
 0x3d9   : > { %v2987_v29 = vadd.f32 %v2986_v50, %v2906_v11  ;;  %v2988_v23 = vpop.f32.mrb[9].mxu0 }
 0x3da   : > { %v2989_v22 = vadd.f32 %v2988_v23, %v2906_v11 }
 0x3db   : > { %3074 = vst [vmem:[%s332_s0] sm:$0xff] %v2987_v29 }
 0x3dc   : > { %3075 = vst [vmem:[%s332_s0 + $0x8] sm:$0xff] %v2989_v22  ;;  %v2992_v43 = vpop.f32.mrb[10].mxu0 }
 0x3dd   : > { %v2993_v18 = vadd.f32 %v2992_v43, %v2911_v51  ;;  %v2994_v13 = vpop.f32.mrb[11].mxu0 }
 0x3de   : > { %v2995_v41 = vadd.f32 %v2994_v13, %v2911_v51 }
 0x3df   : > { %3078 = vst [vmem:[%s332_s0 + $0x20] sm:$0xff] %v2993_v18 }
 0x3e0   : > { %3079 = vst [vmem:[%s332_s0 + $0x28] sm:$0xff] %v2995_v41 }
 0x3e6   : > { %v3063_v21 = vpop.f32.mrb[8].mxu1 }
 0x3e7   : > { %v3064_v12 = vadd.f32 %v3063_v21, %v2906_v11  ;;  %v3065_v5 = vpop.f32.mrb[9].mxu1 }
 0x3e8   : > { %v3066_v56 = vadd.f32 %v3065_v5, %v2906_v11 }
 0x3e9   : > { %3076 = vst [vmem:[%s332_s0 + $0x10] sm:$0xff] %v3064_v12 }
 0x3ea   : > { %3077 = vst [vmem:[%s332_s0 + $0x18] sm:$0xff] %v3066_v56  ;;  %v3069_v34 = vpop.f32.mrb[10].mxu1 }
 0x3eb   : > { %v3070_v6 = vadd.f32 %v3069_v34, %v2911_v51  ;;  %v3071_v10 = vpop.f32.mrb[11].mxu1 }
 0x3ec   : > { %v3072_v58 = vadd.f32 %v3071_v10, %v2911_v51 }
 0x3ed   : > { %3080 = vst [vmem:[%s332_s0 + $0x30] sm:$0xff] %v3070_v6 }
 0x3ee   : > { %3081 = vst [vmem:[%s332_s0 + $0x38] sm:$0xff] %v3072_v58 }
 0x3ef PF: > { %s20_s27 = sadd.s32 1, %s3370_s27  }
 0x3f0   : > { %p17_p5 = scmp.ge.s32.totalorder %s20_s27, 6  }
 0x3f2   :  { %19 = sbr.rel (!%p17_p5) target bundleno = 5 (0x5), region = 98 }
 0x3f9   :  { %3103 = vsyncpa [#allocation6], 1 }
 0x3fa   :  { %3105 = vsyncpa [#allocation6 + $0x1], 1 }
 0x3fb   :  { %3106 = vsyncpa [#allocation8], 1 }

</bundles_post_ra>
